<compile_context>
chip_gen: v7x
topology: tpu7x:2x2x1
jax: 0.10.0
libtpu: 0.0.40
codegen_flags: <defaults>
</compile_context>

<pallas_src>
import numpy as np
import jax
import jax.numpy as jnp
from jax.experimental import pallas as pl
from jax.experimental.pallas import tpu as pltpu

# ----- scaled-down hyper-parameters, consistent with GRUNet.forward ----------
CAT_DICT = {"cat1": (11, 8), "cat2": (7, 4)}   # name -> (vocab+1, emb_dim)
NUM_NUMERIC = 3
VOCAB = 50
RNN_INPUT = 32          # word embedding dim == GRU input size
HIDDEN = 16             # GRU hidden size
L_WORDS = 8             # words per sample (original code hard-codes 100)
BATCH = 4               # samples per request (== GRU sequence length; batch_first=False)
REQ_PER_BLOCK = 16      # requests fused per grid step -> 16*8 = 128 MXU rows
NGROUPS = 2             # grid size ("parallel" axis; v7x second TensorCore)
NREQ = NGROUPS * REQ_PER_BLOCK
EMB_SUM = sum(v[1] for v in CAT_DICT.values())
FEAT_DIM = EMB_SUM + NUM_NUMERIC
INPUT_LAYERS = FEAT_DIM + L_WORDS * HIDDEN * 2   # = 271
BN_EPS = 1e-5


# ------------------------------- Pallas kernel -------------------------------
def grunet_kernel(xwp_ref, feat_ref, wx_ref, wh_ref, w1g_ref, w1f_ref,
                  w2_ref, w3_ref, misc_ref, out_ref, gx_scr, gru_scr):
    T, GL, din2 = xwp_ref.shape
    H2 = gru_scr.shape[-1]              # 2H   (fused [h_f | h_b])
    H = H2 // 2
    G6 = gx_scr.shape[-1]               # 6H   (fused gates [r_f r_b z_f z_b n_f n_b])
    H4 = 2 * H2                         # 4H
    L = w1g_ref.shape[0]
    G = GL // L
    N2 = w2_ref.shape[1]

    # ---- packed small parameters (one DMA for all 1-row vectors) ------------
    bx = misc_ref[0:1, 0:G6]            # input bias (+ folded hidden r/z biases)
    bh_n = misc_ref[1:2, 0:H2]          # hidden n-gate bias (lives inside r*(...))
    b1 = misc_ref[2:3, :]
    b2 = misc_ref[3:4, 0:N2]
    b3 = misc_ref[4:5, 0:1]
    a1 = misc_ref[5:6, 0:1]             # PReLU alphas
    a2 = misc_ref[6:7, 0:1]

    # ---- hoisted input projection: both directions, all timesteps, one matmul
    xp = xwp_ref[...].reshape(T * GL, din2)
    gx_scr[...] = (jnp.dot(xp, wx_ref[...], preferred_element_type=jnp.float32)
                   + bx).reshape(T, GL, G6)

    wh = wh_ref[...]                    # (2H, 6H) bf16, block-diagonal fused fwd/bwd

    # ---- fused bidirectional recurrence: T serial steps, one MXU push each ---
    # TODO(synk): for realistic T (100-word sequences / larger sample batches)
    # replace this static unroll with lax.fori_loop(unroll<=4) + scratch-carried h.
    h = None
    for i in range(T):
        g_x = gx_scr[i]                                   # (GL, 6H)
        if i == 0:                                        # h == 0 -> skip matmul
            rz = jax.nn.sigmoid(g_x[:, 0:H4])
            r_ = rz[:, 0:H2]
            z_ = rz[:, H2:H4]
            n_ = jnp.tanh(g_x[:, H4:G6] + r_ * bh_n)
            h = (1.0 - z_) * n_
        else:
            g_h = jnp.dot(h.astype(jnp.bfloat16), wh,
                          preferred_element_type=jnp.float32)
            rz = jax.nn.sigmoid(g_x[:, 0:H4] + g_h[:, 0:H4])   # r|z: one EUP call
            r_ = rz[:, 0:H2]
            z_ = rz[:, H2:H4]
            n_ = jnp.tanh(g_x[:, H4:G6] + r_ * (g_h[:, H4:G6] + bh_n))
            h = (1.0 - z_) * n_ + z_ * h
        gru_scr[i] = h                                    # one contiguous store

    # ---- backward half was produced in reversed time order: swap once -------
    bwd = [gru_scr[i, :, H:H2] for i in range(T)]
    for i in range(T):
        gru_scr[i, :, H:H2] = bwd[T - 1 - i]

    # ---- regression head (dropout = identity; BatchNorm folded into w2/w3) --
    TG = T * G
    h1 = jnp.dot(feat_ref[...], w1f_ref[...],
                 preferred_element_type=jnp.float32) + b1        # (TG, 128)
    for l in range(L):                        # avoids lane-crossing (T,L,2H)->(T,L*2H)
        blk = gru_scr[:, l * G:(l + 1) * G, :].reshape(TG, H2)   # rows = t*G + g
        h1 = h1 + jnp.dot(blk, w1g_ref[l], preferred_element_type=jnp.float32)
    h1 = jnp.where(h1 >= 0.0, h1, a1 * h1)                       # PReLU
    h2 = jnp.dot(h1, w2_ref[...], preferred_element_type=jnp.float32) + b2
    h2 = jnp.where(h2 >= 0.0, h2, a2 * h2)
    y = jnp.dot(h2, w3_ref[...], preferred_element_type=jnp.float32) + b3
    out_ref[...] = jax.nn.sigmoid(y)


# ------------------------------- wrapper (glue) -------------------------------
def _fuse_gru_weights(g):
    """Fused weights, gate-major lanes [r_f r_b z_f z_b n_f n_b] (each H wide)."""
    H = HIDDEN
    Din = RNN_INPUT
    zx = jnp.zeros((Din, H), jnp.float32)
    zh = jnp.zeros((H, H), jnp.float32)
    wx_f, wx_b = g["wx_f"], g["wx_b"]          # (Din, 3H), PyTorch order [r|z|n]
    wh_f, wh_b = g["wh_f"], g["wh_b"]          # (H, 3H)

    # rows 0:Din act on x[t] (forward), rows Din:2Din act on x[T-1-t] (backward)
    wx_top = jnp.concatenate([wx_f[:, 0:H], zx, wx_f[:, H:2 * H], zx, wx_f[:, 2 * H:], zx], axis=1)
    wx_bot = jnp.concatenate([zx, wx_b[:, 0:H], zx, wx_b[:, H:2 * H], zx, wx_b[:, 2 * H:]], axis=1)
    wx_big = jnp.concatenate([wx_top, wx_bot], axis=0)           # (2Din, 6H)

    # rows 0:H act on h_f, rows H:2H act on h_b (block-diagonal per gate)
    wh_top = jnp.concatenate([wh_f[:, 0:H], zh, wh_f[:, H:2 * H], zh, wh_f[:, 2 * H:], zh], axis=1)
    wh_bot = jnp.concatenate([zh, wh_b[:, 0:H], zh, wh_b[:, H:2 * H], zh, wh_b[:, 2 * H:]], axis=1)
    wh_big = jnp.concatenate([wh_top, wh_bot], axis=0)           # (2H, 6H)

    def fuse_bias(bf, bb):
        return jnp.concatenate([bf[:, 0:H], bb[:, 0:H],
                                bf[:, H:2 * H], bb[:, H:2 * H],
                                bf[:, 2 * H:], bb[:, 2 * H:]], axis=1)   # (1, 6H)

    return wx_big, fuse_bias(g["bx_f"], g["bx_b"]), wh_big, fuse_bias(g["bh_f"], g["bh_b"])


def grunet_forward(params, x_cat, x_num, x_words):
    """x_cat (R,T,2) int32, x_num (R,T,3) f32, x_words (R,T,L) int32; R = NGROUPS*G."""
    R, T = x_cat.shape[0], x_cat.shape[1]
    G, L, H, Din = REQ_PER_BLOCK, L_WORDS, HIDDEN, RNN_INPUT
    GL = L * G

    # Embedding lookups (gathers) + dropout (identity in inference) are wrapper glue.
    embs = [params["emb"][name][x_cat[..., i]] for i, name in enumerate(CAT_DICT)]
    feat = jnp.concatenate(embs + [x_num.astype(jnp.float32)], axis=-1)    # (R,T,15)
    xw = params["word_emb"][x_words].astype(jnp.float32)                   # (R,T,L,Din)

    # ---- layout: requests grouped, GRU rows l-major / g-minor, head rows t*G+g
    xw_g = xw.reshape(NGROUPS, G, T, L, Din)
    xw_tl = jnp.transpose(xw_g, (0, 2, 3, 1, 4)).reshape(NGROUPS, T, GL, Din)
    # pair x[t] with x[T-1-t] so both directions share one hoisted projection
    xw_pair = jnp.concatenate([xw_tl, jnp.flip(xw_tl, axis=1)], axis=-1)
    xw_pair = xw_pair.reshape(NGROUPS * T, GL, 2 * Din)

    feat_g = feat.reshape(NGROUPS, G, T, FEAT_DIM)
    feat_tg = jnp.transpose(feat_g, (0, 2, 1, 3)).reshape(NGROUPS * T * G, FEAT_DIM)

    # ---- weight fusion / folding (wrapper glue) ------------------------------
    g_, r_ = params["gru"], params["reg"]
    wx_big, bx_big, wh_big, bh_big = _fuse_gru_weights(g_)
    bx_fold = bx_big.at[:, 0:4 * H].add(bh_big[:, 0:4 * H])    # fold hidden r/z biases
    bh_n = bh_big[:, 4 * H:6 * H]                               # stays inside r*( )

    n_gru = L * 2 * H
    w1g = r_["w1"][:n_gru].reshape(L, 2 * H, 128)               # per-word head weights
    w1f = r_["w1"][n_gru:]                                      # (15, 128)
    w2_fold = r_["w2"] * r_["s1"].reshape(-1, 1)                # BatchNorm1d folded
    b2_fold = r_["b2"] + r_["t1"] @ r_["w2"]
    w3_fold = r_["w3"] * r_["s2"].reshape(-1, 1)
    b3_fold = r_["b3"] + r_["t2"] @ r_["w3"]

    misc = jnp.zeros((8, 128), jnp.float32)
    misc = misc.at[0, 0:6 * H].set(bx_fold[0])
    misc = misc.at[1, 0:2 * H].set(bh_n[0])
    misc = misc.at[2, :].set(r_["b1"][0])
    misc = misc.at[3, 0:64].set(b2_fold[0])
    misc = misc.at[4, 0].set(b3_fold[0, 0])
    misc = misc.at[5, 0].set(r_["a1"][0, 0])
    misc = misc.at[6, 0].set(r_["a2"][0, 0])

    ins = [xw_pair, feat_tg, wx_big, wh_big.astype(jnp.bfloat16),
           w1g, w1f, w2_fold, w3_fold, misc]
    cidx2 = lambda b: (0, 0)                                    # weights: DMA once
    in_specs = [
        pl.BlockSpec((T, GL, 2 * Din), lambda b: (b, 0, 0)),    # per-group data
        pl.BlockSpec((T * G, FEAT_DIM), lambda b: (b, 0)),      # per-group data
        pl.BlockSpec((2 * Din, 6 * H), cidx2),
        pl.BlockSpec((2 * H, 6 * H), cidx2),
        pl.BlockSpec((L, 2 * H, 128), lambda b: (0, 0, 0)),
        pl.BlockSpec((FEAT_DIM, 128), cidx2),
        pl.BlockSpec((128, 64), cidx2),
        pl.BlockSpec((64, 1), cidx2),
        pl.BlockSpec((8, 128), cidx2),
    ]
    out_flat = pl.pallas_call(
        grunet_kernel,
        out_shape=jax.ShapeDtypeStruct((NGROUPS * T * G, 1), jnp.float32),
        grid=(NGROUPS,),
        in_specs=in_specs,
        out_specs=pl.BlockSpec((T * G, 1), lambda b: (b, 0)),
        scratch_shapes=[
            pltpu.VMEM((T, GL, 6 * H), jnp.float32),            # precomputed input gates
            pltpu.VMEM((T, GL, 2 * H), jnp.float32),            # fused GRU outputs
        ],
        compiler_params=pltpu.CompilerParams(
            dimension_semantics=("parallel",),
            vmem_limit_bytes=32 * 1024 * 1024),                 # sized for v7x's 64 MiB VMEM
    )(*ins)

    out = out_flat.reshape(NGROUPS, T, G, 1)
    return jnp.transpose(out, (0, 2, 1, 3)).reshape(R, T, 1)


# ----------------------------- parameter creation -----------------------------
def init_params(key):
    keys = iter(jax.random.split(key, 64))

    def unif(shape, bound):
        return jax.random.uniform(next(keys), shape, jnp.float32, -bound, bound)

    emb = {name: jax.random.normal(next(keys), (v[0], v[1]), jnp.float32) * 0.3
           for name, v in CAT_DICT.items()}
    word_emb = jax.random.normal(next(keys), (VOCAB, RNN_INPUT), jnp.float32) * 0.5

    std = 1.0 / np.sqrt(HIDDEN)
    gru = {}
    for d in ("f", "b"):
        gru[f"wx_{d}"] = unif((RNN_INPUT, 3 * HIDDEN), std)   # [r|z|n]
        gru[f"wh_{d}"] = unif((HIDDEN, 3 * HIDDEN), std)
        gru[f"bx_{d}"] = unif((1, 3 * HIDDEN), std)
        gru[f"bh_{d}"] = unif((1, 3 * HIDDEN), std)

    def bn_fold(n):
        gamma = jax.random.uniform(next(keys), (1, n), jnp.float32, 0.8, 1.2)
        beta = jax.random.normal(next(keys), (1, n), jnp.float32) * 0.1
        mean = jax.random.normal(next(keys), (1, n), jnp.float32) * 0.1
        var = jax.random.uniform(next(keys), (1, n), jnp.float32, 0.5, 1.5)
        scale = gamma / jnp.sqrt(var + BN_EPS)
        shift = beta - mean * scale
        return scale, shift

    s1, t1 = bn_fold(128)
    s2, t2 = bn_fold(64)
    reg = {
        "w1": unif((INPUT_LAYERS, 128), 1.0 / np.sqrt(INPUT_LAYERS)),
        "b1": unif((1, 128), 1.0 / np.sqrt(INPUT_LAYERS)),
        "a1": jnp.full((1, 1), 0.25, jnp.float32),            # PReLU default
        "s1": s1, "t1": t1,
        "w2": unif((128, 64), 1.0 / np.sqrt(128)),
        "b2": unif((1, 64), 1.0 / np.sqrt(128)),
        "a2": jnp.full((1, 1), 0.25, jnp.float32),
        "s2": s2, "t2": t2,
        "w3": unif((64, 1), 1.0 / np.sqrt(64)),
        "b3": unif((1, 1), 1.0 / np.sqrt(64)),
    }
    return {"emb": emb, "word_emb": word_emb, "gru": gru, "reg": reg}


# ------------------------ pure-JAX reference (checking) ------------------------
def reference_single(params, x_cat, x_num, x_words):
    """Reference for ONE request: x_cat (T,2), x_num (T,3), x_words (T,L)."""
    embs = [params["emb"][name][x_cat[:, i]] for i, name in enumerate(CAT_DICT)]
    x_embeds = jnp.concatenate(embs, axis=1)
    xw = params["word_emb"][x_words].astype(jnp.float32)        # (T, L, Din)
    g, r = params["gru"], params["reg"]
    H = HIDDEN
    T = xw.shape[0]

    def run_dir(wx, wh, bx, bh, reverse):
        h = jnp.zeros((L_WORDS, H), jnp.float32)
        out = [None] * T
        order = range(T - 1, -1, -1) if reverse else range(T)
        for t in order:
            gx = jnp.dot(xw[t], wx) + bx
            gh = jnp.dot(h, wh) + bh
            rr = jax.nn.sigmoid(gx[:, :H] + gh[:, :H])
            z = jax.nn.sigmoid(gx[:, H:2 * H] + gh[:, H:2 * H])
            n = jnp.tanh(gx[:, 2 * H:] + rr * gh[:, 2 * H:])
            h = (1.0 - z) * n + z * h
            out[t] = h
        return jnp.stack(out, axis=0)

    hf = run_dir(g["wx_f"], g["wh_f"], g["bx_f"], g["bh_f"], False)
    hb = run_dir(g["wx_b"], g["wh_b"], g["bx_b"], g["bh_b"], True)
    gru_flat = jnp.concatenate([hf, hb], axis=-1).reshape(T, -1)
    x = jnp.concatenate([gru_flat, x_embeds, x_num.astype(jnp.float32)], axis=1)

    h1 = x @ r["w1"] + r["b1"]
    h1 = jnp.where(h1 >= 0, h1, r["a1"] * h1)
    h1 = h1 * r["s1"] + r["t1"]
    h2 = h1 @ r["w2"] + r["b2"]
    h2 = jnp.where(h2 >= 0, h2, r["a2"] * h2)
    h2 = h2 * r["s2"] + r["t2"]
    return jax.nn.sigmoid(h2 @ r["w3"] + r["b3"])


# ------------------------------------ main ------------------------------------
if __name__ == "__main__":
    root = jax.random.PRNGKey(0)
    k_par, k_cat1, k_cat2, k_num, k_words = jax.random.split(root, 5)

    params = init_params(k_par)
    x_cat = jnp.stack(
        [jax.random.randint(k_cat1, (NREQ, BATCH), 0, CAT_DICT["cat1"][0]),
         jax.random.randint(k_cat2, (NREQ, BATCH), 0, CAT_DICT["cat2"][0])],
        axis=-1).astype(jnp.int32)                              # (R, T, 2)
    x_num = jax.random.normal(k_num, (NREQ, BATCH, NUM_NUMERIC), jnp.float32)
    x_words = jax.random.randint(k_words, (NREQ, BATCH, L_WORDS), 0, VOCAB).astype(jnp.int32)

    out = jax.jit(grunet_forward)(params, x_cat, x_num, x_words)
    out = jax.block_until_ready(out)

    ref_fn = jax.jit(jax.vmap(lambda c, n, w: reference_single(params, c, n, w)))
    ref = ref_fn(x_cat, x_num, x_words)                         # (R, T, 1)

    # bf16 recurrent-matmul operands + BatchNorm folding shift numerics slightly.
    np.testing.assert_allclose(np.asarray(out), np.asarray(ref), rtol=5e-3, atol=5e-3)
    assert out.shape == (NREQ, BATCH, 1)

    print("KERNEL_OK")
</pallas_src>

<mosaic_0001>
module attributes {stable_mosaic.version = 11 : i64} {
  func.func @grunet_kernel(%arg0: i32, %arg1: memref<4x128x64xf32, #tpu.memory_space<vmem>>, %arg2: memref<64x15xf32, #tpu.memory_space<vmem>>, %arg3: memref<64x96xf32, #tpu.memory_space<vmem>>, %arg4: memref<32x96xbf16, #tpu.memory_space<vmem>>, %arg5: memref<8x32x128xf32, #tpu.memory_space<vmem>>, %arg6: memref<15x128xf32, #tpu.memory_space<vmem>>, %arg7: memref<128x64xf32, #tpu.memory_space<vmem>>, %arg8: memref<64x1xf32, #tpu.memory_space<vmem>>, %arg9: memref<8x128xf32, #tpu.memory_space<vmem>>, %arg10: memref<64x1xf32, #tpu.memory_space<vmem>>, %arg11: memref<4x128x96xf32, #tpu.memory_space<vmem>>, %arg12: memref<4x128x32xf32, #tpu.memory_space<vmem>>) attributes {dimension_semantics = [#tpu.dimension_semantics<parallel>], iteration_bounds = array<i64: 2>, scalar_prefetch = 0 : i64, scratch_operands = 2 : i64, tpu.core_type = #tpu.core_type<tc>, window_params = [{transform_indices = @transform_0, window_bounds = array<i64: 4, 128, 64>}, {transform_indices = @transform_1, window_bounds = array<i64: 64, 15>}, {pipeline_mode = #tpu.pipeline_mode<synchronous>, transform_indices = @transform_2, window_bounds = array<i64: 64, 96>}, {pipeline_mode = #tpu.pipeline_mode<synchronous>, transform_indices = @transform_3, window_bounds = array<i64: 32, 96>}, {pipeline_mode = #tpu.pipeline_mode<synchronous>, transform_indices = @transform_4, window_bounds = array<i64: 8, 32, 128>}, {pipeline_mode = #tpu.pipeline_mode<synchronous>, transform_indices = @transform_5, window_bounds = array<i64: 15, 128>}, {pipeline_mode = #tpu.pipeline_mode<synchronous>, transform_indices = @transform_6, window_bounds = array<i64: 128, 64>}, {pipeline_mode = #tpu.pipeline_mode<synchronous>, transform_indices = @transform_7, window_bounds = array<i64: 64, 1>}, {pipeline_mode = #tpu.pipeline_mode<synchronous>, transform_indices = @transform_8, window_bounds = array<i64: 8, 128>}, {transform_indices = @transform_9, window_bounds = array<i64: 64, 1>}]} {
    %c0 = arith.constant 0 : index
    %c0_0 = arith.constant 0 : index
    %0 = vector.load %arg9[%c0, %c0_0] : memref<8x128xf32, #tpu.memory_space<vmem>>, vector<1x96xf32>
    %c1 = arith.constant 1 : index
    %c0_1 = arith.constant 0 : index
    %1 = vector.load %arg9[%c1, %c0_1] : memref<8x128xf32, #tpu.memory_space<vmem>>, vector<1x32xf32>
    %c2 = arith.constant 2 : index
    %c0_2 = arith.constant 0 : index
    %2 = vector.load %arg9[%c2, %c0_2] : memref<8x128xf32, #tpu.memory_space<vmem>>, vector<1x128xf32>
    %c3 = arith.constant 3 : index
    %c0_3 = arith.constant 0 : index
    %3 = vector.load %arg9[%c3, %c0_3] : memref<8x128xf32, #tpu.memory_space<vmem>>, vector<1x64xf32>
    %c4 = arith.constant 4 : index
    %c0_4 = arith.constant 0 : index
    %4 = vector.load %arg9[%c4, %c0_4] : memref<8x128xf32, #tpu.memory_space<vmem>>, vector<1x1xf32>
    %c5 = arith.constant 5 : index
    %c0_5 = arith.constant 0 : index
    %5 = vector.load %arg9[%c5, %c0_5] : memref<8x128xf32, #tpu.memory_space<vmem>>, vector<1x1xf32>
    %c6 = arith.constant 6 : index
    %c0_6 = arith.constant 0 : index
    %6 = vector.load %arg9[%c6, %c0_6] : memref<8x128xf32, #tpu.memory_space<vmem>>, vector<1x1xf32>
    %c0_7 = arith.constant 0 : index
    %c0_8 = arith.constant 0 : index
    %c0_9 = arith.constant 0 : index
    %7 = vector.load %arg1[%c0_7, %c0_8, %c0_9] : memref<4x128x64xf32, #tpu.memory_space<vmem>>, vector<4x128x64xf32>
    %8 = vector.shape_cast %7 : vector<4x128x64xf32> to vector<512x64xf32>
    %c0_10 = arith.constant 0 : index
    %c0_11 = arith.constant 0 : index
    %9 = vector.load %arg3[%c0_10, %c0_11] : memref<64x96xf32, #tpu.memory_space<vmem>>, vector<64x96xf32>
    %cst = arith.constant dense<0.000000e+00> : vector<512x96xf32>
    %10 = tpu.matmul %8, %9, %cst {dimension_numbers = #tpu.dot_dimension_numbers<[1], [0], [0], [1], [0, 0, 1, 1], [], []>} : vector<512x64xf32>, vector<64x96xf32>, vector<512x96xf32> -> vector<512x96xf32>
    %11 = vector.broadcast %0 : vector<1x96xf32> to vector<512x96xf32>
    %12 = arith.addf %10, %11 : vector<512x96xf32>
    %13 = vector.shape_cast %12 : vector<512x96xf32> to vector<4x128x96xf32>
    %c0_12 = arith.constant 0 : index
    %c0_13 = arith.constant 0 : index
    %c0_14 = arith.constant 0 : index
    %14 = vector.load %arg11[%c0_12, %c0_13, %c0_14] : memref<4x128x96xf32, #tpu.memory_space<vmem>>, vector<4x128x96xf32>
    tpu.vector_store %arg11[%c0_12, %c0_13, %c0_14], %13 {strides = array<i32>} : memref<4x128x96xf32, #tpu.memory_space<vmem>>, vector<4x128x96xf32>,
    %c0_15 = arith.constant 0 : index
    %c0_16 = arith.constant 0 : index
    %15 = vector.load %arg4[%c0_15, %c0_16] : memref<32x96xbf16, #tpu.memory_space<vmem>>, vector<32x96xbf16>
    %c0_17 = arith.constant 0 : index
    %c0_18 = arith.constant 0 : index
    %c0_19 = arith.constant 0 : index
    %16 = vector.load %arg11[%c0_17, %c0_18, %c0_19] : memref<4x128x96xf32, #tpu.memory_space<vmem>>, vector<1x128x96xf32>
    %17 = vector.shape_cast %16 : vector<1x128x96xf32> to vector<128x96xf32>
    %18 = vector.extract_strided_slice %17 {offsets = [0, 0], sizes = [128, 64], strides = [1, 1]} : vector<128x96xf32> to vector<128x64xf32>
    %19 = arith.negf %18 : vector<128x64xf32>
    %20 = math.exp %19 : vector<128x64xf32>
    %cst_20 = arith.constant 1.000000e+00 : f32
    %21 = vector.broadcast %cst_20 : f32 to vector<128x64xf32>
    %22 = arith.addf %21, %20 : vector<128x64xf32>
    %23 = arith.divf %21, %22 : vector<128x64xf32>
    %24 = vector.extract_strided_slice %23 {offsets = [0, 0], sizes = [128, 32], strides = [1, 1]} : vector<128x64xf32> to vector<128x32xf32>
    %25 = vector.extract_strided_slice %23 {offsets = [0, 32], sizes = [128, 32], strides = [1, 1]} : vector<128x64xf32> to vector<128x32xf32>
    %26 = vector.extract_strided_slice %17 {offsets = [0, 64], sizes = [128, 32], strides = [1, 1]} : vector<128x96xf32> to vector<128x32xf32>
    %27 = vector.broadcast %1 : vector<1x32xf32> to vector<128x32xf32>
    %28 = arith.mulf %24, %27 : vector<128x32xf32>
    %29 = arith.addf %26, %28 : vector<128x32xf32>
    %30 = math.tanh %29 : vector<128x32xf32>
    %cst_21 = arith.constant 1.000000e+00 : f32
    %31 = vector.broadcast %cst_21 : f32 to vector<128x32xf32>
    %32 = arith.subf %31, %25 : vector<128x32xf32>
    %33 = arith.mulf %32, %30 : vector<128x32xf32>
    %c0_22 = arith.constant 0 : index
    %c0_23 = arith.constant 0 : index
    %c0_24 = arith.constant 0 : index
    %34 = vector.load %arg12[%c0_22, %c0_23, %c0_24] : memref<4x128x32xf32, #tpu.memory_space<vmem>>, vector<1x128x32xf32>
    %35 = vector.shape_cast %34 : vector<1x128x32xf32> to vector<128x32xf32>
    %36 = vector.shape_cast %33 : vector<128x32xf32> to vector<1x128x32xf32>
    tpu.vector_store %arg12[%c0_22, %c0_23, %c0_24], %36 {strides = array<i32>} : memref<4x128x32xf32, #tpu.memory_space<vmem>>, vector<1x128x32xf32>,
    %c1_25 = arith.constant 1 : index
    %c0_26 = arith.constant 0 : index
    %c0_27 = arith.constant 0 : index
    %37 = vector.load %arg11[%c1_25, %c0_26, %c0_27] : memref<4x128x96xf32, #tpu.memory_space<vmem>>, vector<1x128x96xf32>
    %38 = vector.shape_cast %37 : vector<1x128x96xf32> to vector<128x96xf32>
    %39 = arith.truncf %33 : vector<128x32xf32> to vector<128x32xbf16>
    %cst_28 = arith.constant dense<0.000000e+00> : vector<128x96xf32>
    %40 = tpu.matmul %39, %15, %cst_28 {dimension_numbers = #tpu.dot_dimension_numbers<[1], [0], [0], [1], [0, 0, 1, 1], [], []>} : vector<128x32xbf16>, vector<32x96xbf16>, vector<128x96xf32> -> vector<128x96xf32>
    %41 = vector.extract_strided_slice %38 {offsets = [0, 0], sizes = [128, 64], strides = [1, 1]} : vector<128x96xf32> to vector<128x64xf32>
    %42 = vector.extract_strided_slice %40 {offsets = [0, 0], sizes = [128, 64], strides = [1, 1]} : vector<128x96xf32> to vector<128x64xf32>
    %43 = arith.addf %41, %42 : vector<128x64xf32>
    %44 = arith.negf %43 : vector<128x64xf32>
    %45 = math.exp %44 : vector<128x64xf32>
    %cst_29 = arith.constant 1.000000e+00 : f32
    %46 = vector.broadcast %cst_29 : f32 to vector<128x64xf32>
    %47 = arith.addf %46, %45 : vector<128x64xf32>
    %48 = arith.divf %46, %47 : vector<128x64xf32>
    %49 = vector.extract_strided_slice %48 {offsets = [0, 0], sizes = [128, 32], strides = [1, 1]} : vector<128x64xf32> to vector<128x32xf32>
    %50 = vector.extract_strided_slice %48 {offsets = [0, 32], sizes = [128, 32], strides = [1, 1]} : vector<128x64xf32> to vector<128x32xf32>
    %51 = vector.extract_strided_slice %38 {offsets = [0, 64], sizes = [128, 32], strides = [1, 1]} : vector<128x96xf32> to vector<128x32xf32>
    %52 = vector.extract_strided_slice %40 {offsets = [0, 64], sizes = [128, 32], strides = [1, 1]} : vector<128x96xf32> to vector<128x32xf32>
    %53 = vector.broadcast %1 : vector<1x32xf32> to vector<128x32xf32>
    %54 = arith.addf %52, %53 : vector<128x32xf32>
    %55 = arith.mulf %49, %54 : vector<128x32xf32>
    %56 = arith.addf %51, %55 : vector<128x32xf32>
    %57 = math.tanh %56 : vector<128x32xf32>
    %cst_30 = arith.constant 1.000000e+00 : f32
    %58 = vector.broadcast %cst_30 : f32 to vector<128x32xf32>
    %59 = arith.subf %58, %50 : vector<128x32xf32>
    %60 = arith.mulf %59, %57 : vector<128x32xf32>
    %61 = arith.mulf %50, %33 : vector<128x32xf32>
    %62 = arith.addf %60, %61 : vector<128x32xf32>
    %c1_31 = arith.constant 1 : index
    %c0_32 = arith.constant 0 : index
    %c0_33 = arith.constant 0 : index
    %63 = vector.load %arg12[%c1_31, %c0_32, %c0_33] : memref<4x128x32xf32, #tpu.memory_space<vmem>>, vector<1x128x32xf32>
    %64 = vector.shape_cast %63 : vector<1x128x32xf32> to vector<128x32xf32>
    %65 = vector.shape_cast %62 : vector<128x32xf32> to vector<1x128x32xf32>
    tpu.vector_store %arg12[%c1_31, %c0_32, %c0_33], %65 {strides = array<i32>} : memref<4x128x32xf32, #tpu.memory_space<vmem>>, vector<1x128x32xf32>,
    %c2_34 = arith.constant 2 : index
    %c0_35 = arith.constant 0 : index
    %c0_36 = arith.constant 0 : index
    %66 = vector.load %arg11[%c2_34, %c0_35, %c0_36] : memref<4x128x96xf32, #tpu.memory_space<vmem>>, vector<1x128x96xf32>
    %67 = vector.shape_cast %66 : vector<1x128x96xf32> to vector<128x96xf32>
    %68 = arith.truncf %62 : vector<128x32xf32> to vector<128x32xbf16>
    %cst_37 = arith.constant dense<0.000000e+00> : vector<128x96xf32>
    %69 = tpu.matmul %68, %15, %cst_37 {dimension_numbers = #tpu.dot_dimension_numbers<[1], [0], [0], [1], [0, 0, 1, 1], [], []>} : vector<128x32xbf16>, vector<32x96xbf16>, vector<128x96xf32> -> vector<128x96xf32>
    %70 = vector.extract_strided_slice %67 {offsets = [0, 0], sizes = [128, 64], strides = [1, 1]} : vector<128x96xf32> to vector<128x64xf32>
    %71 = vector.extract_strided_slice %69 {offsets = [0, 0], sizes = [128, 64], strides = [1, 1]} : vector<128x96xf32> to vector<128x64xf32>
    %72 = arith.addf %70, %71 : vector<128x64xf32>
    %73 = arith.negf %72 : vector<128x64xf32>
    %74 = math.exp %73 : vector<128x64xf32>
    %cst_38 = arith.constant 1.000000e+00 : f32
    %75 = vector.broadcast %cst_38 : f32 to vector<128x64xf32>
    %76 = arith.addf %75, %74 : vector<128x64xf32>
    %77 = arith.divf %75, %76 : vector<128x64xf32>
    %78 = vector.extract_strided_slice %77 {offsets = [0, 0], sizes = [128, 32], strides = [1, 1]} : vector<128x64xf32> to vector<128x32xf32>
    %79 = vector.extract_strided_slice %77 {offsets = [0, 32], sizes = [128, 32], strides = [1, 1]} : vector<128x64xf32> to vector<128x32xf32>
    %80 = vector.extract_strided_slice %67 {offsets = [0, 64], sizes = [128, 32], strides = [1, 1]} : vector<128x96xf32> to vector<128x32xf32>
    %81 = vector.extract_strided_slice %69 {offsets = [0, 64], sizes = [128, 32], strides = [1, 1]} : vector<128x96xf32> to vector<128x32xf32>
    %82 = vector.broadcast %1 : vector<1x32xf32> to vector<128x32xf32>
    %83 = arith.addf %81, %82 : vector<128x32xf32>
    %84 = arith.mulf %78, %83 : vector<128x32xf32>
    %85 = arith.addf %80, %84 : vector<128x32xf32>
    %86 = math.tanh %85 : vector<128x32xf32>
    %cst_39 = arith.constant 1.000000e+00 : f32
    %87 = vector.broadcast %cst_39 : f32 to vector<128x32xf32>
    %88 = arith.subf %87, %79 : vector<128x32xf32>
    %89 = arith.mulf %88, %86 : vector<128x32xf32>
    %90 = arith.mulf %79, %62 : vector<128x32xf32>
    %91 = arith.addf %89, %90 : vector<128x32xf32>
    %c2_40 = arith.constant 2 : index
    %c0_41 = arith.constant 0 : index
    %c0_42 = arith.constant 0 : index
    %92 = vector.load %arg12[%c2_40, %c0_41, %c0_42] : memref<4x128x32xf32, #tpu.memory_space<vmem>>, vector<1x128x32xf32>
    %93 = vector.shape_cast %92 : vector<1x128x32xf32> to vector<128x32xf32>
    %94 = vector.shape_cast %91 : vector<128x32xf32> to vector<1x128x32xf32>
    tpu.vector_store %arg12[%c2_40, %c0_41, %c0_42], %94 {strides = array<i32>} : memref<4x128x32xf32, #tpu.memory_space<vmem>>, vector<1x128x32xf32>,
    %c3_43 = arith.constant 3 : index
    %c0_44 = arith.constant 0 : index
    %c0_45 = arith.constant 0 : index
    %95 = vector.load %arg11[%c3_43, %c0_44, %c0_45] : memref<4x128x96xf32, #tpu.memory_space<vmem>>, vector<1x128x96xf32>
    %96 = vector.shape_cast %95 : vector<1x128x96xf32> to vector<128x96xf32>
    %97 = arith.truncf %91 : vector<128x32xf32> to vector<128x32xbf16>
    %cst_46 = arith.constant dense<0.000000e+00> : vector<128x96xf32>
    %98 = tpu.matmul %97, %15, %cst_46 {dimension_numbers = #tpu.dot_dimension_numbers<[1], [0], [0], [1], [0, 0, 1, 1], [], []>} : vector<128x32xbf16>, vector<32x96xbf16>, vector<128x96xf32> -> vector<128x96xf32>
    %99 = vector.extract_strided_slice %96 {offsets = [0, 0], sizes = [128, 64], strides = [1, 1]} : vector<128x96xf32> to vector<128x64xf32>
    %100 = vector.extract_strided_slice %98 {offsets = [0, 0], sizes = [128, 64], strides = [1, 1]} : vector<128x96xf32> to vector<128x64xf32>
    %101 = arith.addf %99, %100 : vector<128x64xf32>
    %102 = arith.negf %101 : vector<128x64xf32>
    %103 = math.exp %102 : vector<128x64xf32>
    %cst_47 = arith.constant 1.000000e+00 : f32
    %104 = vector.broadcast %cst_47 : f32 to vector<128x64xf32>
    %105 = arith.addf %104, %103 : vector<128x64xf32>
    %106 = arith.divf %104, %105 : vector<128x64xf32>
    %107 = vector.extract_strided_slice %106 {offsets = [0, 0], sizes = [128, 32], strides = [1, 1]} : vector<128x64xf32> to vector<128x32xf32>
    %108 = vector.extract_strided_slice %106 {offsets = [0, 32], sizes = [128, 32], strides = [1, 1]} : vector<128x64xf32> to vector<128x32xf32>
    %109 = vector.extract_strided_slice %96 {offsets = [0, 64], sizes = [128, 32], strides = [1, 1]} : vector<128x96xf32> to vector<128x32xf32>
    %110 = vector.extract_strided_slice %98 {offsets = [0, 64], sizes = [128, 32], strides = [1, 1]} : vector<128x96xf32> to vector<128x32xf32>
    %111 = vector.broadcast %1 : vector<1x32xf32> to vector<128x32xf32>
    %112 = arith.addf %110, %111 : vector<128x32xf32>
    %113 = arith.mulf %107, %112 : vector<128x32xf32>
    %114 = arith.addf %109, %113 : vector<128x32xf32>
    %115 = math.tanh %114 : vector<128x32xf32>
    %cst_48 = arith.constant 1.000000e+00 : f32
    %116 = vector.broadcast %cst_48 : f32 to vector<128x32xf32>
    %117 = arith.subf %116, %108 : vector<128x32xf32>
    %118 = arith.mulf %117, %115 : vector<128x32xf32>
    %119 = arith.mulf %108, %91 : vector<128x32xf32>
    %120 = arith.addf %118, %119 : vector<128x32xf32>
    %c3_49 = arith.constant 3 : index
    %c0_50 = arith.constant 0 : index
    %c0_51 = arith.constant 0 : index
    %121 = vector.load %arg12[%c3_49, %c0_50, %c0_51] : memref<4x128x32xf32, #tpu.memory_space<vmem>>, vector<1x128x32xf32>
    %122 = vector.shape_cast %121 : vector<1x128x32xf32> to vector<128x32xf32>
    %123 = vector.shape_cast %120 : vector<128x32xf32> to vector<1x128x32xf32>
    tpu.vector_store %arg12[%c3_49, %c0_50, %c0_51], %123 {strides = array<i32>} : memref<4x128x32xf32, #tpu.memory_space<vmem>>, vector<1x128x32xf32>,
    %c0_52 = arith.constant 0 : index
    %c0_53 = arith.constant 0 : index
    %c16 = arith.constant 16 : index
    %124 = vector.load %arg12[%c0_52, %c0_53, %c16] : memref<4x128x32xf32, #tpu.memory_space<vmem>>, vector<1x128x16xf32>
    %125 = vector.shape_cast %124 : vector<1x128x16xf32> to vector<128x16xf32>
    %c1_54 = arith.constant 1 : index
    %c0_55 = arith.constant 0 : index
    %c16_56 = arith.constant 16 : index
    %126 = vector.load %arg12[%c1_54, %c0_55, %c16_56] : memref<4x128x32xf32, #tpu.memory_space<vmem>>, vector<1x128x16xf32>
    %127 = vector.shape_cast %126 : vector<1x128x16xf32> to vector<128x16xf32>
    %c2_57 = arith.constant 2 : index
    %c0_58 = arith.constant 0 : index
    %c16_59 = arith.constant 16 : index
    %128 = vector.load %arg12[%c2_57, %c0_58, %c16_59] : memref<4x128x32xf32, #tpu.memory_space<vmem>>, vector<1x128x16xf32>
    %129 = vector.shape_cast %128 : vector<1x128x16xf32> to vector<128x16xf32>
    %c3_60 = arith.constant 3 : index
    %c0_61 = arith.constant 0 : index
    %c16_62 = arith.constant 16 : index
    %130 = vector.load %arg12[%c3_60, %c0_61, %c16_62] : memref<4x128x32xf32, #tpu.memory_space<vmem>>, vector<1x128x16xf32>
    %131 = vector.shape_cast %130 : vector<1x128x16xf32> to vector<128x16xf32>
    %c0_63 = arith.constant 0 : index
    %c0_64 = arith.constant 0 : index
    %c16_65 = arith.constant 16 : index
    %132 = vector.load %arg12[%c0_63, %c0_64, %c16_65] : memref<4x128x32xf32, #tpu.memory_space<vmem>>, vector<1x128x16xf32>
    %133 = vector.shape_cast %132 : vector<1x128x16xf32> to vector<128x16xf32>
    %134 = vector.shape_cast %131 : vector<128x16xf32> to vector<1x128x16xf32>
    tpu.vector_store %arg12[%c0_63, %c0_64, %c16_65], %134 {strides = array<i32>} : memref<4x128x32xf32, #tpu.memory_space<vmem>>, vector<1x128x16xf32>,
    %c1_66 = arith.constant 1 : index
    %c0_67 = arith.constant 0 : index
    %c16_68 = arith.constant 16 : index
    %135 = vector.load %arg12[%c1_66, %c0_67, %c16_68] : memref<4x128x32xf32, #tpu.memory_space<vmem>>, vector<1x128x16xf32>
    %136 = vector.shape_cast %135 : vector<1x128x16xf32> to vector<128x16xf32>
    %137 = vector.shape_cast %129 : vector<128x16xf32> to vector<1x128x16xf32>
    tpu.vector_store %arg12[%c1_66, %c0_67, %c16_68], %137 {strides = array<i32>} : memref<4x128x32xf32, #tpu.memory_space<vmem>>, vector<1x128x16xf32>,
    %c2_69 = arith.constant 2 : index
    %c0_70 = arith.constant 0 : index
    %c16_71 = arith.constant 16 : index
    %138 = vector.load %arg12[%c2_69, %c0_70, %c16_71] : memref<4x128x32xf32, #tpu.memory_space<vmem>>, vector<1x128x16xf32>
    %139 = vector.shape_cast %138 : vector<1x128x16xf32> to vector<128x16xf32>
    %140 = vector.shape_cast %127 : vector<128x16xf32> to vector<1x128x16xf32>
    tpu.vector_store %arg12[%c2_69, %c0_70, %c16_71], %140 {strides = array<i32>} : memref<4x128x32xf32, #tpu.memory_space<vmem>>, vector<1x128x16xf32>,
    %c3_72 = arith.constant 3 : index
    %c0_73 = arith.constant 0 : index
    %c16_74 = arith.constant 16 : index
    %141 = vector.load %arg12[%c3_72, %c0_73, %c16_74] : memref<4x128x32xf32, #tpu.memory_space<vmem>>, vector<1x128x16xf32>
    %142 = vector.shape_cast %141 : vector<1x128x16xf32> to vector<128x16xf32>
    %143 = vector.shape_cast %125 : vector<128x16xf32> to vector<1x128x16xf32>
    tpu.vector_store %arg12[%c3_72, %c0_73, %c16_74], %143 {strides = array<i32>} : memref<4x128x32xf32, #tpu.memory_space<vmem>>, vector<1x128x16xf32>,
    %c0_75 = arith.constant 0 : index
    %c0_76 = arith.constant 0 : index
    %144 = vector.load %arg2[%c0_75, %c0_76] : memref<64x15xf32, #tpu.memory_space<vmem>>, vector<64x15xf32>
    %c0_77 = arith.constant 0 : index
    %c0_78 = arith.constant 0 : index
    %145 = vector.load %arg6[%c0_77, %c0_78] : memref<15x128xf32, #tpu.memory_space<vmem>>, vector<15x128xf32>
    %cst_79 = arith.constant dense<0.000000e+00> : vector<64x128xf32>
    %146 = tpu.matmul %144, %145, %cst_79 {dimension_numbers = #tpu.dot_dimension_numbers<[1], [0], [0], [1], [0, 0, 1, 1], [], []>} : vector<64x15xf32>, vector<15x128xf32>, vector<64x128xf32> -> vector<64x128xf32>
    %147 = vector.broadcast %2 : vector<1x128xf32> to vector<64x128xf32>
    %148 = arith.addf %146, %147 : vector<64x128xf32>
    %c0_80 = arith.constant 0 : index
    %c0_81 = arith.constant 0 : index
    %c0_82 = arith.constant 0 : index
    %149 = vector.load %arg12[%c0_80, %c0_81, %c0_82] : memref<4x128x32xf32, #tpu.memory_space<vmem>>, vector<4x16x32xf32>
    %150 = vector.shape_cast %149 : vector<4x16x32xf32> to vector<64x32xf32>
    %c0_83 = arith.constant 0 : index
    %c0_84 = arith.constant 0 : index
    %c0_85 = arith.constant 0 : index
    %151 = vector.load %arg5[%c0_83, %c0_84, %c0_85] : memref<8x32x128xf32, #tpu.memory_space<vmem>>, vector<1x32x128xf32>
    %152 = vector.shape_cast %151 : vector<1x32x128xf32> to vector<32x128xf32>
    %cst_86 = arith.constant dense<0.000000e+00> : vector<64x128xf32>
    %153 = tpu.matmul %150, %152, %cst_86 {dimension_numbers = #tpu.dot_dimension_numbers<[1], [0], [0], [1], [0, 0, 1, 1], [], []>} : vector<64x32xf32>, vector<32x128xf32>, vector<64x128xf32> -> vector<64x128xf32>
    %154 = arith.addf %148, %153 : vector<64x128xf32>
    %c0_87 = arith.constant 0 : index
    %c16_88 = arith.constant 16 : index
    %c0_89 = arith.constant 0 : index
    %155 = vector.load %arg12[%c0_87, %c16_88, %c0_89] : memref<4x128x32xf32, #tpu.memory_space<vmem>>, vector<4x16x32xf32>
    %156 = vector.shape_cast %155 : vector<4x16x32xf32> to vector<64x32xf32>
    %c1_90 = arith.constant 1 : index
    %c0_91 = arith.constant 0 : index
    %c0_92 = arith.constant 0 : index
    %157 = vector.load %arg5[%c1_90, %c0_91, %c0_92] : memref<8x32x128xf32, #tpu.memory_space<vmem>>, vector<1x32x128xf32>
    %158 = vector.shape_cast %157 : vector<1x32x128xf32> to vector<32x128xf32>
    %cst_93 = arith.constant dense<0.000000e+00> : vector<64x128xf32>
    %159 = tpu.matmul %156, %158, %cst_93 {dimension_numbers = #tpu.dot_dimension_numbers<[1], [0], [0], [1], [0, 0, 1, 1], [], []>} : vector<64x32xf32>, vector<32x128xf32>, vector<64x128xf32> -> vector<64x128xf32>
    %160 = arith.addf %154, %159 : vector<64x128xf32>
    %c0_94 = arith.constant 0 : index
    %c32 = arith.constant 32 : index
    %c0_95 = arith.constant 0 : index
    %161 = vector.load %arg12[%c0_94, %c32, %c0_95] : memref<4x128x32xf32, #tpu.memory_space<vmem>>, vector<4x16x32xf32>
    %162 = vector.shape_cast %161 : vector<4x16x32xf32> to vector<64x32xf32>
    %c2_96 = arith.constant 2 : index
    %c0_97 = arith.constant 0 : index
    %c0_98 = arith.constant 0 : index
    %163 = vector.load %arg5[%c2_96, %c0_97, %c0_98] : memref<8x32x128xf32, #tpu.memory_space<vmem>>, vector<1x32x128xf32>
    %164 = vector.shape_cast %163 : vector<1x32x128xf32> to vector<32x128xf32>
    %cst_99 = arith.constant dense<0.000000e+00> : vector<64x128xf32>
    %165 = tpu.matmul %162, %164, %cst_99 {dimension_numbers = #tpu.dot_dimension_numbers<[1], [0], [0], [1], [0, 0, 1, 1], [], []>} : vector<64x32xf32>, vector<32x128xf32>, vector<64x128xf32> -> vector<64x128xf32>
    %166 = arith.addf %160, %165 : vector<64x128xf32>
    %c0_100 = arith.constant 0 : index
    %c48 = arith.constant 48 : index
    %c0_101 = arith.constant 0 : index
    %167 = vector.load %arg12[%c0_100, %c48, %c0_101] : memref<4x128x32xf32, #tpu.memory_space<vmem>>, vector<4x16x32xf32>
    %168 = vector.shape_cast %167 : vector<4x16x32xf32> to vector<64x32xf32>
    %c3_102 = arith.constant 3 : index
    %c0_103 = arith.constant 0 : index
    %c0_104 = arith.constant 0 : index
    %169 = vector.load %arg5[%c3_102, %c0_103, %c0_104] : memref<8x32x128xf32, #tpu.memory_space<vmem>>, vector<1x32x128xf32>
    %170 = vector.shape_cast %169 : vector<1x32x128xf32> to vector<32x128xf32>
    %cst_105 = arith.constant dense<0.000000e+00> : vector<64x128xf32>
    %171 = tpu.matmul %168, %170, %cst_105 {dimension_numbers = #tpu.dot_dimension_numbers<[1], [0], [0], [1], [0, 0, 1, 1], [], []>} : vector<64x32xf32>, vector<32x128xf32>, vector<64x128xf32> -> vector<64x128xf32>
    %172 = arith.addf %166, %171 : vector<64x128xf32>
    %c0_106 = arith.constant 0 : index
    %c64 = arith.constant 64 : index
    %c0_107 = arith.constant 0 : index
    %173 = vector.load %arg12[%c0_106, %c64, %c0_107] : memref<4x128x32xf32, #tpu.memory_space<vmem>>, vector<4x16x32xf32>
    %174 = vector.shape_cast %173 : vector<4x16x32xf32> to vector<64x32xf32>
    %c4_108 = arith.constant 4 : index
    %c0_109 = arith.constant 0 : index
    %c0_110 = arith.constant 0 : index
    %175 = vector.load %arg5[%c4_108, %c0_109, %c0_110] : memref<8x32x128xf32, #tpu.memory_space<vmem>>, vector<1x32x128xf32>
    %176 = vector.shape_cast %175 : vector<1x32x128xf32> to vector<32x128xf32>
    %cst_111 = arith.constant dense<0.000000e+00> : vector<64x128xf32>
    %177 = tpu.matmul %174, %176, %cst_111 {dimension_numbers = #tpu.dot_dimension_numbers<[1], [0], [0], [1], [0, 0, 1, 1], [], []>} : vector<64x32xf32>, vector<32x128xf32>, vector<64x128xf32> -> vector<64x128xf32>
    %178 = arith.addf %172, %177 : vector<64x128xf32>
    %c0_112 = arith.constant 0 : index
    %c80 = arith.constant 80 : index
    %c0_113 = arith.constant 0 : index
    %179 = vector.load %arg12[%c0_112, %c80, %c0_113] : memref<4x128x32xf32, #tpu.memory_space<vmem>>, vector<4x16x32xf32>
    %180 = vector.shape_cast %179 : vector<4x16x32xf32> to vector<64x32xf32>
    %c5_114 = arith.constant 5 : index
    %c0_115 = arith.constant 0 : index
    %c0_116 = arith.constant 0 : index
    %181 = vector.load %arg5[%c5_114, %c0_115, %c0_116] : memref<8x32x128xf32, #tpu.memory_space<vmem>>, vector<1x32x128xf32>
    %182 = vector.shape_cast %181 : vector<1x32x128xf32> to vector<32x128xf32>
    %cst_117 = arith.constant dense<0.000000e+00> : vector<64x128xf32>
    %183 = tpu.matmul %180, %182, %cst_117 {dimension_numbers = #tpu.dot_dimension_numbers<[1], [0], [0], [1], [0, 0, 1, 1], [], []>} : vector<64x32xf32>, vector<32x128xf32>, vector<64x128xf32> -> vector<64x128xf32>
    %184 = arith.addf %178, %183 : vector<64x128xf32>
    %c0_118 = arith.constant 0 : index
    %c96 = arith.constant 96 : index
    %c0_119 = arith.constant 0 : index
    %185 = vector.load %arg12[%c0_118, %c96, %c0_119] : memref<4x128x32xf32, #tpu.memory_space<vmem>>, vector<4x16x32xf32>
    %186 = vector.shape_cast %185 : vector<4x16x32xf32> to vector<64x32xf32>
    %c6_120 = arith.constant 6 : index
    %c0_121 = arith.constant 0 : index
    %c0_122 = arith.constant 0 : index
    %187 = vector.load %arg5[%c6_120, %c0_121, %c0_122] : memref<8x32x128xf32, #tpu.memory_space<vmem>>, vector<1x32x128xf32>
    %188 = vector.shape_cast %187 : vector<1x32x128xf32> to vector<32x128xf32>
    %cst_123 = arith.constant dense<0.000000e+00> : vector<64x128xf32>
    %189 = tpu.matmul %186, %188, %cst_123 {dimension_numbers = #tpu.dot_dimension_numbers<[1], [0], [0], [1], [0, 0, 1, 1], [], []>} : vector<64x32xf32>, vector<32x128xf32>, vector<64x128xf32> -> vector<64x128xf32>
    %190 = arith.addf %184, %189 : vector<64x128xf32>
    %c0_124 = arith.constant 0 : index
    %c112 = arith.constant 112 : index
    %c0_125 = arith.constant 0 : index
    %191 = vector.load %arg12[%c0_124, %c112, %c0_125] : memref<4x128x32xf32, #tpu.memory_space<vmem>>, vector<4x16x32xf32>
    %192 = vector.shape_cast %191 : vector<4x16x32xf32> to vector<64x32xf32>
    %c7 = arith.constant 7 : index
    %c0_126 = arith.constant 0 : index
    %c0_127 = arith.constant 0 : index
    %193 = vector.load %arg5[%c7, %c0_126, %c0_127] : memref<8x32x128xf32, #tpu.memory_space<vmem>>, vector<1x32x128xf32>
    %194 = vector.shape_cast %193 : vector<1x32x128xf32> to vector<32x128xf32>
    %cst_128 = arith.constant dense<0.000000e+00> : vector<64x128xf32>
    %195 = tpu.matmul %192, %194, %cst_128 {dimension_numbers = #tpu.dot_dimension_numbers<[1], [0], [0], [1], [0, 0, 1, 1], [], []>} : vector<64x32xf32>, vector<32x128xf32>, vector<64x128xf32> -> vector<64x128xf32>
    %196 = arith.addf %190, %195 : vector<64x128xf32>
    %cst_129 = arith.constant 0.000000e+00 : f32
    %197 = vector.broadcast %cst_129 : f32 to vector<64x128xf32>
    %198 = arith.cmpf oge, %196, %197 : vector<64x128xf32>
    %199 = vector.broadcast %5 : vector<1x1xf32> to vector<64x128xf32>
    %200 = arith.mulf %199, %196 : vector<64x128xf32>
    %201 = arith.select %198, %196, %200 : vector<64x128xi1>, vector<64x128xf32>
    %c0_130 = arith.constant 0 : index
    %c0_131 = arith.constant 0 : index
    %202 = vector.load %arg7[%c0_130, %c0_131] : memref<128x64xf32, #tpu.memory_space<vmem>>, vector<128x64xf32>
    %cst_132 = arith.constant dense<0.000000e+00> : vector<64x64xf32>
    %203 = tpu.matmul %201, %202, %cst_132 {dimension_numbers = #tpu.dot_dimension_numbers<[1], [0], [0], [1], [0, 0, 1, 1], [], []>} : vector<64x128xf32>, vector<128x64xf32>, vector<64x64xf32> -> vector<64x64xf32>
    %204 = vector.broadcast %3 : vector<1x64xf32> to vector<64x64xf32>
    %205 = arith.addf %203, %204 : vector<64x64xf32>
    %cst_133 = arith.constant 0.000000e+00 : f32
    %206 = vector.broadcast %cst_133 : f32 to vector<64x64xf32>
    %207 = arith.cmpf oge, %205, %206 : vector<64x64xf32>
    %208 = vector.broadcast %6 : vector<1x1xf32> to vector<64x64xf32>
    %209 = arith.mulf %208, %205 : vector<64x64xf32>
    %210 = arith.select %207, %205, %209 : vector<64x64xi1>, vector<64x64xf32>
    %c0_134 = arith.constant 0 : index
    %c0_135 = arith.constant 0 : index
    %211 = vector.load %arg8[%c0_134, %c0_135] : memref<64x1xf32, #tpu.memory_space<vmem>>, vector<64x1xf32>
    %cst_136 = arith.constant dense<0.000000e+00> : vector<64x1xf32>
    %212 = tpu.matmul %210, %211, %cst_136 {dimension_numbers = #tpu.dot_dimension_numbers<[1], [0], [0], [1], [0, 0, 1, 1], [], []>} : vector<64x64xf32>, vector<64x1xf32>, vector<64x1xf32> -> vector<64x1xf32>
    %213 = vector.broadcast %4 : vector<1x1xf32> to vector<64x1xf32>
    %214 = arith.addf %212, %213 : vector<64x1xf32>
    %215 = arith.negf %214 : vector<64x1xf32>
    %216 = math.exp %215 : vector<64x1xf32>
    %cst_137 = arith.constant 1.000000e+00 : f32
    %217 = vector.broadcast %cst_137 : f32 to vector<64x1xf32>
    %218 = arith.addf %217, %216 : vector<64x1xf32>
    %219 = arith.divf %217, %218 : vector<64x1xf32>
    %c0_138 = arith.constant 0 : index
    %c0_139 = arith.constant 0 : index
    %220 = vector.load %arg10[%c0_138, %c0_139] : memref<64x1xf32, #tpu.memory_space<vmem>>, vector<64x1xf32>
    tpu.vector_store %arg10[%c0_138, %c0_139], %219 {strides = array<i32>} : memref<64x1xf32, #tpu.memory_space<vmem>>, vector<64x1xf32>,
    return
  }
  func.func @transform_0(%arg0: i32) -> (i32, i32, i32) {
    %c0_i32 = arith.constant 0 : i32
    %c0_i32_0 = arith.constant 0 : i32
    %c0_i32_1 = arith.constant 0 : i32
    return %arg0, %c0_i32, %c0_i32_0 : i32, i32, i32
  }
  func.func @transform_1(%arg0: i32) -> (i32, i32) {
    %c0_i32 = arith.constant 0 : i32
    %c0_i32_0 = arith.constant 0 : i32
    return %arg0, %c0_i32 : i32, i32
  }
  func.func @transform_2(%arg0: i32) -> (i32, i32) {
    %c0_i32 = arith.constant 0 : i32
    %c0_i32_0 = arith.constant 0 : i32
    %c0_i32_1 = arith.constant 0 : i32
    return %c0_i32, %c0_i32_0 : i32, i32
  }
  func.func @transform_3(%arg0: i32) -> (i32, i32) {
    %c0_i32 = arith.constant 0 : i32
    %c0_i32_0 = arith.constant 0 : i32
    %c0_i32_1 = arith.constant 0 : i32
    return %c0_i32, %c0_i32_0 : i32, i32
  }
  func.func @transform_4(%arg0: i32) -> (i32, i32, i32) {
    %c0_i32 = arith.constant 0 : i32
    %c0_i32_0 = arith.constant 0 : i32
    %c0_i32_1 = arith.constant 0 : i32
    %c0_i32_2 = arith.constant 0 : i32
    return %c0_i32, %c0_i32_0, %c0_i32_1 : i32, i32, i32
  }
  func.func @transform_5(%arg0: i32) -> (i32, i32) {
    %c0_i32 = arith.constant 0 : i32
    %c0_i32_0 = arith.constant 0 : i32
    %c0_i32_1 = arith.constant 0 : i32
    return %c0_i32, %c0_i32_0 : i32, i32
  }
  func.func @transform_6(%arg0: i32) -> (i32, i32) {
    %c0_i32 = arith.constant 0 : i32
    %c0_i32_0 = arith.constant 0 : i32
    %c0_i32_1 = arith.constant 0 : i32
    return %c0_i32, %c0_i32_0 : i32, i32
  }
  func.func @transform_7(%arg0: i32) -> (i32, i32) {
    %c0_i32 = arith.constant 0 : i32
    %c0_i32_0 = arith.constant 0 : i32
    %c0_i32_1 = arith.constant 0 : i32
    return %c0_i32, %c0_i32_0 : i32, i32
  }
  func.func @transform_8(%arg0: i32) -> (i32, i32) {
    %c0_i32 = arith.constant 0 : i32
    %c0_i32_0 = arith.constant 0 : i32
    %c0_i32_1 = arith.constant 0 : i32
    return %c0_i32, %c0_i32_0 : i32, i32
  }
  func.func @transform_9(%arg0: i32) -> (i32, i32) {
    %c0_i32 = arith.constant 0 : i32
    %c0_i32_0 = arith.constant 0 : i32
    return %arg0, %c0_i32 : i32, i32
  }
}

</mosaic_0001>

<bundles_post_ra>
// kernel: grunet_forward.1
= control target key start
LH: loop header
LB: loop body
LE: loop exit
PB: predicated region body
PF: predicated region fallthrough
CT: control target
= control target key end

     0   :  { %s7147_s30 = smov 0   ;;  %s9115_s0 = inlined_call_operand.vmem [shape: f32[8,128,64], index: 0, kind: input, shape index: {}]   ;;  %s9116_s1 = inlined_call_operand.vmem [shape: f32[128,15], index: 1, kind: input, shape index: {}]   ;;  %s9117_s2 = inlined_call_operand.vmem [shape: f32[64,96], index: 2, kind: input, shape index: {}]   ;;  %s9118_s3 = inlined_call_operand.vmem [shape: bf16[32,96], index: 3, kind: input, shape index: {}]   ;;  %s9119_s4 = inlined_call_operand.vmem [shape: f32[8,32,128], index: 4, kind: input, shape index: {}]   ;;  %s9120_s5 = inlined_call_operand.vmem [shape: f32[15,128], index: 5, kind: input, shape index: {}]   ;;  %s9121_s6 = inlined_call_operand.vmem [shape: f32[128,64], index: 6, kind: input, shape index: {}]   ;;  %s9122_s7 = inlined_call_operand.vmem [shape: f32[64,1], index: 7, kind: input, shape index: {}]   ;;  %s9123_s8 = inlined_call_operand.vmem [shape: f32[8,128], index: 8, kind: input, shape index: {}]   ;;  %s9124_s9 = inlined_call_operand.vmem [shape: f32[128,1], index: 9, kind: output, shape index: {}]  }
   0x1 LB: > { %s5485_s10 = sadd.s32 4294967295, %s7092_s30   ;;  %p5489_p0 = scmp.ge.s32.totalorder %s7092_s30, 1  ;;  %s7092_s30 = sphi %s7147_s30, %s19_s30  }
   0x2   : > { %p300_p1 = scmp.lt.s32.totalorder %s7092_s30, 3 }
   0x4   : > { %p301_p2 = pnand %p5489_p0, %p300_p1 }
   0x6   : > { %304 = sbr.rel (%p301_p2) target bundleno = 3682 (0xe62), region = 56 }
   0xd   : > { %v433_v0 = vld [vmem:[%s9117_s2] sm:$0xff]  ;;  %v434_v1 = vld [vmem:[%s9117_s2 + $0x8] sm:$0xff]  ;;  %v435_v2 = vld [vmem:[%s9117_s2 + $0x10] sm:$0xff]  ;;  %s5490_s17 = sshll.u32 %s5485_s10, 2  ;;  %vm445_vm0 = vcmask 523264   ;;  %vm1023_vm1 = vcmask 785408  }
   0xe   : > { %v6444_v3 = vpack.c.bf16 %v434_v1, %v433_v0  ;;  %v436_v4 = vld [vmem:[%s9117_s2 + $0x18] sm:$0xff]  ;;  %p343_p3 = scmp.lt.s32.totalorder %s5490_s17, 7  ;;  %v437_v6 = vld [vmem:[%s9117_s2 + $0x20] sm:$0xff]  ;;  %v438_v7 = vld [vmem:[%s9117_s2 + $0x28] sm:$0xff]  ;;  %s7095_s20 = smov 96   ;;  %vm1480_vm2 = vcmask 261120  }
   0xf   : > { %v6448_v5 = vpack.c.bf16 %v436_v4, %v435_v2  ;;  %v6452_v8 = vpack.c.bf16 %v438_v7, %v437_v6  ;;  %v439_v9 = vld [vmem:[%s9117_s2 + $0x30] sm:$0xff]  ;;  %v440_v10 = vld [vmem:[%s9117_s2 + $0x38] sm:$0xff]  ;;  %v7221_v28 = vld [vmem:[%s9123_s8] ss:$0 sm:$0xff]  ;;  %s5493_s29 = sshll.u32 %s5485_s10, 3  ;;  %vm3730_vm3 = vcmask 1046528  }
  0x10   : > { %6445 = vmatprep.subr.bf16.mxu0 %v6444_v3  ;;  %s9212_s17 = smov (!%p343_p3, %s5490_s17), 7  ;;  %v6456_v12 = vpack.c.bf16 %v440_v10, %v439_v9  ;;  %p350_p4 = scmp.lt.s32.totalorder %s5493_s29, 15  ;;  %vm7096_vm4 = vmmov 1   ;;  %vm3705_vm6 = vcmask 121856   ;;  %vm3626_vm7 = vcmask 261248  }
  0x11   : > { %6447 = vmatpush3.bf16.msra.mxu0 %v6444_v3  ;;  %s5775_s24 = sshll.u32 %s9212_s17, 7  ;;  %s7094_s17 = smov 64   ;;  %vm6461_vm5 = vmpackc.low %vm3730_vm3, %vm7096_vm4 }
  0x12   : > { %6449 = vmatprep.subr.bf16.mxu0 %v6448_v5  ;;  %s7184_s12 = scalar_lea.vmem %s9115_s0, %s5775_s24  ;;  %s9214_s29 = smov (!%p350_p4, %s5493_s29), 15 }
  0x13   : > { %v369_v11 = vld [vmem:[%s7184_s12] sm:$0xff]  ;;  %v370_v13 = vld [vmem:[%s7184_s12 + $0x8] sm:$0xff]  ;;  %v371_v14 = vld [vmem:[%s7184_s12 + $0x10] sm:$0xff]  ;;  %s5494_s10 = sshll.u32 %s9214_s29, 3 }
  0x14   : > { %6040 = vmatprep.mubr.msk.f32.mxu0 %vm445_vm0, %v369_v11  ;;  %v372_v15 = vld [vmem:[%s7184_s12 + $0x18] sm:$0xff]  ;;  %v373_v16 = vld [vmem:[%s7184_s12 + $0x20] sm:$0xff]  ;;  %v374_v17 = vld [vmem:[%s7184_s12 + $0x28] sm:$0xff]  ;;  %s9094_s21 = scalar_lea.vmem %s9124_s9, %s5494_s10 }
  0x15   : > { %6451 = vmatpush3.bf16.msra.mxu0 %v6448_v5  ;;  %v375_v18 = vld [vmem:[%s7184_s12 + $0x30] sm:$0xff]  ;;  %v376_v19 = vld [vmem:[%s7184_s12 + $0x38] sm:$0xff]  ;;  %v377_v20 = vld [vmem:[%s7184_s12 + $0x40] sm:$0xff] }
  0x16   : > { %6453 = vmatprep.subr.bf16.mxu0 %v6452_v8  ;;  %v378_v21 = vld [vmem:[%s7184_s12 + $0x48] sm:$0xff]  ;;  %v379_v22 = vld [vmem:[%s7184_s12 + $0x50] sm:$0xff]  ;;  %v380_v23 = vld [vmem:[%s7184_s12 + $0x58] sm:$0xff] }
  0x17   : > { %v381_v24 = vld [vmem:[%s7184_s12 + $0x60] sm:$0xff]  ;;  %v382_v25 = vld [vmem:[%s7184_s12 + $0x68] sm:$0xff]  ;;  %v383_v26 = vld [vmem:[%s7184_s12 + $0x70] sm:$0xff] }
  0x18   : > { %v384_v27 = vld [vmem:[%s7184_s12 + $0x78] sm:$0xff] }
  0x19   : > { %6455 = vmatpush3.bf16.msra.mxu0 %v6452_v8 }
  0x1a   : > { %6457 = vmatprep.subr.bf16.mxu0 %v6456_v12 }
  0x1d   : > { %6459 = vmatpush3.bf16.msra.mxu0 %v6456_v12 }
  0x20   : > { %6041 = vmatmul.mubr.msk.f32.vlgmr.msra.gmra.mrb[0].mxu0 %vm445_vm0, %v370_v13 }
  0x21   : > { %6043 = vmatprep.mubr.msk.f32.mxu0 %vm445_vm0, %v371_v14 }
  0x24   : > { %6044 = vmatmul.mubr.msk.f32.gmra.mrb[2].mxu0 %vm445_vm0, %v372_v15 }
  0x25   : > { %6046 = vmatprep.mubr.msk.f32.mxu0 %vm445_vm0, %v373_v16 }
  0x28   : > { %6047 = vmatmul.mubr.msk.f32.gmra.mrb[4].mxu0 %vm445_vm0, %v374_v17 }
  0x29   : > { %6049 = vmatprep.mubr.msk.f32.mxu0 %vm445_vm0, %v375_v18 }
  0x2c   : > { %6050 = vmatmul.mubr.msk.f32.gmra.mrb[6].mxu0 %vm445_vm0, %v376_v19 }
  0x2d   : > { %6052 = vmatprep.mubr.msk.f32.mxu0 %vm445_vm0, %v377_v20 }
  0x30   : > { %6053 = vmatmul.mubr.msk.f32.gmra.mrb[8].mxu0 %vm445_vm0, %v378_v21 }
  0x31   : > { %6055 = vmatprep.mubr.msk.f32.mxu0 %vm445_vm0, %v379_v22 }
  0x34   : > { %6056 = vmatmul.mubr.msk.f32.gmra.mrb[10].mxu0 %vm445_vm0, %v380_v23 }
  0x35   : > { %6058 = vmatprep.mubr.msk.f32.mxu0 %vm445_vm0, %v381_v24 }
  0x38   : > { %6059 = vmatmul.mubr.msk.f32.gmra.mrb[12].mxu0 %vm445_vm0, %v382_v25 }
  0x39   : > { %6061 = vmatprep.mubr.msk.f32.mxu0 %vm445_vm0, %v383_v26 }
  0x3c   : > { %6062 = vmatmul.mubr.msk.f32.gmra.mrb[14].mxu0 %vm445_vm0, %v384_v27 }
  0xf3   : > { %v6042_v29 = vpop.f32.mrb[0].mxu0 }
  0xf4   : > { %v710_v30 = vadd.f32 %v6042_v29, %v7221_v28  ;;  %v704_v31 = vpop.f32.mrb[1].mxu0 }
  0xf5   : > { %v705_v32 = vadd.f32 %v7221_v28, %v704_v31 }
  0xf6   : > { %1025 = vst.msk [vmem:[#allocation2 + $0x8] sm:$0xff] %vm1023_vm1, %v710_v30 }
  0xf7   : > { %1024 = vst.msk [vmem:[#allocation2] sm:$0xff] %vm1023_vm1, %v705_v32  ;;  %v6045_v33 = vpop.f32.mrb[2].mxu0 }
  0xf8   : > { %v720_v34 = vadd.f32 %v6045_v33, %v7221_v28  ;;  %v714_v35 = vpop.f32.mrb[3].mxu0 }
  0xf9   : > { %v715_v36 = vadd.f32 %v7221_v28, %v714_v35  ;;  %v7294_v35 = vld [vmem:[%s9123_s8 + $0x1] ss:$0 sm:$0xff] }
  0xfa   : > { %1027 = vst.msk [vmem:[#allocation2 + $0x18] sm:$0xff] %vm1023_vm1, %v720_v34 }
  0xfb   : > { %1026 = vst.msk [vmem:[#allocation2 + $0x10] sm:$0xff] %vm1023_vm1, %v715_v36  ;;  %v6048_v37 = vpop.f32.mrb[4].mxu0 }
  0xfc   : > { %v730_v38 = vadd.f32 %v6048_v37, %v7221_v28  ;;  %v724_v39 = vpop.f32.mrb[5].mxu0 }
  0xfd   : > { %v725_v40 = vadd.f32 %v7221_v28, %v724_v39  ;;  %v7233_v41 = vld [vmem:[#allocation2 + $0x8] sm:$0xff] }
  0xfe   : > { %1029 = vst.msk [vmem:[#allocation2 + $0x28] sm:$0xff] %vm1023_vm1, %v730_v38  ;;  %v7236_v42 = vld [vmem:[#allocation2] sm:$0xff]  ;;  %v5563_v43 = vmul.f32 -1.442695, %v7233_v41 }
  0xff   : > { %1028 = vst.msk [vmem:[#allocation2 + $0x20] sm:$0xff] %vm1023_vm1, %v725_v40  ;;  %v6051_v44 = vpop.f32.mrb[6].mxu0  ;;  %v5562_v45 = vmul.f32 -1.442695, %v7236_v42 }
 0x100   : > { %v740_v46 = vadd.f32 %v6051_v44, %v7221_v28  ;;  %v734_v47 = vpop.f32.mrb[7].mxu0  ;;  %6667 = vpow2.f32 %v5563_v43 }
 0x101   : > { %v735_v48 = vadd.f32 %v7221_v28, %v734_v47  ;;  %6669 = vpow2.f32 %v5562_v45  ;;  %v7243_v49 = vld [vmem:[#allocation2 + $0x18] sm:$0xff] }
 0x102   : > { %1031 = vst.msk [vmem:[#allocation2 + $0x38] sm:$0xff] %vm1023_vm1, %v740_v46  ;;  %v7246_v50 = vld [vmem:[#allocation2 + $0x10] sm:$0xff]  ;;  %v5565_v51 = vmul.f32 -1.442695, %v7243_v49 }
 0x103   : > { %1030 = vst.msk [vmem:[#allocation2 + $0x30] sm:$0xff] %vm1023_vm1, %v735_v48  ;;  %v6054_v52 = vpop.f32.mrb[8].mxu0  ;;  %v5564_v53 = vmul.f32 -1.442695, %v7246_v50 }
 0x104   : > { %v750_v54 = vadd.f32 %v6054_v52, %v7221_v28  ;;  %v744_v55 = vpop.f32.mrb[9].mxu0  ;;  %6671 = vpow2.f32 %v5565_v51 }
 0x105   : > { %v745_v56 = vadd.f32 %v7221_v28, %v744_v55  ;;  %6673 = vpow2.f32 %v5564_v53  ;;  %v7253_v57 = vld [vmem:[#allocation2 + $0x28] sm:$0xff] }
 0x106   : > { %1033 = vst.msk [vmem:[#allocation2 + $0x48] sm:$0xff] %vm1023_vm1, %v750_v54  ;;  %v7256_v58 = vld [vmem:[#allocation2 + $0x20] sm:$0xff]  ;;  %v5567_v59 = vmul.f32 -1.442695, %v7253_v57 }
 0x107   : > { %1032 = vst.msk [vmem:[#allocation2 + $0x40] sm:$0xff] %vm1023_vm1, %v745_v56  ;;  %v6057_v60 = vpop.f32.mrb[10].mxu0  ;;  %v5566_v61 = vmul.f32 -1.442695, %v7256_v58 }
 0x108   : > { %v760_v62 = vadd.f32 %v6057_v60, %v7221_v28  ;;  %v754_v63 = vpop.f32.mrb[11].mxu0  ;;  %6675 = vpow2.f32 %v5567_v59 }
 0x109   : > { %v755_v0 = vadd.f32 %v7221_v28, %v754_v63  ;;  %6677 = vpow2.f32 %v5566_v61  ;;  %v7263_v1 = vld [vmem:[#allocation2 + $0x38] sm:$0xff] }
 0x10a   : > { %v6668_v2 = vpop.eup %6667  ;;  %1035 = vst.msk [vmem:[#allocation2 + $0x58] sm:$0xff] %vm1023_vm1, %v760_v62  ;;  %v7266_v3 = vld [vmem:[#allocation2 + $0x30] sm:$0xff]  ;;  %v5569_v4 = vmul.f32 -1.442695, %v7263_v1 }
 0x10b   : > { %v6670_v5 = vpop.eup %6669  ;;  %1034 = vst.msk [vmem:[#allocation2 + $0x50] sm:$0xff] %vm1023_vm1, %v755_v0  ;;  %v1157_v6 = vadd.f32 1.0, %v6668_v2  ;;  %v5568_v7 = vmul.f32 -1.442695, %v7266_v3  ;;  %v6060_v8 = vpop.f32.mrb[12].mxu0 }
 0x10c   : > { %v1156_v9 = vadd.f32 1.0, %v6670_v5  ;;  %6679 = vpow2.f32 %v5569_v4  ;;  %v770_v10 = vadd.f32 %v6060_v8, %v7221_v28  ;;  %v764_v11 = vpop.f32.mrb[13].mxu0 }
 0x10d   : > { %6681 = vrcp.f32 %v1157_v6  ;;  %v7272_v12 = vld [vmem:[#allocation2 + $0x48] sm:$0xff]  ;;  %v765_v13 = vadd.f32 %v7221_v28, %v764_v11 }
 0x10e   : > { %v6672_v14 = vpop.eup %6671  ;;  %6683 = vrcp.f32 %v1156_v9  ;;  %v7275_v15 = vld [vmem:[#allocation2 + $0x40] sm:$0xff]  ;;  %v5571_v16 = vmul.f32 -1.442695, %v7272_v12  ;;  %1037 = vst.msk [vmem:[#allocation2 + $0x68] sm:$0xff] %vm1023_vm1, %v770_v10 }
 0x10f   : > { %v6674_v17 = vpop.eup %6673  ;;  %v1159_v18 = vadd.f32 1.0, %v6672_v14  ;;  %6685 = vpow2.f32 %v5568_v7  ;;  %v5570_v19 = vmul.f32 -1.442695, %v7275_v15  ;;  %1036 = vst.msk [vmem:[#allocation2 + $0x60] sm:$0xff] %vm1023_vm1, %v765_v13  ;;  %v6063_v20 = vpop.f32.mrb[14].mxu0 }
 0x110   : > { %v1158_v21 = vadd.f32 1.0, %v6674_v17  ;;  %6687 = vpow2.f32 %v5571_v16  ;;  %v780_v22 = vadd.f32 %v6063_v20, %v7221_v28  ;;  %v774_v23 = vpop.f32.mrb[15].mxu0  ;;  %v7359_v17 = vld [vmem:[%s9118_s3] sm:$0xff]  }
 0x111   : > { %6689 = vrcp.f32 %v1159_v18  ;;  %v7282_v24 = vld [vmem:[#allocation2 + $0x58] sm:$0xff]  ;;  %v775_v25 = vadd.f32 %v7221_v28, %v774_v23  ;;  %6136 = vmatprep.subr.bf16.mxu0 %v7359_v17  ;;  %6156 = vmatprep.subr.bf16.mxu1 %v7359_v17 }
 0x112   : > { %v6676_v26 = vpop.eup %6675  ;;  %6691 = vrcp.f32 %v1158_v21  ;;  %v7285_v27 = vld [vmem:[#allocation2 + $0x50] sm:$0xff]  ;;  %v5573_v29 = vmul.f32 -1.442695, %v7282_v24  ;;  %1039 = vst.msk [vmem:[#allocation2 + $0x78] sm:$0xff] %vm1023_vm1, %v780_v22  ;;  %6137 = vmatpush3.bf16.msra.mxu0 %v7359_v17  ;;  %6157 = vmatpush3.bf16.msra.mxu1 %v7359_v17 }
 0x113   : > { %v6678_v30 = vpop.eup %6677  ;;  %v1161_v31 = vadd.f32 1.0, %v6676_v26  ;;  %6693 = vpow2.f32 %v5570_v19  ;;  %v5572_v32 = vmul.f32 -1.442695, %v7285_v27  ;;  %1038 = vst.msk [vmem:[#allocation2 + $0x70] sm:$0xff] %vm1023_vm1, %v775_v25 }
 0x114   : > { %v1160_v33 = vadd.f32 1.0, %v6678_v30  ;;  %6695 = vpow2.f32 %v5573_v29 }
 0x115   : > { %6697 = vrcp.f32 %v1161_v31  ;;  %v7370_v21 = vld [vmem:[#allocation2 + $0x68] sm:$0xff] }
 0x116   : > { %v6680_v34 = vpop.eup %6679  ;;  %6699 = vrcp.f32 %v1160_v33  ;;  %v7365_v18 = vld [vmem:[#allocation2 + $0x60] sm:$0xff]  ;;  %v5575_v23 = vmul.f32 -1.442695, %v7370_v21 }
 0x117   : > { %v7296_v36 = vpop.eup %6681  ;;  %v1163_v37 = vadd.f32 1.0, %v6680_v34  ;;  %6701 = vpow2.f32 %v5572_v32  ;;  %v5574_v19 = vmul.f32 -1.442695, %v7365_v18 }
 0x118   : > { %v7298_v38 = vpop.eup %6683  ;;  %v1209_v52 = vmul.f32 %v7296_v36, %v7294_v35 }
 0x119   : > { %v6686_v39 = vpop.eup %6685  ;;  %v1208_v40 = vmul.f32 %v7298_v38, %v7294_v35  ;;  %6703 = vrcp.f32 %v1163_v37  ;;  %v7374_v25 = vld [vmem:[#allocation2 + $0x78] sm:$0xff] }
 0x11a   : > { %v6688_v43 = vpop.eup %6687  ;;  %v1162_v44 = vadd.f32 1.0, %v6686_v39  ;;  %v7368_v20 = vld [vmem:[#allocation2 + $0x70] sm:$0xff]  ;;  %v5577_v26 = vmul.f32 -1.442695, %v7374_v25 }
 0x11b   : > { %v7302_v45 = vpop.eup %6689  ;;  %1240 = vrot.lane.b32.xlu0 %v1208_v40, %s7094_s17  ;;  %v1165_v46 = vadd.f32 1.0, %v6688_v43  ;;  %v5576_v22 = vmul.f32 -1.442695, %v7368_v20 }
 0x11c   : > { %v7305_v47 = vpop.eup %6691  ;;  %6705 = vrcp.f32 %v1162_v44  ;;  %v1211_v61 = vmul.f32 %v7302_v45, %v7294_v35 }
 0x11d   : > { %v6694_v48 = vpop.eup %6693  ;;  %v1210_v51 = vmul.f32 %v7305_v47, %v7294_v35  ;;  %6707 = vrcp.f32 %v1165_v46 }
 0x11e   : > { %v6696_v53 = vpop.eup %6695  ;;  %v1164_v54 = vadd.f32 1.0, %v6694_v48 }
 0x11f   : > { %v7311_v55 = vpop.eup %6697  ;;  %1244 = vrot.lane.b32.xlu1 %v1210_v51, %s7094_s17  ;;  %1242 = vrot.lane.b32.xlu0 %v1209_v52, %s7094_s17  ;;  %v1167_v56 = vadd.f32 1.0, %v6696_v53 }
 0x120   : > { %v7315_v59 = vpop.eup %6699  ;;  %6709 = vrcp.f32 %v1164_v54  ;;  %v1213_v0 = vmul.f32 %v7311_v55, %v7294_v35 }
 0x121   : > { %v6702_v60 = vpop.eup %6701  ;;  %v1212_v62 = vmul.f32 %v7315_v59, %v7294_v35  ;;  %6711 = vrcp.f32 %v1167_v56 }
 0x122   : > { %v1166_v63 = vadd.f32 1.0, %v6702_v60 }
 0x123   : > { %1246 = vrot.lane.b32.xlu1 %v1211_v61, %s7094_s17  ;;  %1248 = vrot.lane.b32.xlu0 %v1212_v62, %s7094_s17  ;;  %v7325_v2 = vpop.eup %6703 }
 0x124   : > { %6713 = vrcp.f32 %v1166_v63  ;;  %v1215_v6 = vmul.f32 %v7325_v2, %v7294_v35 }
 0x125   : > { %6715 = vpow2.f32 %v5574_v19 }
 0x126   : > { %v7327_v4 = vpop.eup %6705  ;;  %6717 = vpow2.f32 %v5576_v22 }
 0x127   : > { %1250 = vrot.lane.b32.xlu1 %v1213_v0, %s7094_s17  ;;  %v1214_v5 = vmul.f32 %v7327_v4, %v7294_v35  ;;  %v7334_v7 = vpop.eup %6707  ;;  %6719 = vpow2.f32 %v5575_v23 }
 0x128   : > { %v1217_v10 = vmul.f32 %v7334_v7, %v7294_v35  ;;  %6721 = vpow2.f32 %v5577_v26 }
 0x129   : > { %1252 = vrot.lane.b32.xlu0 %v1214_v5, %s7094_s17 }
 0x12a   : > { %v7337_v8 = vpop.eup %6709 }
 0x12b   : > { %1254 = vrot.lane.b32.xlu1 %v1215_v6, %s7094_s17  ;;  %v1216_v9 = vmul.f32 %v7337_v8, %v7294_v35  ;;  %v7344_v11 = vpop.eup %6711 }
 0x12c   : > { %v1219_v16 = vmul.f32 %v7344_v11, %v7294_v35 }
 0x12d   : > { %1256 = vrot.lane.b32.xlu0 %v1216_v9, %s7094_s17 }
 0x12e   : > { %v7347_v13 = vpop.eup %6713 }
 0x12f   : > { %1258 = vrot.lane.b32.xlu1 %v1217_v10, %s7094_s17  ;;  %v1218_v14 = vmul.f32 %v7347_v13, %v7294_v35  ;;  %v6716_v29 = vpop.eup %6715 }
 0x130   : > { %v1168_v32 = vadd.f32 1.0, %v6716_v29  ;;  %v6718_v33 = vpop.eup %6717  ;;  %v385_v29 = vld [vmem:[%s7184_s12 + $0x80] sm:$0xff] }
 0x131   : > { %1260 = vrot.lane.b32.xlu0 %v1218_v14, %s7094_s17  ;;  %v6720_v34 = vpop.eup %6719  ;;  %v1170_v44 = vadd.f32 1.0, %v6718_v33  ;;  %6064 = vmatprep.mubr.msk.f32.mxu0 %vm445_vm0, %v385_v29  ;;  %v389_v33 = vld [vmem:[%s7184_s12 + $0xa0] sm:$0xff]  ;;  %v419_v29 = vld [vmem:[%s7184_s12 + $0x190] sm:$0xff] }
 0x132   : > { %v1169_v46 = vadd.f32 1.0, %v6720_v34  ;;  %v6722_v48 = vpop.eup %6721 }
 0x133   : > { %1262 = vrot.lane.b32.xlu1 %v1219_v16, %s7094_s17  ;;  %v1171_v53 = vadd.f32 1.0, %v6722_v48  ;;  %v393_v48 = vld [vmem:[%s7184_s12 + $0xc0] sm:$0xff] }
 0x18d   : > { %v1241_v30 = vpop.permute.xlu0 %1240 }
 0x18e   : > { %v1288_v31 = vadd.f32 %v1241_v30, %v7236_v42  ;;  %v387_v30 = vld [vmem:[%s7184_s12 + $0x90] sm:$0xff] }
 0x190   : > { %6723 = vtanh.f32 %v1288_v31 }
 0x191   : > { %v1245_v37 = vpop.permute.xlu1 %1244  ;;  %v1243_v39 = vpop.permute.xlu0 %1242  ;;  %6725 = vrcp.f32 %v1168_v32  ;;  %v388_v32 = vld [vmem:[%s7184_s12 + $0x98] sm:$0xff] }
 0x192   : > { %v1290_v40 = vadd.f32 %v1245_v37, %v7246_v50  ;;  %v1289_v43 = vadd.f32 %v1243_v39, %v7233_v41  ;;  %v390_v37 = vld [vmem:[%s7184_s12 + $0xa8] sm:$0xff] }
 0x194   : > { %6727 = vtanh.f32 %v1290_v40  ;;  %v391_v40 = vld [vmem:[%s7184_s12 + $0xb0] sm:$0xff] }
 0x195   : > { %6729 = vtanh.f32 %v1289_v43  ;;  %v1247_v51 = vpop.permute.xlu1 %1246  ;;  %v1249_v52 = vpop.permute.xlu0 %1248  ;;  %v6666_v43 = vld [vmem:[%s9118_s3 + $0x8] sm:$0xff]  }
 0x196   : > { %v1291_v42 = vadd.f32 %v1247_v51, %v7243_v49  ;;  %6731 = vrcp.f32 %v1170_v44  ;;  %v1292_v50 = vadd.f32 %v1249_v52, %v7256_v58  ;;  %v392_v44 = vld [vmem:[%s7184_s12 + $0xb8] sm:$0xff]  ;;  %6138 = vmatprep.subr.bf16.mxu0 %v6666_v43  ;;  %6158 = vmatprep.subr.bf16.mxu1 %v6666_v43  ;;  %v394_v51 = vld [vmem:[%s7184_s12 + $0xc8] sm:$0xff]  ;;  %v395_v52 = vld [vmem:[%s7184_s12 + $0xd0] sm:$0xff] }
 0x197   : > { %6733 = vrcp.f32 %v1169_v46  ;;  %6139 = vmatpush3.bf16.msra.mxu0 %v6666_v43  ;;  %6159 = vmatpush3.bf16.msra.mxu1 %v6666_v43  ;;  %v430_v43 = vld [vmem:[%s7184_s12 + $0x1e8] sm:$0xff] }
 0x198   : > { %6735 = vtanh.f32 %v1291_v42  ;;  %6176 = vmatprep.subr.bf16.mxu1 %v7359_v17  ;;  %v396_v42 = vld [vmem:[%s7184_s12 + $0xd8] sm:$0xff] }
 0x199   : > { %v1251_v56 = vpop.permute.xlu1 %1250  ;;  %6737 = vrcp.f32 %v1171_v53  ;;  %v397_v53 = vld [vmem:[%s7184_s12 + $0xe0] sm:$0xff]  ;;  %v400_v17 = vld [vmem:[%s7184_s12 + $0xf8] sm:$0xff] }
 0x19a   : > { %v6724_v54 = vpop.eup %6723  ;;  %6739 = vtanh.f32 %v1292_v50  ;;  %v1293_v9 = vadd.f32 %v1251_v56, %v7253_v57  ;;  %v399_v56 = vld [vmem:[%s7184_s12 + $0xf0] sm:$0xff]  ;;  %v402_v50 = vld [vmem:[%s7184_s12 + $0x108] sm:$0xff] }
 0x19b   : > { %v1253_v60 = vpop.permute.xlu0 %1252  ;;  %1352 = vrot.lane.b32.xlu0 %v6724_v54, %s7095_s20  ;;  %v7382_v41 = vpop.eup %6725  ;;  %v398_v54 = vld [vmem:[%s7184_s12 + $0xe8] sm:$0xff] }
 0x19c   : > { %v1220_v49 = vmul.f32 %v7382_v41, %v7294_v35  ;;  %v1294_v0 = vadd.f32 %v1253_v60, %v7266_v3  ;;  %v401_v60 = vld [vmem:[%s7184_s12 + $0x100] sm:$0xff] }
 0x19d   : > { %v1255_v5 = vpop.permute.xlu1 %1254 }
 0x19e   : > { %v6728_v61 = vpop.eup %6727  ;;  %6741 = vtanh.f32 %v1294_v0  ;;  %v1295_v57 = vadd.f32 %v1255_v5, %v7263_v1  ;;  %v386_v1 = vld [vmem:[%s7184_s12 + $0x88] sm:$0xff]  ;;  %v407_v5 = vld [vmem:[%s7184_s12 + $0x130] sm:$0xff] }
 0x19f   : > { %v6730_v62 = vpop.eup %6729  ;;  %1356 = vrot.lane.b32.xlu0 %v6728_v61, %s7095_s20  ;;  %v1257_v58 = vpop.permute.xlu0 %1256  ;;  %6743 = vtanh.f32 %v1293_v9  ;;  %6065 = vmatmul.mubr.msk.f32.gmra.mrb[16].mxu0 %vm445_vm0, %v386_v1  ;;  %v403_v61 = vld [vmem:[%s7184_s12 + $0x110] sm:$0xff]  ;;  %v406_v0 = vld [vmem:[%s7184_s12 + $0x128] sm:$0xff]  ;;  %v408_v9 = vld [vmem:[%s7184_s12 + $0x138] sm:$0xff] }
 0x1a0   : > { %v7388_v63 = vpop.eup %6731  ;;  %1354 = vrot.lane.b32.xlu1 %v6730_v62, %s7095_s20  ;;  %v1296_v16 = vadd.f32 %v1257_v58, %v7275_v15  ;;  %6067 = vmatprep.mubr.msk.f32.mxu0 %vm445_vm0, %v387_v30  ;;  %v404_v62 = vld [vmem:[%s7184_s12 + $0x118] sm:$0xff]  ;;  %v409_v58 = vld [vmem:[%s7184_s12 + $0x140] sm:$0xff] }
 0x1a1   : > { %v7392_v6 = vpop.eup %6733  ;;  %v1222_v14 = vmul.f32 %v7388_v63, %v7294_v35  ;;  %v1259_v22 = vpop.permute.xlu1 %1258  ;;  %v420_v1 = vld [vmem:[%s7184_s12 + $0x198] sm:$0xff]  ;;  %v421_v30 = vld [vmem:[%s7184_s12 + $0x1a0] sm:$0xff] }
 0x1a2   : > { %v6736_v10 = vpop.eup %6735  ;;  %v1221_v3 = vmul.f32 %v7392_v6, %v7294_v35  ;;  %6745 = vtanh.f32 %v1296_v16  ;;  %v1297_v23 = vadd.f32 %v1259_v22, %v7272_v12  ;;  %v412_v16 = vld [vmem:[%s7184_s12 + $0x158] sm:$0xff]  ;;  %v415_v22 = vld [vmem:[%s7184_s12 + $0x170] sm:$0xff] }
 0x1a3   : > { %1264 = vrot.lane.b32.xlu0 %v1220_v49, %s7094_s17  ;;  %v7402_v19 = vpop.eup %6737  ;;  %6747 = vtanh.f32 %v1295_v57  ;;  %6068 = vmatmul.mubr.msk.f32.gmra.mrb[18].mxu0 %vm445_vm0, %v388_v32  ;;  %v405_v49 = vld [vmem:[%s7184_s12 + $0x120] sm:$0xff]  ;;  %v414_v57 = vld [vmem:[%s7184_s12 + $0x168] sm:$0xff]  ;;  %v424_v32 = vld [vmem:[%s7184_s12 + $0x1b8] sm:$0xff] }
 0x1a4   : > { %1358 = vrot.lane.b32.xlu1 %v6736_v10, %s7095_s20  ;;  %v1223_v15 = vmul.f32 %v7402_v19, %v7294_v35  ;;  %v6740_v26 = vpop.eup %6739  ;;  %6749 = vtanh.f32 %v1297_v23  ;;  %6070 = vmatprep.mubr.msk.f32.mxu0 %vm445_vm0, %v389_v33  ;;  %v410_v10 = vld [vmem:[%s7184_s12 + $0x148] sm:$0xff]  ;;  %v417_v23 = vld [vmem:[%s7184_s12 + $0x180] sm:$0xff] }
 0x1a5   : > { %v425_v33 = vld [vmem:[%s7184_s12 + $0x1c0] sm:$0xff] }
 0x1a7   : > { %1268 = vrot.lane.b32.xlu0 %v1222_v14, %s7094_s17  ;;  %6071 = vmatmul.mubr.msk.f32.gmra.mrb[20].mxu0 %vm445_vm0, %v390_v37  ;;  %v411_v14 = vld [vmem:[%s7184_s12 + $0x150] sm:$0xff] }
 0x1a8   : > { %1266 = vrot.lane.b32.xlu1 %v1221_v3, %s7094_s17  ;;  %v6742_v31 = vpop.eup %6741  ;;  %6073 = vmatprep.mubr.msk.f32.mxu0 %vm445_vm0, %v391_v40  ;;  %v413_v3 = vld [vmem:[%s7184_s12 + $0x160] sm:$0xff]  ;;  %v427_v37 = vld [vmem:[%s7184_s12 + $0x1d0] sm:$0xff] }
 0x1a9   : > { %v6744_v12 = vpop.eup %6743  ;;  %v429_v40 = vld [vmem:[%s7184_s12 + $0x1e0] sm:$0xff] }
 0x1ab   : > { %1360 = vrot.lane.b32.xlu0 %v6740_v26, %s7095_s20  ;;  %6074 = vmatmul.mubr.msk.f32.gmra.mrb[22].mxu0 %vm445_vm0, %v392_v44  ;;  %v418_v26 = vld [vmem:[%s7184_s12 + $0x188] sm:$0xff]  ;;  %v431_v44 = vld [vmem:[%s7184_s12 + $0x1f0] sm:$0xff] }
 0x1ac   : > { %1270 = vrot.lane.b32.xlu1 %v1223_v15, %s7094_s17  ;;  %v6746_v34 = vpop.eup %6745  ;;  %6076 = vmatprep.mubr.msk.f32.mxu0 %vm445_vm0, %v393_v48  ;;  %v416_v15 = vld [vmem:[%s7184_s12 + $0x178] sm:$0xff]  ;;  %v1261_v48 = vpop.permute.xlu0 %1260 }
 0x1ad   : > { %v6748_v39 = vpop.eup %6747 }
 0x1ae   : > { %v6750_v46 = vpop.eup %6749 }
 0x1af   : > { %1364 = vrot.lane.b32.xlu0 %v6742_v31, %s7095_s20  ;;  %6077 = vmatmul.mubr.msk.f32.gmra.mrb[24].mxu0 %vm445_vm0, %v394_v51  ;;  %v422_v31 = vld [vmem:[%s7184_s12 + $0x1a8] sm:$0xff]  ;;  %v1298_v51 = vadd.f32 %v1261_v48, %v7285_v27  ;;  %v1323_v27 = vsub.f32 1.0, %v7302_v45 }
 0x1b0   : > { %1362 = vrot.lane.b32.xlu1 %v6744_v12, %s7095_s20  ;;  %6079 = vmatprep.mubr.msk.f32.mxu0 %vm445_vm0, %v395_v52  ;;  %v423_v12 = vld [vmem:[%s7184_s12 + $0x1b0] sm:$0xff]  ;;  %v1263_v52 = vpop.permute.xlu1 %1262 }
 0x1b1   : > { %6751 = vtanh.f32 %v1298_v51 }
 0x1b3   : > { %1368 = vrot.lane.b32.xlu0 %v6746_v34, %s7095_s20  ;;  %6080 = vmatmul.mubr.msk.f32.gmra.mrb[26].mxu0 %vm445_vm0, %v396_v42  ;;  %v426_v34 = vld [vmem:[%s7184_s12 + $0x1c8] sm:$0xff] }
 0x1b4   : > { %1366 = vrot.lane.b32.xlu1 %v6748_v39, %s7095_s20  ;;  %6082 = vmatprep.mubr.msk.f32.mxu0 %vm445_vm0, %v397_v53  ;;  %v428_v39 = vld [vmem:[%s7184_s12 + $0x1d8] sm:$0xff]  ;;  %v1299_v53 = vadd.f32 %v1263_v52, %v7282_v24 }
 0x1b6   : > { %6753 = vtanh.f32 %v1299_v53 }
 0x1b7   : > { %6083 = vmatmul.mubr.msk.f32.gmra.mrb[28].mxu0 %vm445_vm0, %v398_v54  ;;  %v1320_v54 = vsub.f32 1.0, %v7298_v38 }
 0x1b8   : > { %1370 = vrot.lane.b32.xlu1 %v6750_v46, %s7095_s20  ;;  %6085 = vmatprep.mubr.msk.f32.mxu0 %vm445_vm0, %v399_v56  ;;  %v432_v46 = vld [vmem:[%s7184_s12 + $0x1f8] sm:$0xff]  ;;  %v1321_v56 = vsub.f32 1.0, %v7296_v36 }
 0x1bb   : > { %6086 = vmatmul.mubr.msk.f32.gmra.mrb[30].mxu0 %vm445_vm0, %v400_v17 }
 0x1bc   : > { %6088 = vmatprep.mubr.msk.f32.mxu0 %vm445_vm0, %v401_v60 }
 0x1bf   : > { %6089 = vmatmul.mubr.msk.f32.gmra.mrb[32].mxu0 %vm445_vm0, %v402_v50 }
 0x1c0   : > { %6091 = vmatprep.mubr.msk.f32.mxu0 %vm445_vm0, %v403_v61 }
 0x1c3   : > { %6092 = vmatmul.mubr.msk.f32.gmra.mrb[34].mxu0 %vm445_vm0, %v404_v62  ;;  %v1322_v62 = vsub.f32 1.0, %v7305_v47 }
 0x1c4   : > { %6094 = vmatprep.mubr.msk.f32.mxu0 %vm445_vm0, %v405_v49 }
 0x1c7   : > { %6095 = vmatmul.mubr.msk.f32.gmra.mrb[36].mxu0 %vm445_vm0, %v406_v0 }
 0x1c8   : > { %6097 = vmatprep.mubr.msk.f32.mxu0 %vm445_vm0, %v407_v5 }
 0x1cb   : > { %6098 = vmatmul.mubr.msk.f32.gmra.mrb[38].mxu0 %vm445_vm0, %v408_v9 }
 0x1cc   : > { %6100 = vmatprep.mubr.msk.f32.mxu0 %vm445_vm0, %v409_v58  ;;  %v6752_v58 = vpop.eup %6751 }
 0x1cf   : > { %6101 = vmatmul.mubr.msk.f32.gmra.mrb[40].mxu0 %vm445_vm0, %v410_v10 }
 0x1d0   : > { %6103 = vmatprep.mubr.msk.f32.mxu0 %vm445_vm0, %v411_v14 }
 0x1d3   : > { %6104 = vmatmul.mubr.msk.f32.gmra.mrb[42].mxu0 %vm445_vm0, %v412_v16  ;;  %v6754_v16 = vpop.eup %6753 }
 0x1d4   : > { %6106 = vmatprep.mubr.msk.f32.mxu0 %vm445_vm0, %v413_v3 }
 0x1d7   : > { %6107 = vmatmul.mubr.msk.f32.gmra.mrb[44].mxu0 %vm445_vm0, %v414_v57 }
 0x1d8   : > { %6109 = vmatprep.mubr.msk.f32.mxu0 %vm445_vm0, %v415_v22  ;;  %v1324_v22 = vsub.f32 1.0, %v7315_v59 }
 0x1db   : > { %6110 = vmatmul.mubr.msk.f32.gmra.mrb[46].mxu0 %vm445_vm0, %v416_v15  ;;  %v1325_v15 = vsub.f32 1.0, %v7311_v55 }
 0x1dc   : > { %6112 = vmatprep.mubr.msk.f32.mxu0 %vm445_vm0, %v417_v23 }
 0x1df   : > { %6113 = vmatmul.mubr.msk.f32.gmra.mrb[48].mxu0 %vm445_vm0, %v418_v26 }
 0x1e0   : > { %6115 = vmatprep.mubr.msk.f32.mxu0 %vm445_vm0, %v419_v29 }
 0x1e3   : > { %6116 = vmatmul.mubr.msk.f32.gmra.mrb[50].mxu0 %vm445_vm0, %v420_v1 }
 0x1e4   : > { %6118 = vmatprep.mubr.msk.f32.mxu0 %vm445_vm0, %v421_v30  ;;  %v1327_v30 = vsub.f32 1.0, %v7325_v2 }
 0x1e7   : > { %6119 = vmatmul.mubr.msk.f32.gmra.mrb[52].mxu0 %vm445_vm0, %v422_v31 }
 0x1e8   : > { %6121 = vmatprep.mubr.msk.f32.mxu0 %vm445_vm0, %v423_v12 }
 0x1eb   : > { %6122 = vmatmul.mubr.msk.f32.gmra.mrb[54].mxu0 %vm445_vm0, %v424_v32 }
 0x1ec   : > { %6124 = vmatprep.mubr.msk.f32.mxu0 %vm445_vm0, %v425_v33  ;;  %v1328_v33 = vsub.f32 1.0, %v7337_v8 }
 0x1ef   : > { %6125 = vmatmul.mubr.msk.f32.gmra.mrb[56].mxu0 %vm445_vm0, %v426_v34 }
 0x1f0   : > { %6127 = vmatprep.mubr.msk.f32.mxu0 %vm445_vm0, %v427_v37 }
 0x1f3   : > { %6128 = vmatmul.mubr.msk.f32.gmra.mrb[58].mxu0 %vm445_vm0, %v428_v39 }
 0x1f4   : > { %6130 = vmatprep.mubr.msk.f32.mxu0 %vm445_vm0, %v429_v40 }
 0x1f7   : > { %6131 = vmatmul.mubr.msk.f32.gmra.mrb[60].mxu0 %vm445_vm0, %v430_v43 }
 0x1f8   : > { %6133 = vmatprep.mubr.msk.f32.mxu0 %vm445_vm0, %v431_v44 }
 0x1fb   : > { %6134 = vmatmul.mubr.msk.f32.gmra.mrb[62].mxu0 %vm445_vm0, %v432_v46 }
 0x20d   : > { %v1353_v42 = vpop.permute.xlu0 %1352 }
 0x20e   : > { %v7521_v50 = vmul.f32 %v1353_v42, %v1320_v54 }
 0x211   : > { %v1357_v17 = vpop.permute.xlu0 %1356 }
 0x212   : > { %v1355_v60 = vpop.permute.xlu1 %1354  ;;  %v7530_v5 = vmul.f32 %v1357_v17, %v1322_v62 }
 0x213   : > { %v7523_v61 = vmul.f32 %v1355_v60, %v1321_v56 }
 0x215   : > { %v1265_v49 = vpop.permute.xlu0 %1264  ;;  %v1514_v0 = vpack.c.bf16 %v7523_v61, %v7521_v50 }
 0x216   : > { %v1359_v24 = vpop.permute.xlu1 %1358  ;;  %v1300_v38 = vadd.f32 %v1265_v49, %v7365_v18 }
 0x217   : > { %v7532_v36 = vmul.f32 %v1359_v24, %v1323_v27  ;;  %1530 = vrot.lane.b32.xlu0 %v1514_v0, %s7095_s20 }
 0x218   : > { %6755 = vtanh.f32 %v1300_v38 }
 0x219   : > { %v1269_v9 = vpop.permute.xlu0 %1268  ;;  %v1515_v47 = vpack.c.bf16 %v7532_v36, %v7530_v5 }
 0x21a   : > { %v1267_v45 = vpop.permute.xlu1 %1266  ;;  %v1302_v18 = vadd.f32 %v1269_v9, %v7368_v20  ;;  %v1326_v20 = vsub.f32 1.0, %v7327_v4  ;;  %v1329_v4 = vsub.f32 1.0, %v7334_v7 }
 0x21b   : > { %v1301_v10 = vadd.f32 %v1267_v45, %v7370_v21  ;;  %1372 = vrot.lane.b32.xlu0 %v6752_v58, %s7095_s20  ;;  %1532 = vrot.lane.b32.xlu1 %v1515_v47, %s7095_s20  ;;  %v1330_v47 = vsub.f32 1.0, %v7347_v13  ;;  %v1331_v58 = vsub.f32 1.0, %v7344_v11 }
 0x21d   : > { %6757 = vtanh.f32 %v1301_v10  ;;  %v1361_v14 = vpop.permute.xlu0 %1360 }
 0x21e   : > { %v1271_v3 = vpop.permute.xlu1 %1270  ;;  %6759 = vtanh.f32 %v1302_v18  ;;  %v7545_v29 = vmul.f32 %v1361_v14, %v1324_v22 }
 0x21f   : > { %1374 = vrot.lane.b32.xlu1 %v6754_v16, %s7095_s20  ;;  %v1303_v57 = vadd.f32 %v1271_v3, %v7374_v25 }
 0x220   : > { %9159 = vst [vmem:[#allocation4_spill] sm:$0xff] %v7545_v29 }
 0x221   : > { %v1365_v26 = vpop.permute.xlu0 %1364  ;;  %6761 = vtanh.f32 %v1303_v57 }
 0x222   : > { %v6756_v21 = vpop.eup %6755  ;;  %v1363_v23 = vpop.permute.xlu1 %1362  ;;  %v7554_v55 = vmul.f32 %v1365_v26, %v1326_v20  ;;  %v1332_v20 = vsub.f32 1.0, %v7382_v41 }
 0x223   : > { %v7547_v1 = vmul.f32 %v1363_v23, %v1325_v15  ;;  %1376 = vrot.lane.b32.xlu0 %v6756_v21, %s7095_s20 }
 0x224   : > { %9161 = vst [vmem:[#allocation6_spill] sm:$0xff] %v7554_v55 }
 0x225   : > { %9160 = vst [vmem:[#allocation5_spill] sm:$0xff] %v7547_v1  ;;  %v1516_v25 = vpack.c.bf16 %v7547_v1, %v7545_v29  ;;  %v1369_v32 = vpop.permute.xlu0 %1368 }
 0x226   : > { %v1367_v59 = vpop.permute.xlu1 %1366  ;;  %v7564_v39 = vmul.f32 %v1369_v32, %v1328_v33 }
 0x227   : > { %v6758_v31 = vpop.eup %6757  ;;  %v7556_v12 = vmul.f32 %v1367_v59, %v1327_v30  ;;  %1534 = vrot.lane.b32.xlu0 %v1516_v25, %s7095_s20  ;;  %v1333_v30 = vsub.f32 1.0, %v7392_v6 }
 0x228   : > { %1378 = vrot.lane.b32.xlu1 %v6758_v31, %s7095_s20  ;;  %v6760_v34 = vpop.eup %6759  ;;  %9163 = vst [vmem:[#allocation8_spill] sm:$0xff] %v7564_v39 }
 0x229   : > { %9162 = vst [vmem:[#allocation7_spill] sm:$0xff] %v7556_v12  ;;  %v1517_v2 = vpack.c.bf16 %v7556_v12, %v7554_v55 }
 0x22a   : > { %v1371_v37 = vpop.permute.xlu1 %1370 }
 0x22b   : > { %v7566_v40 = vmul.f32 %v1371_v37, %v1329_v4  ;;  %1380 = vrot.lane.b32.xlu0 %v6760_v34, %s7095_s20  ;;  %v6762_v44 = vpop.eup %6761 }
 0x22c   : > { %1536 = vrot.lane.b32.xlu1 %v1517_v2, %s7095_s20 }
 0x22d   : > { %9164 = vst [vmem:[#allocation9_spill] sm:$0xff] %v7566_v40  ;;  %v1518_v43 = vpack.c.bf16 %v7566_v40, %v7564_v39 }
 0x22f   : > { %1538 = vrot.lane.b32.xlu0 %v1518_v43, %s7095_s20 }
 0x230   : > { %1382 = vrot.lane.b32.xlu1 %v6762_v44, %s7095_s20 }
 0x272   : > { %v6066_v7 = vpop.f32.mrb[16].mxu0 }
 0x273   : > { %v790_v8 = vadd.f32 %v6066_v7, %v7221_v28  ;;  %v784_v46 = vpop.f32.mrb[17].mxu0 }
 0x274   : > { %v785_v48 = vadd.f32 %v7221_v28, %v784_v46  ;;  %v1334_v46 = vsub.f32 1.0, %v7388_v63 }
 0x275   : > { %1041 = vst.msk [vmem:[#allocation2 + $0x88] sm:$0xff] %vm1023_vm1, %v790_v8 }
 0x276   : > { %1040 = vst.msk [vmem:[#allocation2 + $0x80] sm:$0xff] %vm1023_vm1, %v785_v48  ;;  %v6069_v51 = vpop.f32.mrb[18].mxu0  ;;  %v1335_v48 = vsub.f32 1.0, %v7402_v19 }
 0x277   : > { %v800_v52 = vadd.f32 %v6069_v51, %v7221_v28  ;;  %v794_v42 = vpop.f32.mrb[19].mxu0 }
 0x278   : > { %v795_v53 = vadd.f32 %v7221_v28, %v794_v42 }
 0x279   : > { %1043 = vst.msk [vmem:[#allocation2 + $0x98] sm:$0xff] %vm1023_vm1, %v800_v52 }
 0x27a   : > { %1042 = vst.msk [vmem:[#allocation2 + $0x90] sm:$0xff] %vm1023_vm1, %v795_v53  ;;  %v6072_v54 = vpop.f32.mrb[20].mxu0 }
 0x27b   : > { %v810_v17 = vadd.f32 %v6072_v54, %v7221_v28  ;;  %v804_v60 = vpop.f32.mrb[21].mxu0 }
 0x27c   : > { %v805_v62 = vadd.f32 %v7221_v28, %v804_v60  ;;  %v7646_v60 = vld [vmem:[%s9123_s8] ss:$0 sm:$0xff] }
 0x27d   : > { %1045 = vst.msk [vmem:[#allocation2 + $0xa8] sm:$0xff] %vm1023_vm1, %v810_v17 }
 0x27e   : > { %1044 = vst.msk [vmem:[#allocation2 + $0xa0] sm:$0xff] %vm1023_vm1, %v805_v62  ;;  %v6075_v27 = vpop.f32.mrb[22].mxu0 }
 0x27f   : > { %v820_v0 = vadd.f32 %v6075_v27, %v7221_v28  ;;  %v814_v24 = vpop.f32.mrb[23].mxu0 }
 0x280   : > { %v815_v9 = vadd.f32 %v7221_v28, %v814_v24 }
 0x281   : > { %1047 = vst.msk [vmem:[#allocation2 + $0xb8] sm:$0xff] %vm1023_vm1, %v820_v0 }
 0x282   : > { %v6078_v45 = vpop.f32.mrb[24].mxu0  ;;  %1046 = vst.msk [vmem:[#allocation2 + $0xb0] sm:$0xff] %vm1023_vm1, %v815_v9 }
 0x283   : > { %v830_v18 = vadd.f32 %v6078_v45, %v7221_v28  ;;  %v824_v14 = vpop.f32.mrb[25].mxu0 }
 0x284   : > { %v825_v57 = vadd.f32 %v7221_v28, %v824_v14 }
 0x285   : > { %1049 = vst.msk [vmem:[#allocation2 + $0xc8] sm:$0xff] %vm1023_vm1, %v830_v18 }
 0x286   : > { %1048 = vst.msk [vmem:[#allocation2 + $0xc0] sm:$0xff] %vm1023_vm1, %v825_v57  ;;  %v6081_v11 = vpop.f32.mrb[26].mxu0 }
 0x287   : > { %v840_v15 = vadd.f32 %v6081_v11, %v7221_v28  ;;  %v834_v21 = vpop.f32.mrb[27].mxu0 }
 0x288   : > { %v835_v23 = vadd.f32 %v7221_v28, %v834_v21 }
 0x289   : > { %v1531_v56 = vpop.permute.xlu0 %1530  ;;  %1051 = vst.msk [vmem:[#allocation2 + $0xd8] sm:$0xff] %vm1023_vm1, %v840_v15 }
 0x28a   : > { %6140 = vmatprep.mubr.msk.bf16.mxu0 %vm1480_vm2, %v1531_v56  ;;  %1050 = vst.msk [vmem:[#allocation2 + $0xd0] sm:$0xff] %vm1023_vm1, %v835_v23  ;;  %v6084_v26 = vpop.f32.mrb[28].mxu0 }
 0x28b   : > { %v850_v59 = vadd.f32 %v6084_v26, %v7221_v28  ;;  %v844_v31 = vpop.f32.mrb[29].mxu0 }
 0x28c   : > { %v845_v33 = vadd.f32 %v7221_v28, %v844_v31 }
 0x28d   : > { %v1533_v49 = vpop.permute.xlu1 %1532  ;;  %v1373_v38 = vpop.permute.xlu0 %1372  ;;  %1053 = vst.msk [vmem:[#allocation2 + $0xe8] sm:$0xff] %vm1023_vm1, %v850_v59 }
 0x28e   : > { %6141 = vmatmul.mubr.msk.bf16.vlgmr.msra.gmra.mrb[64].mxu0 %vm1480_vm2, %v1533_v49  ;;  %v7595_v16 = vmul.f32 %v1373_v38, %v1330_v47  ;;  %1052 = vst.msk [vmem:[#allocation2 + $0xe0] sm:$0xff] %vm1023_vm1, %v845_v33  ;;  %v6087_v41 = vpop.f32.mrb[30].mxu0 }
 0x28f   : > { %v860_v37 = vadd.f32 %v6087_v41, %v7221_v28  ;;  %v854_v43 = vpop.f32.mrb[31].mxu0 }
 0x290   : > { %9165 = vst [vmem:[#allocation10_spill] sm:$0xff] %v7595_v16  ;;  %v855_v7 = vadd.f32 %v7221_v28, %v854_v43 }
 0x291   : > { %v1375_v10 = vpop.permute.xlu1 %1374  ;;  %1055 = vst.msk [vmem:[#allocation2 + $0xf8] sm:$0xff] %vm1023_vm1, %v860_v37 }
 0x292   : > { %v7597_v3 = vmul.f32 %v1375_v10, %v1331_v58  ;;  %1054 = vst.msk [vmem:[#allocation2 + $0xf0] sm:$0xff] %vm1023_vm1, %v855_v7  ;;  %v6090_v8 = vpop.f32.mrb[32].mxu0 }
 0x293   : > { %v870_v52 = vadd.f32 %v6090_v8, %v7221_v28  ;;  %v864_v42 = vpop.f32.mrb[33].mxu0 }
 0x294   : > { %9166 = vst [vmem:[#allocation11_spill] sm:$0xff] %v7597_v3  ;;  %v1519_v13 = vpack.c.bf16 %v7597_v3, %v7595_v16  ;;  %v865_v54 = vadd.f32 %v7221_v28, %v864_v42 }
 0x295   : > { %v1377_v22 = vpop.permute.xlu0 %1376  ;;  %1057 = vst.msk [vmem:[#allocation2 + $0x108] sm:$0xff] %vm1023_vm1, %v870_v52 }
 0x296   : > { %1540 = vrot.lane.b32.xlu1 %v1519_v13, %s7095_s20  ;;  %v7614_v4 = vmul.f32 %v1377_v22, %v1332_v20  ;;  %1056 = vst.msk [vmem:[#allocation2 + $0x100] sm:$0xff] %vm1023_vm1, %v865_v54  ;;  %v6093_v63 = vpop.f32.mrb[34].mxu0 }
 0x297   : > { %v880_v28 = vadd.f32 %v7646_v60, %v6093_v63  ;;  %v874_v62 = vpop.f32.mrb[35].mxu0 }
 0x298   : > { %9167 = vst [vmem:[#allocation12_spill] sm:$0xff] %v7614_v4  ;;  %v875_v27 = vadd.f32 %v7646_v60, %v874_v62 }
 0x299   : > { %v1535_v25 = vpop.permute.xlu0 %1534  ;;  %1059 = vst.msk [vmem:[#allocation2 + $0x118] sm:$0xff] %vm1023_vm1, %v880_v28 }
 0x29a   : > { %v1379_v32 = vpop.permute.xlu1 %1378  ;;  %6144 = vmatprep.mubr.msk.bf16.mxu0 %vm1480_vm2, %v1535_v25  ;;  %1058 = vst.msk [vmem:[#allocation2 + $0x110] sm:$0xff] %vm1023_vm1, %v875_v27 }
 0x29b   : > { %v7616_v2 = vmul.f32 %v1379_v32, %v1333_v30 }
 0x29d   : > { %9168 = vst [vmem:[#allocation13_spill] sm:$0xff] %v7616_v2  ;;  %v1381_v34 = vpop.permute.xlu0 %1380  ;;  %v1520_v6 = vpack.c.bf16 %v7616_v2, %v7614_v4 }
 0x29e   : > { %v1537_v44 = vpop.permute.xlu1 %1536  ;;  %v7633_v56 = vmul.f32 %v1381_v34, %v1334_v46 }
 0x29f   : > { %1542 = vrot.lane.b32.xlu0 %v1520_v6, %s7095_s20  ;;  %6145 = vmatmul.mubr.msk.bf16.gmra.mrb[68].mxu0 %vm1480_vm2, %v1537_v44 }
 0x2a0   : > { %9169 = vst [vmem:[#allocation14_spill] sm:$0xff] %v7633_v56 }
 0x2a1   : > { %v1539_v51 = vpop.permute.xlu0 %1538 }
 0x2a2   : > { %v1383_v53 = vpop.permute.xlu1 %1382  ;;  %6148 = vmatprep.mubr.msk.bf16.mxu0 %vm1480_vm2, %v1539_v51 }
 0x2a3   : > { %v7635_v17 = vmul.f32 %v1383_v53, %v1335_v48  ;;  %1792 = vrot.lane.b32.xlu0 %v7294_v35, %s7094_s17  ;;  %v6096_v35 = vpop.f32.mrb[36].mxu0 }
 0x2a4   : > { %v890_v49 = vadd.f32 %v7646_v60, %v6096_v35  ;;  %v884_v0 = vpop.f32.mrb[37].mxu0 }
 0x2a5   : > { %9170 = vst [vmem:[#allocation15_spill] sm:$0xff] %v7635_v17  ;;  %v1521_v19 = vpack.c.bf16 %v7635_v17, %v7633_v56  ;;  %v885_v24 = vadd.f32 %v7646_v60, %v884_v0  ;;  %v6099_v38 = vpop.f32.mrb[38].mxu0 }
 0x2a6   : > { %1061 = vst.msk [vmem:[#allocation2 + $0x128] sm:$0xff] %vm1023_vm1, %v890_v49  ;;  %v900_v9 = vadd.f32 %v7646_v60, %v6099_v38  ;;  %v894_v47 = vpop.f32.mrb[39].mxu0 }
 0x2a7   : > { %1544 = vrot.lane.b32.xlu1 %v1521_v19, %s7095_s20  ;;  %1060 = vst.msk [vmem:[#allocation2 + $0x120] sm:$0xff] %vm1023_vm1, %v885_v24  ;;  %v895_v58 = vadd.f32 %v7646_v60, %v894_v47  ;;  %v6102_v45 = vpop.f32.mrb[40].mxu0 }
 0x2a8   : > { %1063 = vst.msk [vmem:[#allocation2 + $0x138] sm:$0xff] %vm1023_vm1, %v900_v9  ;;  %v910_v10 = vadd.f32 %v7646_v60, %v6102_v45  ;;  %v904_v18 = vpop.f32.mrb[41].mxu0 }
 0x2a9   : > { %1062 = vst.msk [vmem:[#allocation2 + $0x130] sm:$0xff] %vm1023_vm1, %v895_v58  ;;  %v905_v14 = vadd.f32 %v7646_v60, %v904_v18  ;;  %v6105_v57 = vpop.f32.mrb[42].mxu0 }
 0x2aa   : > { %1065 = vst.msk [vmem:[#allocation2 + $0x148] sm:$0xff] %vm1023_vm1, %v910_v10  ;;  %v920_v13 = vadd.f32 %v7646_v60, %v6105_v57  ;;  %v914_v11 = vpop.f32.mrb[43].mxu0 }
 0x2ab   : > { %1064 = vst.msk [vmem:[#allocation2 + $0x140] sm:$0xff] %vm1023_vm1, %v905_v14  ;;  %v915_v22 = vadd.f32 %v7646_v60, %v914_v11  ;;  %v6108_v15 = vpop.f32.mrb[44].mxu0 }
 0x2ac   : > { %1067 = vst.msk [vmem:[#allocation2 + $0x158] sm:$0xff] %vm1023_vm1, %v920_v13  ;;  %v930_v21 = vadd.f32 %v7646_v60, %v6108_v15  ;;  %v924_v23 = vpop.f32.mrb[45].mxu0 }
 0x2ad   : > { %1066 = vst.msk [vmem:[#allocation2 + $0x150] sm:$0xff] %vm1023_vm1, %v915_v22  ;;  %v925_v26 = vadd.f32 %v7646_v60, %v924_v23 }
 0x2ae   : > { %1069 = vst.msk [vmem:[#allocation2 + $0x168] sm:$0xff] %vm1023_vm1, %v930_v21  ;;  %v6111_v20 = vpop.f32.mrb[46].mxu0 }
 0x2af   : > { %1068 = vst.msk [vmem:[#allocation2 + $0x160] sm:$0xff] %vm1023_vm1, %v925_v26  ;;  %v940_v30 = vadd.f32 %v7646_v60, %v6111_v20  ;;  %v934_v25 = vpop.f32.mrb[47].mxu0 }
 0x2b0   : > { %v935_v59 = vadd.f32 %v7646_v60, %v934_v25 }
 0x2b1   : > { %1071 = vst.msk [vmem:[#allocation2 + $0x178] sm:$0xff] %vm1023_vm1, %v940_v30 }
 0x2b2   : > { %1070 = vst.msk [vmem:[#allocation2 + $0x170] sm:$0xff] %vm1023_vm1, %v935_v59  ;;  %v6114_v31 = vpop.f32.mrb[48].mxu0 }
 0x2b3   : > { %v950_v32 = vadd.f32 %v7646_v60, %v6114_v31  ;;  %v944_v33 = vpop.f32.mrb[49].mxu0 }
 0x2b4   : > { %v945_v41 = vadd.f32 %v7646_v60, %v944_v33 }
 0x2b5   : > { %1073 = vst.msk [vmem:[#allocation2 + $0x188] sm:$0xff] %vm1023_vm1, %v950_v32 }
 0x2b6   : > { %1072 = vst.msk [vmem:[#allocation2 + $0x180] sm:$0xff] %vm1023_vm1, %v945_v41  ;;  %v6117_v34 = vpop.f32.mrb[50].mxu0 }
 0x2b7   : > { %v960_v6 = vadd.f32 %v7646_v60, %v6117_v34  ;;  %v954_v37 = vpop.f32.mrb[51].mxu0  ;;  %v7730_v34 = vld [vmem:[#allocation2 + $0x90] sm:$0xff] }
 0x2b8   : > { %v955_v43 = vadd.f32 %v7646_v60, %v954_v37  ;;  %v7733_v37 = vld [vmem:[#allocation2 + $0x80] sm:$0xff] }
 0x2b9   : > { %1075 = vst.msk [vmem:[#allocation2 + $0x198] sm:$0xff] %vm1023_vm1, %v960_v6 }
 0x2ba   : > { %1074 = vst.msk [vmem:[#allocation2 + $0x190] sm:$0xff] %vm1023_vm1, %v955_v43  ;;  %v6120_v44 = vpop.f32.mrb[52].mxu0 }
 0x2bb   : > { %v970_v7 = vadd.f32 %v7646_v60, %v6120_v44  ;;  %v964_v8 = vpop.f32.mrb[53].mxu0  ;;  %v7736_v44 = vld [vmem:[#allocation2 + $0x98] sm:$0xff] }
 0x2bc   : > { %v965_v46 = vadd.f32 %v7646_v60, %v964_v8 }
 0x2bd   : > { %1077 = vst.msk [vmem:[#allocation2 + $0x1a8] sm:$0xff] %vm1023_vm1, %v970_v7 }
 0x2be   : > { %1076 = vst.msk [vmem:[#allocation2 + $0x1a0] sm:$0xff] %vm1023_vm1, %v965_v46  ;;  %v6123_v48 = vpop.f32.mrb[54].mxu0 }
 0x2bf   : > { %v980_v51 = vadd.f32 %v7646_v60, %v6123_v48  ;;  %v974_v52 = vpop.f32.mrb[55].mxu0  ;;  %v7739_v48 = vld [vmem:[#allocation2 + $0x88] sm:$0xff] }
 0x2c0   : > { %v975_v42 = vadd.f32 %v7646_v60, %v974_v52 }
 0x2c1   : > { %1079 = vst.msk [vmem:[#allocation2 + $0x1b8] sm:$0xff] %vm1023_vm1, %v980_v51 }
 0x2c2   : > { %1078 = vst.msk [vmem:[#allocation2 + $0x1b0] sm:$0xff] %vm1023_vm1, %v975_v42  ;;  %v6126_v53 = vpop.f32.mrb[56].mxu0 }
 0x2c3   : > { %v990_v54 = vadd.f32 %v7646_v60, %v6126_v53  ;;  %v984_v63 = vpop.f32.mrb[57].mxu0  ;;  %v7742_v53 = vld [vmem:[#allocation2 + $0xb0] sm:$0xff] }
 0x2c4   : > { %v985_v19 = vadd.f32 %v7646_v60, %v984_v63 }
 0x2c5   : > { %1081 = vst.msk [vmem:[#allocation2 + $0x1c8] sm:$0xff] %vm1023_vm1, %v990_v54 }
 0x2c6   : > { %1080 = vst.msk [vmem:[#allocation2 + $0x1c0] sm:$0xff] %vm1023_vm1, %v985_v19  ;;  %v6129_v28 = vpop.f32.mrb[58].mxu0 }
 0x2c7   : > { %v1000_v62 = vadd.f32 %v7646_v60, %v6129_v28  ;;  %v994_v27 = vpop.f32.mrb[59].mxu0  ;;  %v7745_v28 = vld [vmem:[#allocation2 + $0xb8] sm:$0xff] }
 0x2c8   : > { %v995_v35 = vadd.f32 %v7646_v60, %v994_v27 }
 0x2c9   : > { %1083 = vst.msk [vmem:[#allocation2 + $0x1d8] sm:$0xff] %vm1023_vm1, %v1000_v62 }
 0x2ca   : > { %1082 = vst.msk [vmem:[#allocation2 + $0x1d0] sm:$0xff] %vm1023_vm1, %v995_v35  ;;  %v6132_v49 = vpop.f32.mrb[60].mxu0  ;;  %v7747_v35 = vld [vmem:[#allocation2 + $0xa0] sm:$0xff] }
 0x2cb   : > { %v1010_v0 = vadd.f32 %v7646_v60, %v6132_v49  ;;  %v1004_v24 = vpop.f32.mrb[61].mxu0 }
 0x2cc   : > { %v1005_v38 = vadd.f32 %v7646_v60, %v1004_v24 }
 0x2cd   : > { %1085 = vst.msk [vmem:[#allocation2 + $0x1e8] sm:$0xff] %vm1023_vm1, %v1010_v0 }
 0x2ce   : > { %1084 = vst.msk [vmem:[#allocation2 + $0x1e0] sm:$0xff] %vm1023_vm1, %v1005_v38  ;;  %v6135_v9 = vpop.f32.mrb[62].mxu0 }
 0x2cf   : > { %v1020_v47 = vadd.f32 %v7646_v60, %v6135_v9  ;;  %v1014_v58 = vpop.f32.mrb[63].mxu0 }
 0x2d0   : > { %v1015_v45 = vadd.f32 %v7646_v60, %v1014_v58 }
 0x2d1   : > { %1087 = vst.msk [vmem:[#allocation2 + $0x1f8] sm:$0xff] %vm1023_vm1, %v1020_v47  ;;  %v7751_v47 = vld [vmem:[#allocation2 + $0xa8] sm:$0xff] }
 0x2d2   : > { %1086 = vst.msk [vmem:[#allocation2 + $0x1f0] sm:$0xff] %vm1023_vm1, %v1015_v45 }
 0x308   : > { %v1541_v10 = vpop.permute.xlu1 %1540 }
 0x309   : > { %6149 = vmatmul.mubr.msk.bf16.gmra.mrb[72].mxu0 %vm1480_vm2, %v1541_v10 }
 0x311   : > { %v1543_v18 = vpop.permute.xlu0 %1542 }
 0x312   : > { %6152 = vmatprep.mubr.msk.bf16.mxu0 %vm1480_vm2, %v1543_v18 }
 0x315   : > { %v7712_v57 = vpop.permute.xlu0 %1792 }
 0x319   : > { %v1545_v14 = vpop.permute.xlu1 %1544 }
 0x31a   : > { %6153 = vmatmul.mubr.msk.bf16.gmra.mrb[76].mxu0 %vm1480_vm2, %v1545_v14 }
 0x361   : > { %v6142_v13 = vpop.f32.mrb[64].mxu0 }
 0x362   : > { %v1616_v11 = vpop.f32.mrb[65].mxu0  ;;  %v1797_v23 = vadd.f32 %v6142_v13, %v7712_v57  ;;  %v1681_v6 = vadd.f32 %v6142_v13, %v7730_v34 }
 0x363   : > { %v1795_v22 = vadd.f32 %v7712_v57, %v1616_v11  ;;  %v6143_v60 = vpop.f32.mrb[66].mxu0  ;;  %v1679_v43 = vadd.f32 %v1616_v11, %v7733_v37 }
 0x364   : > { %v1619_v15 = vpop.f32.mrb[67].mxu0  ;;  %v1798_v26 = vadd.f32 %v6143_v60, %v7712_v57  ;;  %v1682_v7 = vadd.f32 %v6143_v60, %v7736_v44  ;;  %v5591_v8 = vmul.f32 -1.442695, %v1681_v6 }
 0x365   : > { %v1796_v21 = vadd.f32 %v7712_v57, %v1619_v15  ;;  %1827 = vrot.lane.b32.xlu1 %v1795_v22, %s7094_s17  ;;  %v5589_v46 = vmul.f32 -1.442695, %v1679_v43  ;;  %v1680_v52 = vadd.f32 %v1619_v15, %v7739_v48 }
 0x366   : > { %v5592_v51 = vmul.f32 -1.442695, %v1682_v7  ;;  %6763 = vpow2.f32 %v5591_v8 }
 0x367   : > { %1829 = vrot.lane.b32.xlu0 %v1796_v21, %s7094_s17  ;;  %6765 = vpow2.f32 %v5589_v46  ;;  %v5590_v42 = vmul.f32 -1.442695, %v1680_v52 }
 0x368   : > { %6767 = vpow2.f32 %v5592_v51 }
 0x369   : > { %1831 = vrot.lane.b32.xlu1 %v1797_v23, %s7094_s17  ;;  %6769 = vpow2.f32 %v5590_v42 }
 0x36b   : > { %1833 = vrot.lane.b32.xlu0 %v1798_v26, %s7094_s17 }
 0x370   : > { %v6764_v54 = vpop.eup %6763 }
 0x371   : > { %v6766_v19 = vpop.eup %6765  ;;  %v1745_v27 = vadd.f32 1.0, %v6764_v54 }
 0x372   : > { %v6146_v20 = vpop.f32.mrb[68].mxu0  ;;  %v6768_v62 = vpop.eup %6767  ;;  %v1743_v38 = vadd.f32 1.0, %v6766_v19 }
 0x373   : > { %v1632_v30 = vpop.f32.mrb[69].mxu0  ;;  %v1801_v33 = vadd.f32 %v6146_v20, %v7712_v57  ;;  %v1685_v63 = vadd.f32 %v6146_v20, %v7742_v53  ;;  %v1746_v9 = vadd.f32 1.0, %v6768_v62  ;;  %v6770_v58 = vpop.eup %6769  ;;  %6771 = vrcp.f32 %v1745_v27 }
 0x374   : > { %v1799_v25 = vadd.f32 %v7712_v57, %v1632_v30  ;;  %v6147_v59 = vpop.f32.mrb[70].mxu0  ;;  %v1683_v24 = vadd.f32 %v1632_v30, %v7747_v35  ;;  %v1744_v14 = vadd.f32 1.0, %v6770_v58 }
 0x375   : > { %v1635_v31 = vpop.f32.mrb[71].mxu0  ;;  %v1802_v41 = vadd.f32 %v6147_v59, %v7712_v57  ;;  %v1686_v49 = vadd.f32 %v6147_v59, %v7745_v28  ;;  %v5595_v0 = vmul.f32 -1.442695, %v1685_v63 }
 0x376   : > { %v1800_v32 = vadd.f32 %v7712_v57, %v1635_v31  ;;  %1835 = vrot.lane.b32.xlu1 %v1799_v25, %s7094_s17  ;;  %v1684_v10 = vadd.f32 %v1635_v31, %v7751_v47  ;;  %v5593_v18 = vmul.f32 -1.442695, %v1683_v24 }
 0x377   : > { %v5596_v45 = vmul.f32 -1.442695, %v1686_v49  ;;  %6773 = vpow2.f32 %v5595_v0 }
 0x378   : > { %1837 = vrot.lane.b32.xlu0 %v1800_v32, %s7094_s17  ;;  %6775 = vrcp.f32 %v1743_v38  ;;  %v5594_v13 = vmul.f32 -1.442695, %v1684_v10 }
 0x379   : > { %6777 = vrcp.f32 %v1746_v9 }
 0x37a   : > { %1839 = vrot.lane.b32.xlu1 %v1801_v33, %s7094_s17  ;;  %6779 = vpow2.f32 %v5596_v45 }
 0x37b   : > { %6781 = vpow2.f32 %v5593_v18 }
 0x37c   : > { %1841 = vrot.lane.b32.xlu0 %v1802_v41, %s7094_s17  ;;  %6783 = vrcp.f32 %v1744_v14 }
 0x37d   : > { %6785 = vpow2.f32 %v5594_v13  ;;  %v7754_v60 = vpop.eup %6771 }
 0x381   : > { %v6774_v15 = vpop.eup %6773 }
 0x382   : > { %v7756_v23 = vpop.eup %6775  ;;  %v1749_v32 = vadd.f32 1.0, %v6774_v15 }
 0x383   : > { %v7759_v30 = vpop.eup %6777 }
 0x384   : > { %v6780_v31 = vpop.eup %6779  ;;  %6787 = vrcp.f32 %v1749_v32 }
 0x385   : > { %v6782_v6 = vpop.eup %6781  ;;  %v1750_v46 = vadd.f32 1.0, %v6780_v31 }
 0x386   : > { %v7767_v8 = vpop.eup %6783  ;;  %v1747_v52 = vadd.f32 1.0, %v6782_v6  ;;  %v7805_v6 = vld [vmem:[#allocation2 + $0xd0] sm:$0xff] }
 0x387   : > { %v6786_v51 = vpop.eup %6785  ;;  %6789 = vrcp.f32 %v1750_v46  ;;  %v7808_v46 = vld [vmem:[#allocation2 + $0xd8] sm:$0xff] }
 0x388   : > { %v1748_v63 = vadd.f32 1.0, %v6786_v51  ;;  %6791 = vrcp.f32 %v1747_v52  ;;  %v7811_v52 = vld [vmem:[#allocation2 + $0xc0] sm:$0xff] }
 0x38a   : > { %6793 = vrcp.f32 %v1748_v63  ;;  %v7815_v63 = vld [vmem:[#allocation2 + $0xc8] sm:$0xff] }
 0x38e   : > { %v7780_v24 = vpop.eup %6787 }
 0x391   : > { %v7784_v18 = vpop.eup %6789 }
 0x392   : > { %v7787_v13 = vpop.eup %6791 }
 0x3d7   : > { %v1828_v11 = vpop.permute.xlu1 %1827 }
 0x3d8   : > { %v1875_v7 = vmul.f32 %v7756_v23, %v1828_v11 }
 0x3d9   : > { %v1830_v22 = vpop.permute.xlu0 %1829 }
 0x3da   : > { %v1876_v42 = vmul.f32 %v7767_v8, %v1830_v22 }
 0x3db   : > { %v1832_v21 = vpop.permute.xlu1 %1831 }
 0x3dc   : > { %v1877_v26 = vmul.f32 %v7754_v60, %v1832_v21  ;;  %v6150_v20 = vpop.f32.mrb[72].mxu0  ;;  %v7792_v21 = vpop.eup %6793 }
 0x3dd   : > { %v7761_v25 = vpop.f32.mrb[73].mxu0  ;;  %v1834_v59 = vpop.permute.xlu0 %1833  ;;  %v1805_v62 = vadd.f32 %v6150_v20, %v7712_v57 }
 0x3de   : > { %v1878_v33 = vmul.f32 %v7759_v30, %v1834_v59  ;;  %v6151_v41 = vpop.f32.mrb[74].mxu0  ;;  %1911 = vrot.lane.b32.xlu1 %v1877_v26, %s7094_s17  ;;  %v1803_v54 = vadd.f32 %v7712_v57, %v7761_v25 }
 0x3df   : > { %v1651_v43 = vpop.f32.mrb[75].mxu0  ;;  %v1806_v49 = vadd.f32 %v6151_v41, %v7712_v57  ;;  %v1690_v51 = vadd.f32 %v6151_v41, %v7808_v46 }
 0x3e0   : > { %1913 = vrot.lane.b32.xlu0 %v1878_v33, %s7094_s17  ;;  %v1804_v19 = vadd.f32 %v7712_v57, %v1651_v43 }
 0x3e2   : > { %1907 = vrot.lane.b32.xlu1 %v1875_v7, %s7094_s17  ;;  %v1689_v7 = vadd.f32 %v6150_v20, %v7805_v6  ;;  %v7818_v20 = vld [vmem:[#allocation2 + $0xe0] sm:$0xff] }
 0x3e4   : > { %1909 = vrot.lane.b32.xlu0 %v1876_v42, %s7094_s17  ;;  %v5599_v42 = vmul.f32 -1.442695, %v1689_v7 }
 0x3e6   : > { %1843 = vrot.lane.b32.xlu1 %v1803_v54, %s7094_s17  ;;  %v1687_v54 = vadd.f32 %v7761_v25, %v7811_v52  ;;  %6795 = vpow2.f32 %v5599_v42 }
 0x3e8   : > { %1845 = vrot.lane.b32.xlu0 %v1804_v19, %s7094_s17  ;;  %v1836_v27 = vpop.permute.xlu1 %1835  ;;  %v5600_v19 = vmul.f32 -1.442695, %v1690_v51 }
 0x3e9   : > { %v1879_v15 = vmul.f32 %v7787_v13, %v1836_v27  ;;  %v5597_v27 = vmul.f32 -1.442695, %v1687_v54 }
 0x3ea   : > { %v1838_v0 = vpop.permute.xlu0 %1837  ;;  %1847 = vrot.lane.b32.xlu1 %v1805_v62, %s7094_s17  ;;  %v1688_v62 = vadd.f32 %v1651_v43, %v7815_v63  ;;  %6797 = vpow2.f32 %v5600_v19 }
 0x3eb   : > { %v1880_v26 = vmul.f32 %v7792_v21, %v1838_v0  ;;  %6799 = vpow2.f32 %v5597_v27  ;;  %v7821_v0 = vld [vmem:[#allocation2 + $0xe8] sm:$0xff] }
 0x3ec   : > { %1849 = vrot.lane.b32.xlu0 %v1806_v49, %s7094_s17  ;;  %v1840_v38 = vpop.permute.xlu1 %1839  ;;  %v5598_v49 = vmul.f32 -1.442695, %v1688_v62 }
 0x3ed   : > { %v1881_v9 = vmul.f32 %v7780_v24, %v1840_v38  ;;  %v6154_v58 = vpop.f32.mrb[76].mxu0 }
 0x3ee   : > { %v1664_v45 = vpop.f32.mrb[77].mxu0  ;;  %v1842_v10 = vpop.permute.xlu0 %1841  ;;  %v1809_v32 = vadd.f32 %v6154_v58, %v7712_v57  ;;  %6801 = vpow2.f32 %v5598_v49 }
 0x3ef   : > { %v6155_v14 = vpop.f32.mrb[78].mxu0  ;;  %1919 = vrot.lane.b32.xlu1 %v1881_v9, %s7094_s17  ;;  %v1882_v11 = vmul.f32 %v7784_v18, %v1842_v10  ;;  %v1807_v59 = vadd.f32 %v7712_v57, %v1664_v45  ;;  %v1691_v41 = vadd.f32 %v1664_v45, %v7818_v20  ;;  %v7824_v9 = vld [vmem:[#allocation2 + $0xf0] sm:$0xff] }
 0x3f0   : > { %v1667_v22 = vpop.f32.mrb[79].mxu0  ;;  %v1810_v33 = vadd.f32 %v6155_v14, %v7712_v57  ;;  %v6796_v38 = vpop.eup %6795  ;;  %v1693_v43 = vadd.f32 %v6154_v58, %v7824_v9 }
 0x3f1   : > { %1921 = vrot.lane.b32.xlu0 %v1882_v11, %s7094_s17  ;;  %v1808_v31 = vadd.f32 %v7712_v57, %v1667_v22  ;;  %v1692_v25 = vadd.f32 %v1667_v22, %v7821_v0  ;;  %v5601_v10 = vmul.f32 -1.442695, %v1691_v41 }
 0x3f2   : > { %v5603_v51 = vmul.f32 -1.442695, %v1693_v43 }
 0x3f3   : > { %1915 = vrot.lane.b32.xlu1 %v1879_v15, %s7094_s17  ;;  %v1753_v15 = vadd.f32 1.0, %v6796_v38  ;;  %6803 = vpow2.f32 %v5601_v10 }
 0x3f4   : > { %v6798_v11 = vpop.eup %6797 }
 0x3f5   : > { %1917 = vrot.lane.b32.xlu0 %v1880_v26, %s7094_s17  ;;  %v7827_v26 = vld [vmem:[#allocation2 + $0xf8] sm:$0xff]  ;;  %6805 = vrcp.f32 %v1753_v15 }
 0x3f7   : > { %1851 = vrot.lane.b32.xlu1 %v1807_v59, %s7094_s17  ;;  %v6800_v59 = vpop.eup %6799 }
 0x3f8   : > { %v6802_v7 = vpop.eup %6801  ;;  %v1751_v22 = vadd.f32 1.0, %v6800_v59 }
 0x3f9   : > { %1853 = vrot.lane.b32.xlu0 %v1808_v31, %s7094_s17  ;;  %v1694_v31 = vadd.f32 %v6155_v14, %v7827_v26  ;;  %v1752_v19 = vadd.f32 1.0, %v6802_v7 }
 0x3fb   : > { %1855 = vrot.lane.b32.xlu1 %v1809_v32, %s7094_s17  ;;  %v5602_v32 = vmul.f32 -1.442695, %v1692_v25  ;;  %v5604_v54 = vmul.f32 -1.442695, %v1694_v31 }
 0x3fd   : > { %1857 = vrot.lane.b32.xlu0 %v1810_v33, %s7094_s17  ;;  %v1754_v33 = vadd.f32 1.0, %v6798_v11  ;;  %6807 = vpow2.f32 %v5602_v32  ;;  %v6804_v49 = vpop.eup %6803 }
 0x3fe   : > { %v1755_v15 = vadd.f32 1.0, %v6804_v49 }
 0x3ff   : > { %6809 = vrcp.f32 %v1754_v33  ;;  %v7832_v25 = vpop.eup %6805 }
 0x400   : > { %6811 = vpow2.f32 %v5603_v51 }
 0x401   : > { %6813 = vrcp.f32 %v1751_v22 }
 0x402   : > { %6815 = vpow2.f32 %v5604_v54 }
 0x403   : > { %6817 = vrcp.f32 %v1752_v19 }
 0x407   : > { %v6808_v43 = vpop.eup %6807 }
 0x409   : > { %v7836_v31 = vpop.eup %6809 }
 0x40a   : > { %v6812_v33 = vpop.eup %6811 }
 0x40b   : > { %v7841_v7 = vpop.eup %6813 }
 0x450   : > { %v1912_v45 = vpop.permute.xlu1 %1911 }
 0x451   : > { %v1957_v10 = vadd.f32 %v1912_v45, %v7730_v34  ;;  %v1756_v34 = vadd.f32 1.0, %v6808_v43  ;;  %v6816_v45 = vpop.eup %6815 }
 0x452   : > { %v1914_v42 = vpop.permute.xlu0 %1913  ;;  %v7845_v54 = vpop.eup %6817  ;;  %v1758_v19 = vadd.f32 1.0, %v6816_v45 }
 0x453   : > { %v1958_v32 = vadd.f32 %v1914_v42, %v7736_v44  ;;  %v1757_v44 = vadd.f32 1.0, %v6812_v33 }
 0x454   : > { %v1908_v58 = vpop.permute.xlu1 %1907 }
 0x455   : > { %v1955_v14 = vadd.f32 %v1908_v58, %v7733_v37 }
 0x456   : > { %v1910_v62 = vpop.permute.xlu0 %1909 }
 0x457   : > { %v1956_v41 = vadd.f32 %v1910_v62, %v7739_v48  ;;  %6819 = vtanh.f32 %v1955_v14 }
 0x458   : > { %v1844_v27 = vpop.permute.xlu1 %1843 }
 0x459   : > { %6821 = vtanh.f32 %v1956_v41  ;;  %v1883_v51 = vmul.f32 %v7841_v7, %v1844_v27 }
 0x45a   : > { %v1846_v38 = vpop.permute.xlu0 %1845  ;;  %6823 = vtanh.f32 %v1957_v10 }
 0x45b   : > { %6825 = vrcp.f32 %v1755_v15  ;;  %v1884_v42 = vmul.f32 %v7845_v54, %v1846_v38 }
 0x45c   : > { %v1848_v11 = vpop.permute.xlu1 %1847  ;;  %6827 = vtanh.f32 %v1958_v32 }
 0x45d   : > { %v1885_v59 = vmul.f32 %v7832_v25, %v1848_v11  ;;  %6829 = vrcp.f32 %v1756_v34 }
 0x45e   : > { %v1850_v37 = vpop.permute.xlu0 %1849  ;;  %6831 = vrcp.f32 %v1757_v44 }
 0x45f   : > { %v1886_v48 = vmul.f32 %v7836_v31, %v1850_v37  ;;  %1927 = vrot.lane.b32.xlu1 %v1885_v59, %s7094_s17  ;;  %6833 = vrcp.f32 %v1758_v19 }
 0x461   : > { %1929 = vrot.lane.b32.xlu0 %v1886_v48, %s7094_s17  ;;  %v1920_v22 = vpop.permute.xlu1 %1919  ;;  %v6820_v14 = vpop.eup %6819 }
 0x462   : > { %v1961_v59 = vadd.f32 %v1920_v22, %v7742_v53 }
 0x463   : > { %1923 = vrot.lane.b32.xlu1 %v1883_v51, %s7094_s17  ;;  %v1922_v58 = vpop.permute.xlu0 %1921  ;;  %v6822_v27 = vpop.eup %6821 }
 0x464   : > { %v6824_v10 = vpop.eup %6823  ;;  %v1962_v33 = vadd.f32 %v1922_v58, %v7745_v28 }
 0x465   : > { %1925 = vrot.lane.b32.xlu0 %v1884_v42, %s7094_s17  ;;  %v1916_v62 = vpop.permute.xlu1 %1915  ;;  %v7854_v43 = vpop.eup %6825 }
 0x466   : > { %v1959_v49 = vadd.f32 %v1916_v62, %v7747_v35  ;;  %v6828_v15 = vpop.eup %6827 }
 0x467   : > { %2019 = vrot.lane.b32.xlu1 %v6820_v14, %s7095_s20  ;;  %v1918_v41 = vpop.permute.xlu0 %1917  ;;  %v7860_v35 = vpop.eup %6829 }
 0x468   : > { %v1960_v11 = vadd.f32 %v1918_v41, %v7751_v47  ;;  %6835 = vtanh.f32 %v1959_v49  ;;  %v7865_v34 = vpop.eup %6831 }
 0x469   : > { %2021 = vrot.lane.b32.xlu0 %v6822_v27, %s7095_s20  ;;  %v1852_v38 = vpop.permute.xlu1 %1851  ;;  %v7869_v51 = vpop.eup %6833 }
 0x46a   : > { %v1887_v37 = vmul.f32 %v7854_v43, %v1852_v38  ;;  %6837 = vtanh.f32 %v1960_v11  ;;  %v1988_v11 = vsub.f32 1.0, %v7767_v8 }
 0x46b   : > { %2023 = vrot.lane.b32.xlu1 %v6824_v10, %s7095_s20  ;;  %v1854_v32 = vpop.permute.xlu0 %1853  ;;  %6839 = vtanh.f32 %v1961_v59 }
 0x46c   : > { %v1888_v47 = vmul.f32 %v7860_v35, %v1854_v32  ;;  %6841 = vtanh.f32 %v1962_v33  ;;  %v1987_v32 = vsub.f32 1.0, %v7756_v23 }
 0x46d   : > { %2025 = vrot.lane.b32.xlu0 %v6828_v15, %s7095_s20  ;;  %v1856_v48 = vpop.permute.xlu1 %1855 }
 0x46e   : > { %v1889_v45 = vmul.f32 %v7865_v34, %v1856_v48  ;;  %v1990_v48 = vsub.f32 1.0, %v7759_v30 }
 0x46f   : > { %1931 = vrot.lane.b32.xlu1 %v1887_v37, %s7094_s17  ;;  %v1858_v53 = vpop.permute.xlu0 %1857 }
 0x470   : > { %v1890_v22 = vmul.f32 %v7869_v51, %v1858_v53 }
 0x471   : > { %1933 = vrot.lane.b32.xlu0 %v1888_v47, %s7094_s17 }
 0x472   : > { %v6836_v28 = vpop.eup %6835 }
 0x473   : > { %1935 = vrot.lane.b32.xlu1 %v1889_v45, %s7094_s17 }
 0x474   : > { %v6838_v44 = vpop.eup %6837 }
 0x475   : > { %1937 = vrot.lane.b32.xlu0 %v1890_v22, %s7094_s17  ;;  %v6840_v42 = vpop.eup %6839 }
 0x476   : > { %v6842_v19 = vpop.eup %6841 }
 0x477   : > { %2027 = vrot.lane.b32.xlu1 %v6836_v28, %s7095_s20 }
 0x479   : > { %2029 = vrot.lane.b32.xlu0 %v6838_v44, %s7095_s20  ;;  %v2086_v44 = vmul.f32 %v7759_v30, %v7532_v36 }
 0x47b   : > { %2031 = vrot.lane.b32.xlu1 %v6840_v42, %s7095_s20 }
 0x47d   : > { %2033 = vrot.lane.b32.xlu0 %v6842_v19, %s7095_s20 }
 0x4d1   : > { %v1928_v58 = vpop.permute.xlu1 %1927 }
 0x4d2   : > { %v1965_v62 = vadd.f32 %v1928_v58, %v7805_v6 }
 0x4d3   : > { %v1930_v14 = vpop.permute.xlu0 %1929 }
 0x4d4   : > { %6843 = vtanh.f32 %v1965_v62  ;;  %v1966_v59 = vadd.f32 %v1930_v14, %v7808_v46  ;;  %v2083_v46 = vmul.f32 %v7756_v23, %v7521_v50  ;;  %v2085_v62 = vmul.f32 %v7754_v60, %v7530_v5 }
 0x4d5   : > { %v1924_v27 = vpop.permute.xlu1 %1923 }
 0x4d6   : > { %v1963_v49 = vadd.f32 %v1924_v27, %v7811_v52  ;;  %v2084_v52 = vmul.f32 %v7767_v8, %v7523_v61 }
 0x4d7   : > { %v1926_v41 = vpop.permute.xlu0 %1925 }
 0x4d8   : > { %6845 = vtanh.f32 %v1963_v49  ;;  %v1964_v38 = vadd.f32 %v1926_v41, %v7815_v63  ;;  %v1989_v63 = vsub.f32 1.0, %v7754_v60 }
 0x4d9   : > { %v2020_v10 = vpop.permute.xlu1 %2019 }
 0x4da   : > { %6847 = vtanh.f32 %v1964_v38  ;;  %v2067_v47 = vmul.f32 %v2020_v10, %v1987_v32 }
 0x4db   : > { %v2022_v15 = vpop.permute.xlu0 %2021  ;;  %6849 = vtanh.f32 %v1966_v59 }
 0x4dc   : > { %v2068_v37 = vmul.f32 %v2022_v15, %v1988_v11  ;;  %v7896_v58 = vadd.f32 %v2083_v46, %v2067_v47 }
 0x4dd   : > { %v2024_v6 = vpop.permute.xlu1 %2023 }
 0x4de   : > { %v6844_v33 = vpop.eup %6843  ;;  %v7891_v22 = vadd.f32 %v2084_v52, %v2068_v37  ;;  %v2069_v28 = vmul.f32 %v2024_v6, %v1989_v63  ;;  %v1992_v37 = vsub.f32 1.0, %v7792_v21 }
 0x4df   : > { %v2026_v53 = vpop.permute.xlu0 %2025  ;;  %2039 = vrot.lane.b32.xlu0 %v6844_v33, %s7095_s20 }
 0x4e0   : > { %v2070_v45 = vmul.f32 %v2026_v53, %v1990_v48  ;;  %v7904_v41 = vadd.f32 %v2085_v62, %v2069_v28  ;;  %v1994_v53 = vsub.f32 1.0, %v7784_v18 }
 0x4e1   : > { %v1932_v42 = vpop.permute.xlu1 %1931 }
 0x4e2   : > { %v6846_v19 = vpop.eup %6845  ;;  %v1967_v8 = vadd.f32 %v1932_v42, %v7818_v20  ;;  %v7900_v14 = vadd.f32 %v2086_v44, %v2070_v45  ;;  %v2213_v20 = vpack.c.bf16 %v7891_v22, %v7896_v58  ;;  %v1993_v45 = vsub.f32 1.0, %v7780_v24 }
 0x4e3   : > { %v1934_v27 = vpop.permute.xlu0 %1933  ;;  %2035 = vrot.lane.b32.xlu1 %v6846_v19, %s7095_s20  ;;  %v2090_v42 = vmul.f32 %v7784_v18, %v7556_v12  ;;  %v2089_v19 = vmul.f32 %v7780_v24, %v7554_v55  ;;  %v1995_v24 = vsub.f32 1.0, %v7841_v7 }
 0x4e4   : > { %v6848_v23 = vpop.eup %6847  ;;  %6851 = vtanh.f32 %v1967_v8  ;;  %v1968_v49 = vadd.f32 %v1934_v27, %v7821_v0  ;;  %v2214_v10 = vpack.c.bf16 %v7900_v14, %v7904_v41  ;;  %v1991_v0 = vsub.f32 1.0, %v7787_v13 }
 0x4e5   : > { %2037 = vrot.lane.b32.xlu0 %v6848_v23, %s7095_s20  ;;  %v1936_v30 = vpop.permute.xlu1 %1935  ;;  %v6850_v59 = vpop.eup %6849 }
 0x4e6   : > { %6853 = vtanh.f32 %v1968_v49  ;;  %v1969_v60 = vadd.f32 %v1936_v30, %v7824_v9  ;;  %v2087_v9 = vmul.f32 %v7787_v13, %v7545_v29 }
 0x4e7   : > { %v1938_v38 = vpop.permute.xlu0 %1937  ;;  %2229 = vrot.lane.b32.xlu1 %v2213_v20, %s7095_s20 }
 0x4e8   : > { %v1970_v11 = vadd.f32 %v1938_v38, %v7827_v26  ;;  %6855 = vtanh.f32 %v1969_v60  ;;  %v2088_v26 = vmul.f32 %v7792_v21, %v7547_v1  ;;  %v1996_v60 = vsub.f32 1.0, %v7845_v54 }
 0x4e9   : > { %2231 = vrot.lane.b32.xlu0 %v2214_v10, %s7095_s20  ;;  %v2028_v15 = vpop.permute.xlu1 %2027  ;;  %v2091_v10 = vmul.f32 %v7841_v7, %v7564_v39 }
 0x4ea   : > { %v2071_v32 = vmul.f32 %v2028_v15, %v1991_v0  ;;  %6857 = vtanh.f32 %v1970_v11  ;;  %v2092_v11 = vmul.f32 %v7845_v54, %v7566_v40  ;;  %v8122_v40 = vld [vmem:[#allocation2 + $0x170] sm:$0xff] }
 0x4eb   : > { %v2030_v6 = vpop.permute.xlu0 %2029  ;;  %2041 = vrot.lane.b32.xlu1 %v6850_v59, %s7095_s20  ;;  %v1997_v59 = vsub.f32 1.0, %v7832_v25 }
 0x4ec   : > { %v2072_v33 = vmul.f32 %v2030_v6, %v1992_v37  ;;  %v7922_v47 = vadd.f32 %v2087_v9, %v2071_v32 }
 0x4ed   : > { %v2032_v63 = vpop.permute.xlu1 %2031 }
 0x4ee   : > { %v6852_v48 = vpop.eup %6851  ;;  %v7924_v52 = vadd.f32 %v2088_v26, %v2072_v33  ;;  %v2073_v21 = vmul.f32 %v2032_v63, %v1993_v45  ;;  %v1998_v26 = vsub.f32 1.0, %v7836_v31  ;;  %v7084_v33 = vld [vmem:[%s9118_s3] sm:$0xff]   ;;  %v2094_v63 = vmul.f32 %v7836_v31, %v7597_v3  ;;  %v7085_v45 = vld [vmem:[%s9118_s3 + $0x8] sm:$0xff]  }
 0x4ef   : > { %v2034_v46 = vpop.permute.xlu0 %2033  ;;  %2043 = vrot.lane.b32.xlu1 %v6852_v48, %s7095_s20  ;;  %v2093_v48 = vmul.f32 %v7832_v25, %v7595_v16  ;;  %v8119_v16 = vld [vmem:[#allocation2 + $0x168] sm:$0xff] }
 0x4f0   : > { %v6854_v28 = vpop.eup %6853  ;;  %v2074_v44 = vmul.f32 %v2034_v46, %v1994_v53  ;;  %v2215_v13 = vpack.c.bf16 %v7924_v52, %v7922_v47  ;;  %v7939_v27 = vadd.f32 %v2089_v19, %v2073_v21  ;;  %v2000_v21 = vsub.f32 1.0, %v7860_v35 }
 0x4f1   : > { %2045 = vrot.lane.b32.xlu0 %v6854_v28, %s7095_s20  ;;  %v2095_v19 = vmul.f32 %v7854_v43, %v7614_v4 }
 0x4f2   : > { %v7936_v8 = vadd.f32 %v2090_v42, %v2074_v44  ;;  %v6856_v62 = vpop.eup %6855  ;;  %v1999_v44 = vsub.f32 1.0, %v7854_v43 }
 0x4f3   : > { %2233 = vrot.lane.b32.xlu1 %v2215_v13, %s7095_s20 }
 0x4f4   : > { %v6858_v23 = vpop.eup %6857  ;;  %v2216_v18 = vpack.c.bf16 %v7936_v8, %v7939_v27 }
 0x4f5   : > { %2047 = vrot.lane.b32.xlu0 %v6856_v62, %s7095_s20  ;;  %v2096_v62 = vmul.f32 %v7860_v35, %v7616_v2  ;;  %v8113_v2 = vld [vmem:[#allocation2 + $0x148] sm:$0xff] }
 0x4f7   : > { %2049 = vrot.lane.b32.xlu1 %v6858_v23, %s7095_s20 }
 0x4f9   : > { %2235 = vrot.lane.b32.xlu0 %v2216_v18, %s7095_s20 }
 0x551   : > { %v2040_v49 = vpop.permute.xlu0 %2039 }
 0x552   : > { %v2077_v9 = vmul.f32 %v2040_v49, %v1997_v59 }
 0x554   : > { %v7973_v46 = vadd.f32 %v2093_v48, %v2077_v9 }
 0x555   : > { %v2036_v30 = vpop.permute.xlu1 %2035 }
 0x556   : > { %v2075_v20 = vmul.f32 %v2036_v30, %v1995_v24  ;;  %9171 = vst [vmem:[#allocation16_spill] sm:$0xff] %v7973_v46  ;;  %v2001_v30 = vsub.f32 1.0, %v7865_v34 }
 0x557   : > { %v2038_v38 = vpop.permute.xlu0 %2037 }
 0x558   : > { %v2076_v0 = vmul.f32 %v2038_v38, %v1996_v60  ;;  %v7953_v32 = vadd.f32 %v2091_v10, %v2075_v20  ;;  %v2002_v38 = vsub.f32 1.0, %v7869_v51  ;;  %v2097_v10 = vmul.f32 %v7865_v34, %v7633_v56 }
 0x559   : > { %v2230_v15 = vpop.permute.xlu1 %2229 }
 0x55a   : > { %v7955_v37 = vadd.f32 %v2092_v11, %v2076_v0  ;;  %6160 = vmatprep.mubr.msk.bf16.mxu1 %vm1480_vm2, %v2230_v15  ;;  %v2098_v11 = vmul.f32 %v7869_v51, %v7635_v17 }
 0x55b   : > { %v2232_v6 = vpop.permute.xlu0 %2231 }
 0x55c   : > { %6161 = vmatmul.mubr.msk.bf16.vlgmr.msra.gmra.mrb[0].mxu1 %vm1480_vm2, %v2232_v6  ;;  %v2217_v7 = vpack.c.bf16 %v7955_v37, %v7953_v32 }
 0x55d   : > { %v2042_v54 = vpop.permute.xlu1 %2041  ;;  %6177 = vmatpush3.bf16.msra.mxu1 %v7084_v33 }
 0x55e   : > { %v2078_v53 = vmul.f32 %v2042_v54, %v1998_v26  ;;  %2237 = vrot.lane.b32.xlu1 %v2217_v7, %s7095_s20  ;;  %6178 = vmatprep.subr.bf16.mxu1 %v7085_v45 }
 0x560   : > { %v7975_v28 = vadd.f32 %v2094_v63, %v2078_v53 }
 0x561   : > { %v2044_v13 = vpop.permute.xlu1 %2043  ;;  %6179 = vmatpush3.bf16.msra.mxu1 %v7085_v45 }
 0x562   : > { %9172 = vst [vmem:[#allocation17_spill] sm:$0xff] %v7975_v28  ;;  %v2079_v25 = vmul.f32 %v2044_v13, %v1999_v44  ;;  %v2218_v31 = vpack.c.bf16 %v7975_v28, %v7973_v46 }
 0x563   : > { %v2046_v42 = vpop.permute.xlu0 %2045 }
 0x564   : > { %v2080_v23 = vmul.f32 %v2046_v42, %v2000_v21  ;;  %2239 = vrot.lane.b32.xlu0 %v2218_v31, %s7095_s20  ;;  %v7986_v49 = vadd.f32 %v2095_v19, %v2079_v25 }
 0x565   : > { %v2234_v18 = vpop.permute.xlu1 %2233 }
 0x566   : > { %9173 = vst [vmem:[#allocation18_spill] sm:$0xff] %v7986_v49  ;;  %v7988_v24 = vadd.f32 %v2096_v62, %v2080_v23  ;;  %6164 = vmatprep.mubr.msk.bf16.mxu1 %vm1480_vm2, %v2234_v18 }
 0x567   : > { %v2048_v20 = vpop.permute.xlu0 %2047 }
 0x568   : > { %9174 = vst [vmem:[#allocation19_spill] sm:$0xff] %v7988_v24  ;;  %v2081_v60 = vmul.f32 %v2048_v20, %v2001_v30  ;;  %v2219_v43 = vpack.c.bf16 %v7988_v24, %v7986_v49  ;;  %v8028_v30 = vld [vmem:[#allocation2 + $0x110] sm:$0xff] }
 0x569   : > { %v2050_v35 = vpop.permute.xlu1 %2049 }
 0x56a   : > { %v2082_v0 = vmul.f32 %v2050_v35, %v2002_v38  ;;  %2241 = vrot.lane.b32.xlu1 %v2219_v43, %s7095_s20  ;;  %v8000_v59 = vadd.f32 %v2097_v10, %v2081_v60  ;;  %v8031_v60 = vld [vmem:[#allocation2 + $0x118] sm:$0xff]  ;;  %v8034_v43 = vld [vmem:[#allocation2 + $0x100] sm:$0xff] }
 0x56b   : > { %v2236_v15 = vpop.permute.xlu0 %2235 }
 0x56c   : > { %9175 = vst [vmem:[#allocation20_spill] sm:$0xff] %v8000_v59  ;;  %v8002_v6 = vadd.f32 %v2098_v11, %v2082_v0  ;;  %6165 = vmatmul.mubr.msk.bf16.gmra.mrb[4].mxu1 %vm1480_vm2, %v2236_v15  ;;  %v8037_v11 = vld [vmem:[#allocation2 + $0x108] sm:$0xff] }
 0x56e   : > { %9176 = vst [vmem:[#allocation21_spill] sm:$0xff] %v8002_v6  ;;  %v2220_v9 = vpack.c.bf16 %v8002_v6, %v8000_v59 }
 0x570   : > { %2243 = vrot.lane.b32.xlu0 %v2220_v9, %s7095_s20 }
 0x5d0   : > { %v2238_v26 = vpop.permute.xlu1 %2237 }
 0x5d1   : > { %6168 = vmatprep.mubr.msk.bf16.mxu1 %vm1480_vm2, %v2238_v26 }
 0x5d6   : > { %v2240_v34 = vpop.permute.xlu0 %2239 }
 0x5d7   : > { %6169 = vmatmul.mubr.msk.bf16.gmra.mrb[8].mxu1 %vm1480_vm2, %v2240_v34  ;;  %v8040_v34 = vld [vmem:[#allocation2 + $0x130] sm:$0xff] }
 0x5dc   : > { %v2242_v51 = vpop.permute.xlu1 %2241 }
 0x5dd   : > { %6172 = vmatprep.mubr.msk.bf16.mxu1 %vm1480_vm2, %v2242_v51 }
 0x5e2   : > { %v2244_v7 = vpop.permute.xlu0 %2243 }
 0x5e3   : > { %6173 = vmatmul.mubr.msk.bf16.gmra.mrb[12].mxu1 %vm1480_vm2, %v2244_v7 }
 0x62f   : > { %v6162_v54 = vpop.f32.mrb[0].mxu1 }
 0x630   : > { %v2303_v33 = vpop.f32.mrb[1].mxu1  ;;  %v2480_v44 = vadd.f32 %v6162_v54, %v7712_v57  ;;  %v2368_v20 = vadd.f32 %v6162_v54, %v8028_v30  ;;  %v8043_v54 = vld [vmem:[#allocation2 + $0x138] sm:$0xff] }
 0x631   : > { %v2478_v48 = vadd.f32 %v2303_v33, %v7712_v57  ;;  %v6163_v63 = vpop.f32.mrb[2].mxu1  ;;  %v2366_v10 = vadd.f32 %v2303_v33, %v8034_v43 }
 0x632   : > { %v2306_v53 = vpop.f32.mrb[3].mxu1  ;;  %v2481_v13 = vadd.f32 %v6163_v63, %v7712_v57  ;;  %v2369_v38 = vadd.f32 %v6163_v63, %v8031_v60  ;;  %v5615_v35 = vmul.f32 -1.442695, %v2368_v20 }
 0x633   : > { %v2479_v45 = vadd.f32 %v2306_v53, %v7712_v57  ;;  %2510 = vrot.lane.b32.xlu1 %v2478_v48, %s7094_s17  ;;  %v2367_v15 = vadd.f32 %v2306_v53, %v8037_v11  ;;  %v5613_v9 = vmul.f32 -1.442695, %v2366_v10 }
 0x634   : > { %v5616_v0 = vmul.f32 -1.442695, %v2369_v38  ;;  %6859 = vpow2.f32 %v5615_v35 }
 0x635   : > { %2512 = vrot.lane.b32.xlu0 %v2479_v45, %s7094_s17  ;;  %v5614_v26 = vmul.f32 -1.442695, %v2367_v15  ;;  %v8046_v45 = vld [vmem:[#allocation2 + $0x120] sm:$0xff] }
 0x636   : > { %6861 = vpow2.f32 %v5616_v0 }
 0x637   : > { %2514 = vrot.lane.b32.xlu1 %v2480_v44, %s7094_s17  ;;  %6863 = vpow2.f32 %v5613_v9 }
 0x638   : > { %6865 = vpow2.f32 %v5614_v26 }
 0x639   : > { %2516 = vrot.lane.b32.xlu0 %v2481_v13, %s7094_s17 }
 0x63e   : > { %v6860_v51 = vpop.eup %6859 }
 0x63f   : > { %v6166_v25 = vpop.f32.mrb[4].mxu1  ;;  %v2432_v63 = vadd.f32 1.0, %v6860_v51 }
 0x640   : > { %v2319_v21 = vpop.f32.mrb[5].mxu1  ;;  %v2484_v23 = vadd.f32 %v6166_v25, %v7712_v57  ;;  %v2372_v7 = vadd.f32 %v6166_v25, %v8040_v34  ;;  %v6862_v48 = vpop.eup %6861 }
 0x641   : > { %v2482_v31 = vadd.f32 %v2319_v21, %v7712_v57  ;;  %v6167_v42 = vpop.f32.mrb[6].mxu1  ;;  %v6864_v53 = vpop.eup %6863  ;;  %v2370_v13 = vadd.f32 %v2319_v21, %v8046_v45  ;;  %6867 = vrcp.f32 %v2432_v63 }
 0x642   : > { %v2322_v19 = vpop.f32.mrb[7].mxu1  ;;  %v2485_v18 = vadd.f32 %v6167_v42, %v7712_v57  ;;  %v2373_v33 = vadd.f32 %v6167_v42, %v8043_v54  ;;  %v5619_v44 = vmul.f32 -1.442695, %v2372_v7  ;;  %v2430_v25 = vadd.f32 1.0, %v6864_v53 }
 0x643   : > { %2518 = vrot.lane.b32.xlu1 %v2482_v31, %s7094_s17  ;;  %v2483_v62 = vadd.f32 %v2322_v19, %v7712_v57  ;;  %v2433_v31 = vadd.f32 1.0, %v6862_v48  ;;  %v5617_v38 = vmul.f32 -1.442695, %v2370_v13 }
 0x644   : > { %6869 = vpow2.f32 %v5619_v44 }
 0x645   : > { %2520 = vrot.lane.b32.xlu0 %v2483_v62, %s7094_s17  ;;  %v8049_v62 = vld [vmem:[#allocation2 + $0x128] sm:$0xff]  ;;  %6871 = vrcp.f32 %v2433_v31 }
 0x646   : > { %v2371_v20 = vadd.f32 %v2322_v19, %v8049_v62 }
 0x647   : > { %2522 = vrot.lane.b32.xlu1 %v2484_v23, %s7094_s17  ;;  %v6866_v23 = vpop.eup %6865 }
 0x648   : > { %v2431_v42 = vadd.f32 1.0, %v6866_v23  ;;  %v5618_v35 = vmul.f32 -1.442695, %v2371_v20 }
 0x649   : > { %2524 = vrot.lane.b32.xlu0 %v2485_v18, %s7094_s17  ;;  %v5620_v18 = vmul.f32 -1.442695, %v2373_v33 }
 0x64b   : > { %6873 = vpow2.f32 %v5620_v18  ;;  %v8052_v0 = vpop.eup %6867 }
 0x64c   : > { %6875 = vrcp.f32 %v2430_v25 }
 0x64d   : > { %6877 = vpow2.f32 %v5617_v38 }
 0x64e   : > { %6879 = vrcp.f32 %v2431_v42  ;;  %v6870_v15 = vpop.eup %6869 }
 0x64f   : > { %6881 = vpow2.f32 %v5618_v35  ;;  %v8054_v26 = vpop.eup %6871  ;;  %v2436_v53 = vadd.f32 1.0, %v6870_v15 }
 0x651   : > { %6883 = vrcp.f32 %v2436_v53 }
 0x655   : > { %v6874_v7 = vpop.eup %6873 }
 0x656   : > { %v8059_v63 = vpop.eup %6875  ;;  %v2437_v20 = vadd.f32 1.0, %v6874_v7 }
 0x657   : > { %v6878_v31 = vpop.eup %6877 }
 0x658   : > { %v8063_v18 = vpop.eup %6879  ;;  %v2434_v42 = vadd.f32 1.0, %v6878_v31  ;;  %6885 = vrcp.f32 %v2437_v20 }
 0x659   : > { %v6882_v38 = vpop.eup %6881 }
 0x65a   : > { %v2435_v15 = vadd.f32 1.0, %v6882_v38  ;;  %6887 = vrcp.f32 %v2434_v42 }
 0x65b   : > { %v8078_v38 = vpop.eup %6883 }
 0x65c   : > { %6889 = vrcp.f32 %v2435_v15 }
 0x6a5   : > { %v2511_v21 = vpop.permute.xlu1 %2510 }
 0x6a6   : > { %v2558_v25 = vmul.f32 %v8059_v63, %v2511_v21 }
 0x6a7   : > { %v2513_v10 = vpop.permute.xlu0 %2512 }
 0x6a8   : > { %v2559_v35 = vmul.f32 %v8063_v18, %v2513_v10 }
 0x6a9   : > { %v2515_v9 = vpop.permute.xlu1 %2514 }
 0x6aa   : > { %v2560_v19 = vmul.f32 %v8052_v0, %v2515_v9  ;;  %v6170_v51 = vpop.f32.mrb[8].mxu1 }
 0x6ab   : > { %v2517_v48 = vpop.permute.xlu0 %2516  ;;  %v8057_v33 = vpop.f32.mrb[9].mxu1  ;;  %v2488_v7 = vadd.f32 %v6170_v51, %v7712_v57 }
 0x6ac   : > { %v2561_v44 = vmul.f32 %v8054_v26, %v2517_v48  ;;  %v6171_v13 = vpop.f32.mrb[10].mxu1  ;;  %2594 = vrot.lane.b32.xlu1 %v2560_v19, %s7094_s17  ;;  %v2486_v9 = vadd.f32 %v8057_v33, %v7712_v57 }
 0x6ad   : > { %v2338_v23 = vpop.f32.mrb[11].mxu1  ;;  %v2489_v53 = vadd.f32 %v6171_v13, %v7712_v57 }
 0x6ae   : > { %2596 = vrot.lane.b32.xlu0 %v2561_v44, %s7094_s17  ;;  %v2487_v19 = vadd.f32 %v2338_v23, %v7712_v57 }
 0x6b0   : > { %2590 = vrot.lane.b32.xlu1 %v2558_v25, %s7094_s17 }
 0x6b2   : > { %2592 = vrot.lane.b32.xlu0 %v2559_v35, %s7094_s17  ;;  %v8082_v35 = vpop.eup %6885 }
 0x6b4   : > { %2526 = vrot.lane.b32.xlu1 %v2486_v9, %s7094_s17 }
 0x6b5   : > { %v2519_v21 = vpop.permute.xlu1 %2518 }
 0x6b6   : > { %2528 = vrot.lane.b32.xlu0 %v2487_v19, %s7094_s17  ;;  %v6174_v10 = vpop.f32.mrb[12].mxu1  ;;  %v8086_v19 = vpop.eup %6887 }
 0x6b7   : > { %v2351_v48 = vpop.f32.mrb[13].mxu1  ;;  %v2521_v44 = vpop.permute.xlu0 %2520  ;;  %v2562_v17 = vmul.f32 %v8086_v19, %v2519_v21 }
 0x6b8   : > { %v6175_v31 = vpop.f32.mrb[14].mxu1  ;;  %2530 = vrot.lane.b32.xlu1 %v2488_v7, %s7094_s17  ;;  %v8090_v7 = vpop.eup %6889 }
 0x6b9   : > { %v2354_v20 = vpop.f32.mrb[15].mxu1  ;;  %v2523_v25 = vpop.permute.xlu1 %2522  ;;  %v2563_v56 = vmul.f32 %v8090_v7, %v2521_v44  ;;  %v2493_v21 = vadd.f32 %v6175_v31, %v7712_v57  ;;  %v8103_v44 = vld [vmem:[#allocation2 + $0x150] sm:$0xff] }
 0x6ba   : > { %2532 = vrot.lane.b32.xlu0 %v2489_v53, %s7094_s17  ;;  %v2564_v42 = vmul.f32 %v8078_v38, %v2523_v25  ;;  %v2490_v53 = vadd.f32 %v2351_v48, %v7712_v57  ;;  %v2491_v25 = vadd.f32 %v2354_v20, %v7712_v57 }
 0x6bb   : > { %v2525_v15 = vpop.permute.xlu0 %2524 }
 0x6bc   : > { %v2565_v9 = vmul.f32 %v8082_v35, %v2525_v15  ;;  %2602 = vrot.lane.b32.xlu1 %v2564_v42, %s7094_s17  ;;  %v2492_v42 = vadd.f32 %v6174_v10, %v7712_v57  ;;  %v8106_v15 = vld [vmem:[#allocation2 + $0x158] sm:$0xff] }
 0x6be   : > { %2604 = vrot.lane.b32.xlu0 %v2565_v9, %s7094_s17  ;;  %v8109_v9 = vld [vmem:[#allocation2 + $0x140] sm:$0xff] }
 0x6c0   : > { %2598 = vrot.lane.b32.xlu1 %v2562_v17, %s7094_s17  ;;  %v2376_v17 = vadd.f32 %v6170_v51, %v8103_v44  ;;  %v8116_v51 = vld [vmem:[#allocation2 + $0x160] sm:$0xff] }
 0x6c2   : > { %2600 = vrot.lane.b32.xlu0 %v2563_v56, %s7094_s17  ;;  %v2377_v56 = vadd.f32 %v6171_v13, %v8106_v15  ;;  %v2378_v13 = vadd.f32 %v2351_v48, %v8116_v51 }
 0x6c4   : > { %2534 = vrot.lane.b32.xlu1 %v2490_v53, %s7094_s17  ;;  %v5623_v53 = vmul.f32 -1.442695, %v2376_v17  ;;  %v5624_v4 = vmul.f32 -1.442695, %v2377_v56  ;;  %v5625_v56 = vmul.f32 -1.442695, %v2378_v13 }
 0x6c6   : > { %2536 = vrot.lane.b32.xlu0 %v2491_v25, %s7094_s17  ;;  %v2374_v25 = vadd.f32 %v8057_v33, %v8109_v9  ;;  %6891 = vpow2.f32 %v5623_v53  ;;  %v2379_v33 = vadd.f32 %v2354_v20, %v8119_v16 }
 0x6c7   : > { %6893 = vpow2.f32 %v5624_v4  ;;  %v8125_v4 = vld [vmem:[#allocation2 + $0x178] sm:$0xff] }
 0x6c8   : > { %2538 = vrot.lane.b32.xlu1 %v2492_v42, %s7094_s17  ;;  %v2375_v42 = vadd.f32 %v2338_v23, %v8113_v2  ;;  %v2380_v23 = vadd.f32 %v6174_v10, %v8122_v40 }
 0x6ca   : > { %2540 = vrot.lane.b32.xlu0 %v2493_v21, %s7094_s17  ;;  %v5621_v21 = vmul.f32 -1.442695, %v2374_v25  ;;  %v5622_v3 = vmul.f32 -1.442695, %v2375_v42  ;;  %v5626_v42 = vmul.f32 -1.442695, %v2379_v33 }
 0x6cb   : > { %v5627_v55 = vmul.f32 -1.442695, %v2380_v23 }
 0x6cc   : > { %6895 = vpow2.f32 %v5621_v21 }
 0x6cd   : > { %6897 = vpow2.f32 %v5622_v3  ;;  %v2381_v3 = vadd.f32 %v6175_v31, %v8125_v4 }
 0x6ce   : > { %6899 = vpow2.f32 %v5625_v56 }
 0x6cf   : > { %v5628_v29 = vmul.f32 -1.442695, %v2381_v3 }
 0x6d0   : > { %v6892_v17 = vpop.eup %6891 }
 0x6d1   : > { %v6894_v39 = vpop.eup %6893  ;;  %v2440_v53 = vadd.f32 1.0, %v6892_v17 }
 0x6d2   : > { %v2441_v21 = vadd.f32 1.0, %v6894_v39 }
 0x6d3   : > { %6901 = vrcp.f32 %v2440_v53 }
 0x6d4   : > { %6903 = vpow2.f32 %v5626_v42 }
 0x6d5   : > { %6905 = vrcp.f32 %v2441_v21 }
 0x6d6   : > { %v6896_v25 = vpop.eup %6895  ;;  %6907 = vpow2.f32 %v5627_v55 }
 0x6d7   : > { %v6898_v12 = vpop.eup %6897  ;;  %v2438_v20 = vadd.f32 1.0, %v6896_v25 }
 0x6d8   : > { %v2439_v13 = vadd.f32 1.0, %v6898_v12  ;;  %v6900_v33 = vpop.eup %6899 }
 0x6d9   : > { %6909 = vrcp.f32 %v2438_v20  ;;  %v2442_v42 = vadd.f32 1.0, %v6900_v33 }
 0x6da   : > { %6911 = vpow2.f32 %v5628_v29 }
 0x6db   : > { %6913 = vrcp.f32 %v2439_v13 }
 0x6dd   : > { %v8130_v53 = vpop.eup %6901 }
 0x6de   : > { %v6904_v12 = vpop.eup %6903 }
 0x6df   : > { %v8134_v21 = vpop.eup %6905 }
 0x6e0   : > { %v6908_v20 = vpop.eup %6907 }
 0x6e3   : > { %v8139_v13 = vpop.eup %6909 }
 0x71e   : > { %v2595_v48 = vpop.permute.xlu1 %2594 }
 0x71f   : > { %v2640_v25 = vadd.f32 %v2595_v48, %v8028_v30  ;;  %v2443_v30 = vadd.f32 1.0, %v6904_v12  ;;  %v6912_v48 = vpop.eup %6911 }
 0x720   : > { %v2597_v1 = vpop.permute.xlu0 %2596 }
 0x721   : > { %v2641_v29 = vadd.f32 %v2597_v1, %v8031_v60  ;;  %v2444_v1 = vadd.f32 1.0, %v6908_v20 }
 0x722   : > { %v2591_v10 = vpop.permute.xlu1 %2590 }
 0x723   : > { %v2638_v31 = vadd.f32 %v2591_v10, %v8034_v43 }
 0x724   : > { %v2593_v17 = vpop.permute.xlu0 %2592 }
 0x725   : > { %v2639_v56 = vadd.f32 %v2593_v17, %v8037_v11  ;;  %6915 = vtanh.f32 %v2638_v31  ;;  %v8143_v31 = vpop.eup %6913 }
 0x726   : > { %v2527_v39 = vpop.permute.xlu1 %2526 }
 0x727   : > { %6917 = vtanh.f32 %v2639_v56  ;;  %v2566_v10 = vmul.f32 %v8139_v13, %v2527_v39  ;;  %v2445_v56 = vadd.f32 1.0, %v6912_v48 }
 0x728   : > { %v2529_v23 = vpop.permute.xlu0 %2528  ;;  %6919 = vtanh.f32 %v2640_v25 }
 0x729   : > { %6921 = vrcp.f32 %v2442_v42  ;;  %v2567_v60 = vmul.f32 %v8143_v31, %v2529_v23 }
 0x72a   : > { %v2531_v3 = vpop.permute.xlu1 %2530  ;;  %6923 = vtanh.f32 %v2641_v29 }
 0x72b   : > { %v2568_v55 = vmul.f32 %v8130_v53, %v2531_v3  ;;  %6925 = vrcp.f32 %v2443_v30 }
 0x72c   : > { %v2533_v43 = vpop.permute.xlu0 %2532  ;;  %6927 = vrcp.f32 %v2444_v1 }
 0x72d   : > { %v2569_v11 = vmul.f32 %v8134_v21, %v2533_v43  ;;  %2610 = vrot.lane.b32.xlu1 %v2568_v55, %s7094_s17  ;;  %6929 = vrcp.f32 %v2445_v56 }
 0x72e   : > { %v2603_v17 = vpop.permute.xlu1 %2602 }
 0x72f   : > { %2612 = vrot.lane.b32.xlu0 %v2569_v11, %s7094_s17  ;;  %v6916_v25 = vpop.eup %6915  ;;  %v2644_v30 = vadd.f32 %v2603_v17, %v8040_v34 }
 0x730   : > { %v2605_v33 = vpop.permute.xlu0 %2604 }
 0x731   : > { %2606 = vrot.lane.b32.xlu1 %v2566_v10, %s7094_s17  ;;  %v6918_v12 = vpop.eup %6917  ;;  %v2645_v10 = vadd.f32 %v2605_v33, %v8043_v54 }
 0x732   : > { %v2599_v3 = vpop.permute.xlu1 %2598  ;;  %v6920_v23 = vpop.eup %6919 }
 0x733   : > { %2608 = vrot.lane.b32.xlu0 %v2567_v60, %s7094_s17  ;;  %v2642_v42 = vadd.f32 %v2599_v3, %v8046_v45  ;;  %v8152_v43 = vpop.eup %6921 }
 0x734   : > { %v2601_v39 = vpop.permute.xlu0 %2600  ;;  %v6924_v11 = vpop.eup %6923 }
 0x735   : > { %2702 = vrot.lane.b32.xlu1 %v6916_v25, %s7095_s20  ;;  %v2643_v29 = vadd.f32 %v2601_v39, %v8049_v62  ;;  %6931 = vtanh.f32 %v2642_v42  ;;  %v8158_v45 = vpop.eup %6925 }
 0x736   : > { %v2535_v55 = vpop.permute.xlu1 %2534  ;;  %v8163_v60 = vpop.eup %6927 }
 0x737   : > { %2704 = vrot.lane.b32.xlu0 %v6918_v12, %s7095_s20  ;;  %v2570_v48 = vmul.f32 %v8152_v43, %v2535_v55  ;;  %6933 = vtanh.f32 %v2643_v29  ;;  %v8167_v17 = vpop.eup %6929 }
 0x738   : > { %v2537_v20 = vpop.permute.xlu0 %2536  ;;  %6935 = vtanh.f32 %v2644_v30 }
 0x739   : > { %2706 = vrot.lane.b32.xlu1 %v6920_v23, %s7095_s20  ;;  %v2571_v62 = vmul.f32 %v8158_v45, %v2537_v20  ;;  %6937 = vtanh.f32 %v2645_v10 }
 0x73a   : > { %v2539_v1 = vpop.permute.xlu1 %2538 }
 0x73b   : > { %2708 = vrot.lane.b32.xlu0 %v6924_v11, %s7095_s20  ;;  %v2572_v34 = vmul.f32 %v8163_v60, %v2539_v1 }
 0x73c   : > { %v2541_v56 = vpop.permute.xlu0 %2540 }
 0x73d   : > { %2614 = vrot.lane.b32.xlu1 %v2570_v48, %s7094_s17  ;;  %v2573_v3 = vmul.f32 %v8167_v17, %v2541_v56  ;;  %v2671_v48 = vsub.f32 1.0, %v8063_v18 }
 0x73f   : > { %2616 = vrot.lane.b32.xlu0 %v2571_v62, %s7094_s17  ;;  %v6932_v54 = vpop.eup %6931  ;;  %v2670_v62 = vsub.f32 1.0, %v8059_v63 }
 0x741   : > { %2618 = vrot.lane.b32.xlu1 %v2572_v34, %s7094_s17  ;;  %v6934_v33 = vpop.eup %6933 }
 0x742   : > { %v6936_v25 = vpop.eup %6935 }
 0x743   : > { %2620 = vrot.lane.b32.xlu0 %v2573_v3, %s7094_s17  ;;  %v6938_v39 = vpop.eup %6937  ;;  %v2673_v3 = vsub.f32 1.0, %v8054_v26 }
 0x745   : > { %2710 = vrot.lane.b32.xlu1 %v6932_v54, %s7095_s20 }
 0x747   : > { %2712 = vrot.lane.b32.xlu0 %v6934_v33, %s7095_s20 }
 0x749   : > { %2714 = vrot.lane.b32.xlu1 %v6936_v25, %s7095_s20 }
 0x74b   : > { %2716 = vrot.lane.b32.xlu0 %v6938_v39, %s7095_s20 }
 0x79f   : > { %v2611_v12 = vpop.permute.xlu1 %2610 }
 0x7a0   : > { %v2648_v42 = vadd.f32 %v2611_v12, %v8103_v44 }
 0x7a1   : > { %v2613_v55 = vpop.permute.xlu0 %2612 }
 0x7a2   : > { %6939 = vtanh.f32 %v2648_v42  ;;  %v2649_v1 = vadd.f32 %v2613_v55, %v8106_v15  ;;  %v2766_v15 = vmul.f32 %v8059_v63, %v7896_v58  ;;  %v2769_v42 = vmul.f32 %v8054_v26, %v7900_v14 }
 0x7a3   : > { %v2607_v23 = vpop.permute.xlu1 %2606 }
 0x7a4   : > { %v2646_v29 = vadd.f32 %v2607_v23, %v8109_v9  ;;  %v2767_v9 = vmul.f32 %v8063_v18, %v7891_v22 }
 0x7a5   : > { %v2609_v20 = vpop.permute.xlu0 %2608 }
 0x7a6   : > { %6941 = vtanh.f32 %v2646_v29  ;;  %v2647_v11 = vadd.f32 %v2609_v20, %v8113_v2  ;;  %v2672_v2 = vsub.f32 1.0, %v8052_v0  ;;  %v2768_v20 = vmul.f32 %v8052_v0, %v7904_v41 }
 0x7a7   : > { %v2703_v30 = vpop.permute.xlu1 %2702 }
 0x7a8   : > { %6943 = vtanh.f32 %v2647_v11  ;;  %v2750_v54 = vmul.f32 %v2703_v30, %v2670_v62 }
 0x7a9   : > { %v2705_v10 = vpop.permute.xlu0 %2704  ;;  %6945 = vtanh.f32 %v2649_v1 }
 0x7aa   : > { %v2751_v56 = vmul.f32 %v2705_v10, %v2671_v48  ;;  %v8194_v29 = vadd.f32 %v2766_v15, %v2750_v54  ;;  %v2675_v54 = vsub.f32 1.0, %v8090_v7 }
 0x7ab   : > { %v2707_v44 = vpop.permute.xlu1 %2706 }
 0x7ac   : > { %v6940_v34 = vpop.eup %6939  ;;  %v8189_v39 = vadd.f32 %v2767_v9, %v2751_v56  ;;  %v2752_v12 = vmul.f32 %v2707_v44, %v2672_v2 }
 0x7ad   : > { %v2709_v33 = vpop.permute.xlu0 %2708  ;;  %2722 = vrot.lane.b32.xlu0 %v6940_v34, %s7095_s20 }
 0x7ae   : > { %v2753_v25 = vmul.f32 %v2709_v33, %v2673_v3  ;;  %v8202_v10 = vadd.f32 %v2768_v20, %v2752_v12 }
 0x7af   : > { %v2615_v55 = vpop.permute.xlu1 %2614 }
 0x7b0   : > { %v6942_v23 = vpop.eup %6941  ;;  %v2650_v18 = vadd.f32 %v2615_v55, %v8116_v51  ;;  %v8198_v11 = vadd.f32 %v2769_v42, %v2753_v25  ;;  %v2896_v51 = vpack.c.bf16 %v8189_v39, %v8194_v29  ;;  %v2677_v42 = vsub.f32 1.0, %v8082_v35 }
 0x7b1   : > { %v2617_v30 = vpop.permute.xlu0 %2616  ;;  %2718 = vrot.lane.b32.xlu1 %v6942_v23, %s7095_s20  ;;  %v2676_v55 = vsub.f32 1.0, %v8078_v38 }
 0x7b2   : > { %v6944_v63 = vpop.eup %6943  ;;  %6947 = vtanh.f32 %v2650_v18  ;;  %v2651_v48 = vadd.f32 %v2617_v30, %v8119_v16  ;;  %v2897_v62 = vpack.c.bf16 %v8198_v11, %v8202_v10  ;;  %v2674_v16 = vsub.f32 1.0, %v8086_v19 }
 0x7b3   : > { %2720 = vrot.lane.b32.xlu0 %v6944_v63, %s7095_s20  ;;  %v2619_v26 = vpop.permute.xlu1 %2618  ;;  %v6946_v34 = vpop.eup %6945  ;;  %v2773_v30 = vmul.f32 %v8082_v35, %v7936_v8  ;;  %v2772_v63 = vmul.f32 %v8078_v38, %v7939_v27  ;;  %v2678_v38 = vsub.f32 1.0, %v8139_v13 }
 0x7b4   : > { %6949 = vtanh.f32 %v2651_v48  ;;  %v2652_v0 = vadd.f32 %v2619_v26, %v8122_v40  ;;  %v2770_v40 = vmul.f32 %v8086_v19, %v7922_v47 }
 0x7b5   : > { %v2621_v1 = vpop.permute.xlu0 %2620  ;;  %2912 = vrot.lane.b32.xlu1 %v2896_v51, %s7095_s20 }
 0x7b6   : > { %v2653_v56 = vadd.f32 %v2621_v1, %v8125_v4  ;;  %6951 = vtanh.f32 %v2652_v0  ;;  %v2771_v4 = vmul.f32 %v8090_v7, %v7924_v52 }
 0x7b7   : > { %2914 = vrot.lane.b32.xlu0 %v2897_v62, %s7095_s20  ;;  %v2711_v44 = vpop.permute.xlu1 %2710 }
 0x7b8   : > { %v2754_v3 = vmul.f32 %v2711_v44, %v2674_v16  ;;  %6953 = vtanh.f32 %v2653_v56  ;;  %v2679_v16 = vsub.f32 1.0, %v8143_v31 }
 0x7b9   : > { %v2713_v9 = vpop.permute.xlu0 %2712  ;;  %2724 = vrot.lane.b32.xlu1 %v6946_v34, %s7095_s20  ;;  %v2774_v34 = vmul.f32 %v8139_v13, %v7953_v32 }
 0x7ba   : > { %v2755_v2 = vmul.f32 %v2713_v9, %v2675_v54  ;;  %v8220_v25 = vadd.f32 %v2770_v40, %v2754_v3  ;;  %v2775_v3 = vmul.f32 %v8143_v31, %v7955_v37  ;;  %v2680_v40 = vsub.f32 1.0, %v8130_v53 }
 0x7bb   : > { %v2715_v12 = vpop.permute.xlu1 %2714 }
 0x7bc   : > { %v6948_v33 = vpop.eup %6947  ;;  %v8222_v15 = vadd.f32 %v2771_v4, %v2755_v2  ;;  %v2756_v7 = vmul.f32 %v2715_v12, %v2676_v55  ;;  %v2776_v55 = vmul.f32 %v8130_v53, %v7973_v46 }
 0x7bd   : > { %v2717_v23 = vpop.permute.xlu0 %2716  ;;  %2726 = vrot.lane.b32.xlu1 %v6948_v33, %s7095_s20 }
 0x7be   : > { %v6950_v18 = vpop.eup %6949  ;;  %v2757_v20 = vmul.f32 %v2717_v23, %v2677_v42  ;;  %v2898_v19 = vpack.c.bf16 %v8222_v15, %v8220_v25  ;;  %v8237_v51 = vadd.f32 %v2772_v63, %v2756_v7  ;;  %v2681_v42 = vsub.f32 1.0, %v8134_v21 }
 0x7bf   : > { %2728 = vrot.lane.b32.xlu0 %v6950_v18, %s7095_s20  ;;  %v2777_v23 = vmul.f32 %v8134_v21, %v7975_v28  ;;  %v2682_v7 = vsub.f32 1.0, %v8152_v43  ;;  %v2778_v21 = vmul.f32 %v8152_v43, %v7986_v49 }
 0x7c0   : > { %v8234_v48 = vadd.f32 %v2773_v30, %v2757_v20  ;;  %v6952_v26 = vpop.eup %6951 }
 0x7c1   : > { %2916 = vrot.lane.b32.xlu1 %v2898_v19, %s7095_s20 }
 0x7c2   : > { %v6954_v0 = vpop.eup %6953  ;;  %v2899_v35 = vpack.c.bf16 %v8234_v48, %v8237_v51 }
 0x7c3   : > { %2730 = vrot.lane.b32.xlu0 %v6952_v26, %s7095_s20  ;;  %v2683_v26 = vsub.f32 1.0, %v8158_v45 }
 0x7c5   : > { %2732 = vrot.lane.b32.xlu1 %v6954_v0, %s7095_s20 }
 0x7c7   : > { %2918 = vrot.lane.b32.xlu0 %v2899_v35, %s7095_s20  ;;  %v2779_v35 = vmul.f32 %v8158_v45, %v7988_v24  ;;  %v8415_v24 = vld [vmem:[#allocation2 + $0x1e8] sm:$0xff] }
 0x81f   : > { %v2723_v1 = vpop.permute.xlu0 %2722 }
 0x820   : > { %v2760_v12 = vmul.f32 %v2723_v1, %v2680_v40 }
 0x822   : > { %v8265_v20 = vadd.f32 %v2776_v55, %v2760_v12 }
 0x823   : > { %v2719_v62 = vpop.permute.xlu1 %2718 }
 0x824   : > { %v2758_v56 = vmul.f32 %v2719_v62, %v2678_v38  ;;  %9179 = vst [vmem:[#allocation24_spill] sm:$0xff] %v8265_v20 }
 0x825   : > { %v2721_v44 = vpop.permute.xlu0 %2720 }
 0x826   : > { %v2759_v54 = vmul.f32 %v2721_v44, %v2679_v16  ;;  %v8251_v4 = vadd.f32 %v2774_v34, %v2758_v56  ;;  %v2684_v16 = vsub.f32 1.0, %v8163_v60 }
 0x827   : > { %v2913_v9 = vpop.permute.xlu1 %2912 }
 0x828   : > { %9177 = vst [vmem:[#allocation22_spill] sm:$0xff] %v8251_v4  ;;  %v8253_v2 = vadd.f32 %v2775_v3, %v2759_v54  ;;  %6180 = vmatprep.mubr.msk.bf16.mxu1 %vm1480_vm2, %v2913_v9  ;;  %v2685_v3 = vsub.f32 1.0, %v8167_v17  ;;  %v2780_v54 = vmul.f32 %v8163_v60, %v8000_v59  ;;  %v2781_v9 = vmul.f32 %v8167_v17, %v8002_v6 }
 0x829   : > { %v2915_v33 = vpop.permute.xlu0 %2914 }
 0x82a   : > { %9178 = vst [vmem:[#allocation23_spill] sm:$0xff] %v8253_v2  ;;  %6181 = vmatmul.mubr.msk.bf16.vlgmr.msra.gmra.mrb[16].mxu1 %vm1480_vm2, %v2915_v33  ;;  %v2900_v13 = vpack.c.bf16 %v8253_v2, %v8251_v4  ;;  %v8412_v2 = vld [vmem:[#allocation2 + $0x1e0] sm:$0xff] }
 0x82b   : > { %v2725_v31 = vpop.permute.xlu1 %2724 }
 0x82c   : > { %v2761_v18 = vmul.f32 %v2725_v31, %v2681_v42  ;;  %2920 = vrot.lane.b32.xlu1 %v2900_v13, %s7095_s20 }
 0x82e   : > { %v8267_v19 = vadd.f32 %v2777_v23, %v2761_v18 }
 0x82f   : > { %v2727_v30 = vpop.permute.xlu1 %2726 }
 0x830   : > { %9180 = vst [vmem:[#allocation25_spill] sm:$0xff] %v8267_v19  ;;  %v2762_v63 = vmul.f32 %v2727_v30, %v2682_v7  ;;  %v2901_v0 = vpack.c.bf16 %v8267_v19, %v8265_v20 }
 0x831   : > { %v2729_v53 = vpop.permute.xlu0 %2728 }
 0x832   : > { %v2763_v1 = vmul.f32 %v2729_v53, %v2683_v26  ;;  %2922 = vrot.lane.b32.xlu0 %v2901_v0, %s7095_s20  ;;  %v8278_v62 = vadd.f32 %v2778_v21, %v2762_v63 }
 0x833   : > { %v2917_v38 = vpop.permute.xlu1 %2916 }
 0x834   : > { %9181 = vst [vmem:[#allocation26_spill] sm:$0xff] %v8278_v62  ;;  %v8280_v56 = vadd.f32 %v2779_v35, %v2763_v1  ;;  %6184 = vmatprep.mubr.msk.bf16.mxu1 %vm1480_vm2, %v2917_v38 }
 0x835   : > { %v2731_v44 = vpop.permute.xlu0 %2730 }
 0x836   : > { %9182 = vst [vmem:[#allocation27_spill] sm:$0xff] %v8280_v56  ;;  %v2764_v34 = vmul.f32 %v2731_v44, %v2684_v16  ;;  %v2902_v43 = vpack.c.bf16 %v8280_v56, %v8278_v62 }
 0x837   : > { %v2733_v45 = vpop.permute.xlu1 %2732 }
 0x838   : > { %v2765_v40 = vmul.f32 %v2733_v45, %v2685_v3  ;;  %2924 = vrot.lane.b32.xlu1 %v2902_v43, %s7095_s20  ;;  %v8292_v12 = vadd.f32 %v2780_v54, %v2764_v34  ;;  %v8320_v43 = vld [vmem:[#allocation2 + $0x180] sm:$0xff]  ;;  %v8323_v54 = vld [vmem:[#allocation2 + $0x188] sm:$0xff] }
 0x839   : > { %v2919_v33 = vpop.permute.xlu0 %2918 }
 0x83a   : > { %9183 = vst [vmem:[#allocation28_spill] sm:$0xff] %v8292_v12  ;;  %v8294_v42 = vadd.f32 %v2781_v9, %v2765_v40  ;;  %6185 = vmatmul.mubr.msk.bf16.gmra.mrb[20].mxu1 %vm1480_vm2, %v2919_v33 }
 0x83c   : > { %9184 = vst [vmem:[#allocation29_spill] sm:$0xff] %v8294_v42  ;;  %v2903_v13 = vpack.c.bf16 %v8294_v42, %v8292_v12 }
 0x83e   : > { %2926 = vrot.lane.b32.xlu0 %v2903_v13, %s7095_s20  ;;  %v8326_v13 = vld [vmem:[#allocation2 + $0x190] sm:$0xff] }
 0x89e   : > { %v2921_v31 = vpop.permute.xlu1 %2920 }
 0x89f   : > { %6188 = vmatprep.mubr.msk.bf16.mxu1 %vm1480_vm2, %v2921_v31 }
 0x8a4   : > { %v2923_v60 = vpop.permute.xlu0 %2922 }
 0x8a5   : > { %6189 = vmatmul.mubr.msk.bf16.gmra.mrb[24].mxu1 %vm1480_vm2, %v2923_v60  ;;  %v8329_v60 = vld [vmem:[#allocation2 + $0x198] sm:$0xff] }
 0x8aa   : > { %v2925_v17 = vpop.permute.xlu1 %2924 }
 0x8ab   : > { %6192 = vmatprep.mubr.msk.bf16.mxu1 %vm1480_vm2, %v2925_v17 }
 0x8b0   : > { %v2927_v55 = vpop.permute.xlu0 %2926 }
 0x8b1   : > { %6193 = vmatmul.mubr.msk.bf16.gmra.mrb[28].mxu1 %vm1480_vm2, %v2927_v55 }
 0x8fd   : > { %v6182_v23 = vpop.f32.mrb[16].mxu1 }
 0x8fe   : > { %v2986_v18 = vpop.f32.mrb[17].mxu1  ;;  %v3163_v0 = vadd.f32 %v6182_v23, %v7712_v57  ;;  %v3051_v31 = vadd.f32 %v6182_v23, %v8326_v13 }
 0x8ff   : > { %v3161_v7 = vadd.f32 %v2986_v18, %v7712_v57  ;;  %v6183_v30 = vpop.f32.mrb[18].mxu1  ;;  %v3049_v45 = vadd.f32 %v2986_v18, %v8320_v43 }
 0x900   : > { %v2989_v63 = vpop.f32.mrb[19].mxu1  ;;  %v3164_v53 = vadd.f32 %v6183_v30, %v7712_v57  ;;  %v3052_v17 = vadd.f32 %v6183_v30, %v8329_v60  ;;  %v5639_v55 = vmul.f32 -1.442695, %v3051_v31  ;;  %v8338_v30 = vld [vmem:[#allocation2 + $0x1b0] sm:$0xff] }
 0x901   : > { %v3162_v26 = vadd.f32 %v2989_v63, %v7712_v57  ;;  %3193 = vrot.lane.b32.xlu1 %v3161_v7, %s7094_s17  ;;  %v3050_v9 = vadd.f32 %v2989_v63, %v8323_v54  ;;  %v5637_v40 = vmul.f32 -1.442695, %v3049_v45 }
 0x902   : > { %v5640_v7 = vmul.f32 -1.442695, %v3052_v17 }
 0x903   : > { %3195 = vrot.lane.b32.xlu0 %v3162_v26, %s7094_s17  ;;  %v5638_v33 = vmul.f32 -1.442695, %v3050_v9  ;;  %6955 = vpow2.f32 %v5637_v40  ;;  %v8332_v26 = vld [vmem:[#allocation2 + $0x1a0] sm:$0xff]  ;;  %v8341_v9 = vld [vmem:[#allocation2 + $0x1b8] sm:$0xff] }
 0x905   : > { %3197 = vrot.lane.b32.xlu1 %v3163_v0, %s7094_s17  ;;  %6957 = vpow2.f32 %v5638_v33  ;;  %v8335_v0 = vld [vmem:[#allocation2 + $0x1a8] sm:$0xff] }
 0x906   : > { %6959 = vpow2.f32 %v5639_v55 }
 0x907   : > { %3199 = vrot.lane.b32.xlu0 %v3164_v53, %s7094_s17  ;;  %6961 = vpow2.f32 %v5640_v7 }
 0x90d   : > { %v6186_v21 = vpop.f32.mrb[20].mxu1  ;;  %v6956_v18 = vpop.eup %6955 }
 0x90e   : > { %v3002_v35 = vpop.f32.mrb[21].mxu1  ;;  %v3167_v34 = vadd.f32 %v6186_v21, %v7712_v57  ;;  %v3113_v23 = vadd.f32 1.0, %v6956_v18  ;;  %v3055_v45 = vadd.f32 %v6186_v21, %v8338_v30 }
 0x90f   : > { %v3165_v1 = vadd.f32 %v3002_v35, %v7712_v57  ;;  %v6187_v38 = vpop.f32.mrb[22].mxu1  ;;  %v3053_v63 = vadd.f32 %v3002_v35, %v8332_v26  ;;  %v6958_v53 = vpop.eup %6957 }
 0x910   : > { %v3005_v16 = vpop.f32.mrb[23].mxu1  ;;  %v3168_v3 = vadd.f32 %v6187_v38, %v7712_v57  ;;  %6963 = vrcp.f32 %v3113_v23  ;;  %v6960_v35 = vpop.eup %6959  ;;  %v3056_v40 = vadd.f32 %v6187_v38, %v8341_v9  ;;  %v5643_v31 = vmul.f32 -1.442695, %v3055_v45 }
 0x911   : > { %3201 = vrot.lane.b32.xlu1 %v3165_v1, %s7094_s17  ;;  %v3166_v44 = vadd.f32 %v3005_v16, %v7712_v57  ;;  %v3054_v1 = vadd.f32 %v3005_v16, %v8335_v0  ;;  %v6962_v33 = vpop.eup %6961  ;;  %v3115_v16 = vadd.f32 1.0, %v6960_v35 }
 0x912   : > { %v5644_v17 = vmul.f32 -1.442695, %v3056_v40  ;;  %v3116_v55 = vadd.f32 1.0, %v6962_v33 }
 0x913   : > { %3203 = vrot.lane.b32.xlu0 %v3166_v44, %s7094_s17  ;;  %v5641_v44 = vmul.f32 -1.442695, %v3053_v63 }
 0x915   : > { %3205 = vrot.lane.b32.xlu1 %v3167_v34, %s7094_s17  ;;  %v3114_v34 = vadd.f32 1.0, %v6958_v53  ;;  %6965 = vpow2.f32 %v5641_v44 }
 0x917   : > { %3207 = vrot.lane.b32.xlu0 %v3168_v3, %s7094_s17  ;;  %v5642_v3 = vmul.f32 -1.442695, %v3054_v1  ;;  %6967 = vrcp.f32 %v3114_v34 }
 0x919   : > { %6969 = vpow2.f32 %v5642_v3 }
 0x91a   : > { %6971 = vpow2.f32 %v5643_v31  ;;  %v8344_v7 = vpop.eup %6963 }
 0x91b   : > { %6973 = vrcp.f32 %v3115_v16 }
 0x91c   : > { %6975 = vpow2.f32 %v5644_v17 }
 0x91d   : > { %6977 = vrcp.f32 %v3116_v55 }
 0x91f   : > { %v6966_v63 = vpop.eup %6965 }
 0x920   : > { %v3117_v44 = vadd.f32 1.0, %v6966_v63 }
 0x921   : > { %v8347_v53 = vpop.eup %6967 }
 0x922   : > { %6979 = vrcp.f32 %v3117_v44 }
 0x923   : > { %v6970_v38 = vpop.eup %6969 }
 0x924   : > { %v3118_v3 = vadd.f32 1.0, %v6970_v38  ;;  %v6972_v16 = vpop.eup %6971 }
 0x925   : > { %v8359_v55 = vpop.eup %6973  ;;  %v3119_v38 = vadd.f32 1.0, %v6972_v16 }
 0x926   : > { %6981 = vrcp.f32 %v3118_v3  ;;  %v6976_v63 = vpop.eup %6975 }
 0x927   : > { %v3120_v44 = vadd.f32 1.0, %v6976_v63  ;;  %6983 = vrcp.f32 %v3119_v38 }
 0x929   : > { %6985 = vrcp.f32 %v3120_v44 }
 0x973   : > { %v3194_v18 = vpop.permute.xlu1 %3193 }
 0x974   : > { %v3241_v21 = vmul.f32 %v8344_v7, %v3194_v18 }
 0x975   : > { %v3196_v1 = vpop.permute.xlu0 %3195 }
 0x976   : > { %v3242_v23 = vmul.f32 %v8347_v53, %v3196_v1  ;;  %3273 = vrot.lane.b32.xlu1 %v3241_v21, %s7094_s17  ;;  %v8363_v1 = vpop.eup %6977 }
 0x977   : > { %v3198_v33 = vpop.permute.xlu1 %3197 }
 0x978   : > { %3275 = vrot.lane.b32.xlu0 %v3242_v23, %s7094_s17  ;;  %v8352_v34 = vpop.f32.mrb[24].mxu1  ;;  %v3243_v21 = vmul.f32 %v8359_v55, %v3198_v33 }
 0x979   : > { %v3018_v45 = vpop.f32.mrb[25].mxu1  ;;  %v3200_v18 = vpop.permute.xlu0 %3199 }
 0x97a   : > { %v3169_v35 = vadd.f32 %v3018_v45, %v7712_v57  ;;  %v8355_v40 = vpop.f32.mrb[26].mxu1  ;;  %v3244_v23 = vmul.f32 %v8363_v1, %v3200_v18 }
 0x97b   : > { %v3021_v31 = vpop.f32.mrb[27].mxu1  ;;  %v3172_v33 = vadd.f32 %v8355_v40, %v7712_v57 }
 0x97c   : > { %v3170_v17 = vadd.f32 %v3021_v31, %v7712_v57  ;;  %3209 = vrot.lane.b32.xlu1 %v3169_v35, %s7094_s17  ;;  %v3171_v35 = vadd.f32 %v8352_v34, %v7712_v57 }
 0x97e   : > { %3211 = vrot.lane.b32.xlu0 %v3170_v17, %s7094_s17  ;;  %v8373_v17 = vpop.eup %6979 }
 0x97f   : > { %v8377_v12 = vpop.eup %6981 }
 0x980   : > { %3277 = vrot.lane.b32.xlu1 %v3243_v21, %s7094_s17 }
 0x982   : > { %3279 = vrot.lane.b32.xlu0 %v3244_v23, %s7094_s17 }
 0x983   : > { %v3202_v3 = vpop.permute.xlu1 %3201 }
 0x984   : > { %v6194_v42 = vpop.f32.mrb[28].mxu1  ;;  %3213 = vrot.lane.b32.xlu1 %v3171_v35, %s7094_s17  ;;  %v3245_v18 = vmul.f32 %v8373_v17, %v3202_v3  ;;  %v8385_v3 = vpop.eup %6983 }
 0x985   : > { %v3034_v16 = vpop.f32.mrb[29].mxu1  ;;  %v3204_v63 = vpop.permute.xlu0 %3203 }
 0x986   : > { %3215 = vrot.lane.b32.xlu0 %v3172_v33, %s7094_s17  ;;  %v6195_v21 = vpop.f32.mrb[30].mxu1  ;;  %v3246_v23 = vmul.f32 %v8377_v12, %v3204_v63  ;;  %v3173_v56 = vadd.f32 %v3034_v16, %v7712_v57  ;;  %v8389_v19 = vpop.eup %6985  ;;  %v3175_v63 = vadd.f32 %v6194_v42, %v7712_v57 }
 0x987   : > { %v3037_v38 = vpop.f32.mrb[31].mxu1  ;;  %v3206_v35 = vpop.permute.xlu1 %3205 }
 0x988   : > { %3281 = vrot.lane.b32.xlu1 %v3245_v18, %s7094_s17  ;;  %v3174_v44 = vadd.f32 %v3037_v38, %v7712_v57  ;;  %v3247_v62 = vmul.f32 %v8385_v3, %v3206_v35 }
 0x989   : > { %v3208_v33 = vpop.permute.xlu0 %3207 }
 0x98a   : > { %3283 = vrot.lane.b32.xlu0 %v3246_v23, %s7094_s17  ;;  %v3248_v18 = vmul.f32 %v8389_v19, %v3208_v33  ;;  %v3176_v23 = vadd.f32 %v6195_v21, %v7712_v57  ;;  %v8408_v57 = vld [vmem:[#allocation2 + $0x1d8] sm:$0xff] }
 0x98c   : > { %3217 = vrot.lane.b32.xlu1 %v3173_v56, %s7094_s17  ;;  %v8398_v56 = vld [vmem:[#allocation2 + $0x1c0] sm:$0xff] }
 0x98d   : > { %v3057_v35 = vadd.f32 %v3018_v45, %v8398_v56 }
 0x98e   : > { %3219 = vrot.lane.b32.xlu0 %v3174_v44, %s7094_s17  ;;  %v8401_v44 = vld [vmem:[#allocation2 + $0x1c8] sm:$0xff] }
 0x98f   : > { %v3058_v33 = vadd.f32 %v3021_v31, %v8401_v44  ;;  %v5645_v20 = vmul.f32 -1.442695, %v3057_v35  ;;  %v3061_v35 = vadd.f32 %v3034_v16, %v8412_v2 }
 0x990   : > { %3285 = vrot.lane.b32.xlu1 %v3247_v62, %s7094_s17  ;;  %v8404_v62 = vld [vmem:[#allocation2 + $0x1d0] sm:$0xff] }
 0x991   : > { %v5646_v6 = vmul.f32 -1.442695, %v3058_v33  ;;  %6987 = vpow2.f32 %v5645_v20  ;;  %v8417_v20 = vld [vmem:[#allocation2 + $0x1f0] sm:$0xff]  ;;  %v3062_v33 = vadd.f32 %v3037_v38, %v8415_v24 }
 0x992   : > { %3287 = vrot.lane.b32.xlu0 %v3248_v18, %s7094_s17  ;;  %v3059_v18 = vadd.f32 %v8352_v34, %v8404_v62 }
 0x993   : > { %6989 = vpow2.f32 %v5646_v6  ;;  %v5650_v49 = vmul.f32 -1.442695, %v3062_v33 }
 0x994   : > { %3221 = vrot.lane.b32.xlu1 %v3175_v63, %s7094_s17  ;;  %v5647_v63 = vmul.f32 -1.442695, %v3059_v18  ;;  %v3063_v18 = vadd.f32 %v6194_v42, %v8417_v20 }
 0x996   : > { %3223 = vrot.lane.b32.xlu0 %v3176_v23, %s7094_s17  ;;  %v3060_v23 = vadd.f32 %v8355_v40, %v8408_v57  ;;  %6991 = vpow2.f32 %v5647_v63  ;;  %v5649_v40 = vmul.f32 -1.442695, %v3061_v35  ;;  %v5651_v16 = vmul.f32 -1.442695, %v3063_v18 }
 0x998   : > { %v5648_v45 = vmul.f32 -1.442695, %v3060_v23  ;;  %v8421_v23 = vld [vmem:[#allocation2 + $0x1f8] sm:$0xff] }
 0x99a   : > { %6993 = vpow2.f32 %v5648_v45  ;;  %v3064_v45 = vadd.f32 %v6195_v21, %v8421_v23 }
 0x99b   : > { %v6988_v31 = vpop.eup %6987 }
 0x99c   : > { %v3121_v34 = vadd.f32 1.0, %v6988_v31  ;;  %v5652_v46 = vmul.f32 -1.442695, %v3064_v45 }
 0x99d   : > { %v6990_v59 = vpop.eup %6989 }
 0x99e   : > { %v3122_v6 = vadd.f32 1.0, %v6990_v59  ;;  %6995 = vrcp.f32 %v3121_v34 }
 0x99f   : > { %6997 = vpow2.f32 %v5649_v40 }
 0x9a0   : > { %v6992_v63 = vpop.eup %6991  ;;  %6999 = vrcp.f32 %v3122_v6 }
 0x9a1   : > { %v3123_v28 = vadd.f32 1.0, %v6992_v63  ;;  %7001 = vpow2.f32 %v5650_v49 }
 0x9a2   : > { %7003 = vpow2.f32 %v5651_v16 }
 0x9a3   : > { %7005 = vrcp.f32 %v3123_v28 }
 0x9a4   : > { %v6994_v31 = vpop.eup %6993 }
 0x9a5   : > { %v3124_v59 = vadd.f32 1.0, %v6994_v31 }
 0x9a8   : > { %v8426_v21 = vpop.eup %6995 }
 0x9a9   : > { %v6998_v33 = vpop.eup %6997 }
 0x9aa   : > { %v8429_v49 = vpop.eup %6999 }
 0x9ab   : > { %v7002_v28 = vpop.eup %7001 }
 0x9ac   : > { %v3126_v31 = vadd.f32 1.0, %v7002_v28 }
 0x9e8   : > { %v3274_v4 = vpop.permute.xlu1 %3273 }
 0x9e9   : > { %v3321_v42 = vadd.f32 %v3274_v4, %v8320_v43  ;;  %v3125_v43 = vadd.f32 1.0, %v6998_v33 }
 0x9ea   : > { %v3276_v38 = vpop.permute.xlu0 %3275 }
 0x9eb   : > { %7007 = vtanh.f32 %v3321_v42  ;;  %v3322_v35 = vadd.f32 %v3276_v38, %v8323_v54  ;;  %v7004_v54 = vpop.eup %7003 }
 0x9ec   : > { %7009 = vpow2.f32 %v5652_v46  ;;  %v8435_v63 = vpop.eup %7005  ;;  %v3127_v33 = vadd.f32 1.0, %v7004_v54 }
 0x9ed   : > { %7011 = vtanh.f32 %v3322_v35 }
 0x9ee   : > { %7013 = vrcp.f32 %v3124_v59  ;;  %v3210_v34 = vpop.permute.xlu1 %3209 }
 0x9ef   : > { %v3249_v18 = vmul.f32 %v8426_v21, %v3210_v34 }
 0x9f0   : > { %v3212_v40 = vpop.permute.xlu0 %3211 }
 0x9f1   : > { %v3250_v4 = vmul.f32 %v8429_v49, %v3212_v40  ;;  %3289 = vrot.lane.b32.xlu1 %v3249_v18, %s7094_s17 }
 0x9f2   : > { %v3278_v6 = vpop.permute.xlu1 %3277 }
 0x9f3   : > { %v3323_v46 = vadd.f32 %v3278_v6, %v8326_v13  ;;  %3291 = vrot.lane.b32.xlu0 %v3250_v4, %s7094_s17 }
 0x9f4   : > { %v3280_v45 = vpop.permute.xlu0 %3279 }
 0x9f5   : > { %v7008_v16 = vpop.eup %7007  ;;  %7015 = vtanh.f32 %v3323_v46  ;;  %v3324_v42 = vadd.f32 %v3280_v45, %v8329_v60 }
 0x9f6   : > { %v7010_v59 = vpop.eup %7009  ;;  %7017 = vrcp.f32 %v3125_v43  ;;  %3385 = vrot.lane.b32.xlu1 %v7008_v16, %s7095_s20  ;;  %v3214_v38 = vpop.permute.xlu1 %3213 }
 0x9f7   : > { %v7012_v35 = vpop.eup %7011  ;;  %7019 = vtanh.f32 %v3324_v42  ;;  %v3251_v34 = vmul.f32 %v8435_v63, %v3214_v38  ;;  %v3128_v4 = vadd.f32 1.0, %v7010_v59 }
 0x9f8   : > { %v8440_v13 = vpop.eup %7013  ;;  %v3216_v18 = vpop.permute.xlu0 %3215  ;;  %3387 = vrot.lane.b32.xlu0 %v7012_v35, %s7095_s20  ;;  %7021 = vrcp.f32 %v3126_v31 }
 0x9f9   : > { %v3252_v40 = vmul.f32 %v8440_v13, %v3216_v18  ;;  %7023 = vrcp.f32 %v3127_v33 }
 0x9fa   : > { %3293 = vrot.lane.b32.xlu1 %v3251_v34, %s7094_s17  ;;  %v3282_v60 = vpop.permute.xlu1 %3281  ;;  %7025 = vrcp.f32 %v3128_v4 }
 0x9fb   : > { %v3325_v43 = vadd.f32 %v3282_v60, %v8332_v26 }
 0x9fc   : > { %v3284_v28 = vpop.permute.xlu0 %3283  ;;  %3295 = vrot.lane.b32.xlu0 %v3252_v40, %s7094_s17 }
 0x9fd   : > { %v3326_v45 = vadd.f32 %v3284_v28, %v8335_v0  ;;  %7027 = vtanh.f32 %v3325_v43 }
 0x9fe   : > { %v3218_v6 = vpop.permute.xlu1 %3217 }
 0x9ff   : > { %v7016_v46 = vpop.eup %7015  ;;  %7029 = vtanh.f32 %v3326_v45 }
 0xa00   : > { %v8447_v54 = vpop.eup %7017  ;;  %v3220_v16 = vpop.permute.xlu0 %3219  ;;  %3389 = vrot.lane.b32.xlu1 %v7016_v46, %s7095_s20 }
 0xa01   : > { %v7020_v31 = vpop.eup %7019  ;;  %v3253_v42 = vmul.f32 %v8447_v54, %v3218_v6 }
 0xa02   : > { %3391 = vrot.lane.b32.xlu0 %v7020_v31, %s7095_s20  ;;  %v3286_v59 = vpop.permute.xlu1 %3285  ;;  %v8453_v38 = vpop.eup %7021 }
 0xa03   : > { %v3327_v26 = vadd.f32 %v3286_v59, %v8338_v30  ;;  %v3254_v35 = vmul.f32 %v8453_v38, %v3220_v16  ;;  %v8459_v33 = vpop.eup %7023 }
 0xa04   : > { %v3288_v34 = vpop.permute.xlu0 %3287  ;;  %3297 = vrot.lane.b32.xlu1 %v3253_v42, %s7094_s17  ;;  %v8463_v4 = vpop.eup %7025 }
 0xa05   : > { %7031 = vtanh.f32 %v3327_v26  ;;  %v3328_v0 = vadd.f32 %v3288_v34, %v8341_v9  ;;  %v3451_v34 = vmul.f32 %v8359_v55, %v8202_v10 }
 0xa06   : > { %3299 = vrot.lane.b32.xlu0 %v3254_v35, %s7094_s17  ;;  %v3222_v18 = vpop.permute.xlu1 %3221  ;;  %v3353_v35 = vsub.f32 1.0, %v8344_v7 }
 0xa07   : > { %7033 = vtanh.f32 %v3328_v0  ;;  %v3255_v40 = vmul.f32 %v8459_v33, %v3222_v18  ;;  %v7028_v28 = vpop.eup %7027 }
 0xa08   : > { %v3224_v30 = vpop.permute.xlu0 %3223 }
 0xa09   : > { %v3256_v60 = vmul.f32 %v8463_v4, %v3224_v30  ;;  %3301 = vrot.lane.b32.xlu1 %v3255_v40, %s7094_s17  ;;  %v7030_v9 = vpop.eup %7029 }
 0xa0b   : > { %3303 = vrot.lane.b32.xlu0 %v3256_v60, %s7094_s17  ;;  %s8509_s17 = scalar_lea.vmem %s9116_s1, %s5494_s10 }
 0xa0c   : > { %v3691_v18 = vld [vmem:[%s8509_s17] sm:$0xff]  ;;  %v3692_v30 = vld [vmem:[%s8509_s17 + $0x8] sm:$0xff] }
 0xa0d   : > { %3393 = vrot.lane.b32.xlu1 %v7028_v28, %s7095_s20  ;;  %6200 = vmatprep.mubr.msk.f32.mxu1 %vm3705_vm6, %v3691_v18 }
 0xa0f   : > { %v7032_v43 = vpop.eup %7031  ;;  %3395 = vrot.lane.b32.xlu0 %v7030_v9, %s7095_s20 }
 0xa11   : > { %v7034_v6 = vpop.eup %7033  ;;  %3397 = vrot.lane.b32.xlu1 %v7032_v43, %s7095_s20  ;;  %v3356_v43 = vsub.f32 1.0, %v8363_v1 }
 0xa13   : > { %3399 = vrot.lane.b32.xlu0 %v7034_v6, %s7095_s20  ;;  %v3693_v6 = vld [vmem:[%s8509_s17 + $0x10] sm:$0xff] }
 0xa15   : > { %1432 = vrot.lane.b32.xlu1 %v7521_v50, %s7095_s20 }
 0xa17   : > { %2814 = vrot.lane.b32.xlu0 %v8194_v29, %s7095_s20 }
 0xa19   : > { %1434 = vrot.lane.b32.xlu1 %v7523_v61, %s7095_s20 }
 0xa1b   : > { %2816 = vrot.lane.b32.xlu0 %v8189_v39, %s7095_s20 }
 0xa1d   : > { %2131 = vrot.lane.b32.xlu1 %v7896_v58, %s7095_s20 }
 0xa21   : > { %2133 = vrot.lane.b32.xlu1 %v7891_v22, %s7095_s20 }
 0xa25   : > { %1436 = vrot.lane.b32.xlu1 %v7530_v5, %s7095_s20  ;;  %v3699_v5 = vld [vmem:[%s9120_s5] sm:$0xff] }
 0xa29   : > { %1438 = vrot.lane.b32.xlu1 %v7532_v36, %s7095_s20  ;;  %v3700_v36 = vld [vmem:[%s9120_s5 + $0x8] sm:$0x7f] }
 0xa63   : > { %v3290_v50 = vpop.permute.xlu1 %3289 }
 0xa64   : > { %v3329_v46 = vadd.f32 %v3290_v50, %v8398_v56  ;;  %v6460_v56 = vpack.c.bf16 %v3700_v36, %v3699_v5  ;;  %v3696_v5 = vld [vmem:[%s8509_s17 + $0x28] sm:$0xff] }
 0xa65   : > { %v3292_v45 = vpop.permute.xlu0 %3291 }
 0xa66   : > { %7035 = vtanh.f32 %v3329_v46  ;;  %v3330_v61 = vadd.f32 %v3292_v45, %v8401_v44  ;;  %6462 = vmatprep.subr.msk.bf16.mxu1 %vm6461_vm5, %v6460_v56  ;;  %v3694_v45 = vld [vmem:[%s8509_s17 + $0x18] sm:$0xff] }
 0xa67   : > { %6465 = vmatpush3.bf16.msk.msra.mxu1 %vm6461_vm5, %v6460_v56 }
 0xa68   : > { %7037 = vtanh.f32 %v3330_v61  ;;  %v3386_v16 = vpop.permute.xlu1 %3385 }
 0xa69   : > { %v3433_v60 = vmul.f32 %v3386_v16, %v3353_v35 }
 0xa6a   : > { %v3388_v31 = vpop.permute.xlu0 %3387  ;;  %6201 = vmatmul.mubr.msk.f32.vlgmr.msra.gmra.mrb[32].mxu1 %vm3705_vm6, %v3692_v30 }
 0xa6b   : > { %6203 = vmatprep.mubr.msk.f32.mxu1 %vm3705_vm6, %v3693_v6 }
 0xa6c   : > { %v3294_v58 = vpop.permute.xlu1 %3293 }
 0xa6d   : > { %v3331_v22 = vadd.f32 %v3294_v58, %v8404_v62  ;;  %v3355_v62 = vsub.f32 1.0, %v8359_v55  ;;  %v3449_v55 = vmul.f32 %v8344_v7, %v8194_v29  ;;  %v3354_v29 = vsub.f32 1.0, %v8347_v53 }
 0xa6e   : > { %v3296_v42 = vpop.permute.xlu0 %3295  ;;  %6204 = vmatmul.mubr.msk.f32.gmra.mrb[34].mxu1 %vm3705_vm6, %v3694_v45  ;;  %v3452_v7 = vmul.f32 %v8363_v1, %v8198_v11  ;;  %v3450_v1 = vmul.f32 %v8347_v53, %v8189_v39  ;;  %v3850_v53 = vld [vmem:[%s9119_s4 + $0x18] sm:$0xff] }
 0xa6f   : > { %7039 = vtanh.f32 %v3331_v22  ;;  %v3332_v50 = vadd.f32 %v3296_v42, %v8408_v57  ;;  %v3465_v16 = vadd.f32 %v3449_v55, %v3433_v60  ;;  %v3695_v22 = vld [vmem:[%s8509_s17 + $0x20] sm:$0xff]  ;;  %v3434_v36 = vmul.f32 %v3388_v31, %v3354_v29  ;;  %v3697_v42 = vld [vmem:[%s8509_s17 + $0x30] sm:$0xff]  ;;  %v3698_v31 = vld [vmem:[%s8509_s17 + $0x38] sm:$0xff] }
 0xa70   : > { %v7036_v44 = vpop.eup %7035  ;;  %6206 = vmatprep.mubr.msk.f32.mxu1 %vm3705_vm6, %v3695_v22  ;;  %v9185_v60 = vld [vmem:[#allocation4_spill] sm:$0xff]  ;;  %v3358_v22 = vsub.f32 1.0, %v8377_v12 }
 0xa71   : > { %3401 = vrot.lane.b32.xlu1 %v7036_v44, %s7095_s20  ;;  %7041 = vtanh.f32 %v3332_v50 }
 0xa72   : > { %v7038_v59 = vpop.eup %7037  ;;  %v3390_v26 = vpop.permute.xlu1 %3389  ;;  %6207 = vmatmul.mubr.msk.f32.gmra.mrb[36].mxu1 %vm3705_vm6, %v3696_v5 }
 0xa73   : > { %v3435_v0 = vmul.f32 %v3390_v26, %v3355_v62  ;;  %3403 = vrot.lane.b32.xlu0 %v7038_v59, %s7095_s20  ;;  %6209 = vmatprep.mubr.msk.f32.mxu1 %vm3705_vm6, %v3697_v42  ;;  %v3847_v26 = vld [vmem:[%s9119_s4] sm:$0xff] }
 0xa74   : > { %v3392_v40 = vpop.permute.xlu0 %3391 }
 0xa75   : > { %v3467_v28 = vadd.f32 %v3451_v34, %v3435_v0  ;;  %v3436_v58 = vmul.f32 %v3392_v40, %v3356_v43  ;;  %v3466_v34 = vadd.f32 %v3450_v1, %v3434_v36 }
 0xa76   : > { %v3298_v9 = vpop.permute.xlu1 %3297  ;;  %6210 = vmatmul.mubr.msk.f32.gmra.mrb[38].mxu1 %vm3705_vm6, %v3698_v31 }
 0xa77   : > { %3501 = vrot.lane.b32.xlu0 %v3467_v28, %s7095_s20  ;;  %v3468_v56 = vadd.f32 %v3452_v7, %v3436_v58  ;;  %v3333_v62 = vadd.f32 %v3298_v9, %v8412_v2  ;;  %v3849_v2 = vld [vmem:[%s9119_s4 + $0x10] sm:$0xff]  ;;  %v3357_v58 = vsub.f32 1.0, %v8373_v17 }
 0xa78   : > { %v3300_v46 = vpop.permute.xlu0 %3299 }
 0xa79   : > { %v7040_v61 = vpop.eup %7039  ;;  %7043 = vtanh.f32 %v3333_v62  ;;  %v3334_v18 = vadd.f32 %v3300_v46, %v8415_v24  ;;  %v9186_v24 = vld [vmem:[#allocation5_spill] sm:$0xff]  ;;  %v5671_v46 = vld [vmem:[%s9119_s4 + $0x20] sm:$0xff]  ;;  %v9188_v62 = vld [vmem:[#allocation7_spill] sm:$0xff] }
 0xa7a   : > { %3405 = vrot.lane.b32.xlu1 %v7040_v61, %s7095_s20 }
 0xa7b   : > { %3497 = vrot.lane.b32.xlu0 %v3465_v16, %s7095_s20  ;;  %v3302_v57 = vpop.permute.xlu1 %3301  ;;  %v7042_v30 = vpop.eup %7041  ;;  %7045 = vtanh.f32 %v3334_v18  ;;  %v9200_v18 = vld [vmem:[#allocation14_spill] sm:$0xff] }
 0xa7d   : > { %v8536_v44 = vpop.permute.xlu0 %3303 }
 0xa7e   : > { %2135 = vrot.lane.b32.xlu1 %v7904_v41, %s7095_s20  ;;  %v3848_v41 = vld [vmem:[%s9119_s4 + $0x8] sm:$0xff] }
 0xa7f   : > { %3503 = vrot.lane.b32.xlu0 %v3468_v56, %s7095_s20  ;;  %v3394_v59 = vpop.permute.xlu1 %3393  ;;  %v6466_v35 = vpack.c.bf16 %v3848_v41, %v3847_v26 }
 0xa81   : > { %v8554_v0 = vpop.permute.xlu0 %3395  ;;  %6467 = vmatprep.subr.bf16.mxu1 %v6466_v35 }
 0xa82   : > { %2137 = vrot.lane.b32.xlu1 %v7900_v14, %s7095_s20  ;;  %6469 = vmatpush3.bf16.msra.mxu1 %v6466_v35  ;;  %v6470_v14 = vpack.c.bf16 %v3850_v53, %v3849_v2  ;;  %v3438_v1 = vmul.f32 %v8554_v0, %v3358_v22  ;;  %v3455_v35 = vmul.f32 %v8385_v3, %v8237_v51  ;;  %v9189_v0 = vld [vmem:[#allocation8_spill] sm:$0xff]  ;;  %v9198_v2 = vld [vmem:[#allocation18_spill] sm:$0xff]  ;;  %v9199_v53 = vld [vmem:[#allocation19_spill] sm:$0xff] }
 0xa83   : > { %3499 = vrot.lane.b32.xlu0 %v3466_v34, %s7095_s20  ;;  %v8560_v39 = vpop.permute.xlu1 %3397  ;;  %v7044_v43 = vpop.eup %7043  ;;  %v3360_v34 = vsub.f32 1.0, %v8389_v19 }
 0xa84   : > { %6471 = vmatprep.subr.bf16.mxu1 %v6470_v14 }
 0xa85   : > { %v8569_v40 = vpop.permute.xlu0 %3399  ;;  %v7046_v61 = vpop.eup %7045 }
 0xa86   : > { %1440 = vrot.lane.b32.xlu1 %v9185_v60, %s7095_s20  ;;  %6473 = vmatpush3.bf16.msra.mxu1 %v6470_v14  ;;  %v9201_v14 = vld [vmem:[#allocation15_spill] sm:$0xff] }
 0xa87   : > { %3407 = vrot.lane.b32.xlu0 %v7042_v30, %s7095_s20  ;;  %v1433_v28 = vpop.permute.xlu1 %1432 }
 0xa88   : > { %1481 = vst.msk [vmem:[#allocation3] sm:$0xff] %vm1480_vm2, %v1433_v28 }
 0xa89   : > { %v2815_v9 = vpop.permute.xlu0 %2814 }
 0xa8a   : > { %2863 = vst.msk [vmem:[#allocation3 + $0x100] sm:$0xff] %vm1480_vm2, %v2815_v9  ;;  %1442 = vrot.lane.b32.xlu1 %v9186_v24, %s7095_s20  ;;  %v3362_v9 = vsub.f32 1.0, %v8429_v49 }
 0xa8b   : > { %2818 = vrot.lane.b32.xlu0 %v8202_v10, %s7095_s20  ;;  %v1435_v55 = vpop.permute.xlu1 %1434  ;;  %v5672_v10 = vld [vmem:[%s9119_s4 + $0x28] sm:$0xff] }
 0xa8c   : > { %1482 = vst.msk [vmem:[#allocation3 + $0x8] sm:$0xff] %vm1480_vm2, %v1435_v55  ;;  %v8592_v45 = vpack.c.bf16 %v5672_v10, %v5671_v46 }
 0xa8d   : > { %v2817_v6 = vpop.permute.xlu0 %2816 }
 0xa8e   : > { %2864 = vst.msk [vmem:[#allocation3 + $0x108] sm:$0xff] %vm1480_vm2, %v2817_v6  ;;  %3409 = vrot.lane.b32.xlu1 %v7044_v43, %s7095_s20  ;;  %6475 = vmatprep.subr.bf16.mxu1 %v8592_v45  ;;  %v9202_v6 = vld [vmem:[#allocation20_spill] sm:$0xff] }
 0xa8f   : > { %2820 = vrot.lane.b32.xlu0 %v8198_v11, %s7095_s20  ;;  %v2132_v50 = vpop.permute.xlu1 %2131  ;;  %v3335_v11 = vadd.f32 %v3302_v57, %v8417_v20  ;;  %v3437_v20 = vmul.f32 %v3394_v59, %v3357_v58  ;;  %v9187_v57 = vld [vmem:[#allocation6_spill] sm:$0xff]  ;;  %v3336_v59 = vadd.f32 %v8536_v44, %v8421_v23  ;;  %v3456_v23 = vmul.f32 %v8389_v19, %v8234_v48  ;;  %v9193_v19 = vld [vmem:[#allocation11_spill] sm:$0xff] }
 0xa90   : > { %2180 = vst.msk [vmem:[#allocation3 + $0x80] sm:$0xff] %vm1480_vm2, %v2132_v50  ;;  %v9203_v50 = vld [vmem:[#allocation23_spill] sm:$0xff] }
 0xa91   : > { %7047 = vtanh.f32 %v3335_v11  ;;  %v3594_v29 = vld [vmem:[#allocation3 + $0x100] sm:$0xff]  ;;  %v3458_v46 = vmul.f32 %v8429_v49, %v9203_v50  ;;  %v3363_v11 = vsub.f32 1.0, %v8435_v63 }
 0xa92   : > { %2139 = vrot.lane.b32.xlu1 %v7922_v47, %s7095_s20  ;;  %7049 = vtanh.f32 %v3336_v59  ;;  %v9206_v59 = vld [vmem:[#allocation25_spill] sm:$0xff] }
 0xa93   : > { %3411 = vrot.lane.b32.xlu0 %v7046_v61, %s7095_s20  ;;  %v2134_v16 = vpop.permute.xlu1 %2133 }
 0xa94   : > { %2181 = vst.msk [vmem:[#allocation3 + $0x88] sm:$0xff] %vm1480_vm2, %v2134_v16 }
 0xa95   : > { %v3595_v5 = vld [vmem:[#allocation3 + $0x108] sm:$0xff] }
 0xa96   : > { %2141 = vrot.lane.b32.xlu1 %v7924_v52, %s7095_s20  ;;  %v3453_v52 = vmul.f32 %v8373_v17, %v8220_v25  ;;  %v3359_v17 = vsub.f32 1.0, %v8385_v3 }
 0xa97   : > { %v3578_v7 = vld [vmem:[#allocation3 + $0x80] sm:$0xff]  ;;  %2822 = vrot.lane.b32.xlu0 %v8220_v25, %s7095_s20  ;;  %v1437_v47 = vpop.permute.xlu1 %1436  ;;  %v3454_v25 = vmul.f32 %v8377_v12, %v8222_v15  ;;  %v3440_v12 = vmul.f32 %v8569_v40, %v3360_v34  ;;  %v3361_v40 = vsub.f32 1.0, %v8426_v21  ;;  %v3563_v34 = vld [vmem:[#allocation3 + $0x8] sm:$0xff] }
 0xa98   : > { %3643 = vst.msk [vmem:[#allocation3 + $0x80] sm:$0xff] %vm3626_vm7, %v3594_v29  ;;  %3659 = vst.msk [vmem:[#allocation3 + $0x100] sm:$0xff] %vm3626_vm7, %v3578_v7  ;;  %v3469_v42 = vadd.f32 %v3453_v52, %v3437_v20  ;;  %v3439_v41 = vmul.f32 %v8560_v39, %v3359_v17  ;;  %v9190_v39 = vld [vmem:[#allocation9_spill] sm:$0xff]  ;;  %v9205_v7 = vld [vmem:[#allocation24_spill] sm:$0xff] }
 0xa99   : > { %1483 = vst.msk [vmem:[#allocation3 + $0x10] sm:$0xff] %vm1480_vm2, %v1437_v47  ;;  %v3470_v26 = vadd.f32 %v3454_v25, %v3438_v1  ;;  %v3472_v44 = vadd.f32 %v3456_v23, %v3440_v12  ;;  %v3459_v49 = vmul.f32 %v8435_v63, %v9205_v7  ;;  %v3562_v63 = vld [vmem:[#allocation3] sm:$0xff]  ;;  %v3364_v1 = vsub.f32 1.0, %v8440_v13 }
 0xa9a   : > { %1444 = vrot.lane.b32.xlu1 %v9187_v57, %s7095_s20 }
 0xa9b   : > { %v3579_v36 = vld [vmem:[#allocation3 + $0x88] sm:$0xff]  ;;  %2824 = vrot.lane.b32.xlu0 %v8222_v15, %s7095_s20  ;;  %v1439_v56 = vpop.permute.xlu1 %1438  ;;  %v7048_v31 = vpop.eup %7047  ;;  %v3471_v15 = vadd.f32 %v3455_v35, %v3439_v41 }
 0xa9c   : > { %3644 = vst.msk [vmem:[#allocation3 + $0x88] sm:$0xff] %vm3626_vm7, %v3595_v5  ;;  %3660 = vst.msk [vmem:[#allocation3 + $0x108] sm:$0xff] %vm3626_vm7, %v3579_v36  ;;  %v7050_v3 = vpop.eup %7049 }
 0xa9d   : > { %1484 = vst.msk [vmem:[#allocation3 + $0x18] sm:$0xff] %vm1480_vm2, %v1439_v56 }
 0xa9e   : > { %1446 = vrot.lane.b32.xlu1 %v9188_v62, %s7095_s20 }
 0xa9f   : > { %3505 = vrot.lane.b32.xlu0 %v3469_v42, %s7095_s20 }
 0xaa0   : > { %v3564_v20 = vld [vmem:[#allocation3 + $0x10] sm:$0xff] }
 0xaa2   : > { %3413 = vrot.lane.b32.xlu1 %v7048_v31, %s7095_s20  ;;  %v3460_v31 = vmul.f32 %v8440_v13, %v9206_v59 }
 0xaa3   : > { %3507 = vrot.lane.b32.xlu0 %v3470_v26, %s7095_s20 }
 0xaa4   : > { %v3565_v62 = vld [vmem:[#allocation3 + $0x18] sm:$0xff] }
 0xaa6   : > { %2143 = vrot.lane.b32.xlu1 %v7939_v27, %s7095_s20  ;;  %v9192_v27 = vld [vmem:[#allocation10_spill] sm:$0xff] }
 0xaa7   : > { %3509 = vrot.lane.b32.xlu0 %v3471_v15, %s7095_s20 }
 0xaaa   : > { %2145 = vrot.lane.b32.xlu1 %v7936_v8, %s7095_s20  ;;  %v9191_v8 = vld [vmem:[#allocation22_spill] sm:$0xff] }
 0xaab   : > { %3511 = vrot.lane.b32.xlu0 %v3472_v44, %s7095_s20  ;;  %v3457_v60 = vmul.f32 %v8426_v21, %v9191_v8  ;;  %v9204_v21 = vld [vmem:[#allocation21_spill] sm:$0xff] }
 0xaae   : > { %1448 = vrot.lane.b32.xlu1 %v9189_v0, %s7095_s20  ;;  %v5674_v0 = vld [vmem:[%s9119_s4 + $0x38] sm:$0xff] }
 0xaaf   : > { %3415 = vrot.lane.b32.xlu0 %v7050_v3, %s7095_s20  ;;  %v5673_v3 = vld [vmem:[%s9119_s4 + $0x30] sm:$0xff] }
 0xab2   : > { %1450 = vrot.lane.b32.xlu1 %v9190_v39, %s7095_s20 }
 0xab3   : > { %2826 = vrot.lane.b32.xlu0 %v8237_v51, %s7095_s20  ;;  %v9194_v51 = vld [vmem:[#allocation16_spill] sm:$0xff] }
 0xab6   : > { %2147 = vrot.lane.b32.xlu1 %v7953_v32, %s7095_s20  ;;  %v9195_v32 = vld [vmem:[#allocation17_spill] sm:$0xff] }
 0xab7   : > { %2828 = vrot.lane.b32.xlu0 %v8234_v48, %s7095_s20  ;;  %v9196_v48 = vld [vmem:[#allocation12_spill] sm:$0xff] }
 0xaba   : > { %2149 = vrot.lane.b32.xlu1 %v7955_v37, %s7095_s20  ;;  %v9197_v37 = vld [vmem:[#allocation13_spill] sm:$0xff] }
 0xabb   : > { %2830 = vrot.lane.b32.xlu0 %v9191_v8, %s7095_s20  ;;  %v6478_v8 = vpack.c.bf16 %v5674_v0, %v5673_v3 }
 0xabe   : > { %1452 = vrot.lane.b32.xlu1 %v9192_v27, %s7095_s20  ;;  %v5683_v27 = vld [vmem:[%s9119_s4 + $0x40] sm:$0xff] }
 0xac2   : > { %1454 = vrot.lane.b32.xlu1 %v9193_v19, %s7095_s20  ;;  %v5684_v19 = vld [vmem:[%s9119_s4 + $0x48] sm:$0xff] }
 0xac6   : > { %2151 = vrot.lane.b32.xlu1 %v9194_v51, %s7095_s20 }
 0xaca   : > { %2153 = vrot.lane.b32.xlu1 %v9195_v32, %s7095_s20 }
 0xace   : > { %1456 = vrot.lane.b32.xlu1 %v9196_v48, %s7095_s20 }
 0xad2   : > { %1458 = vrot.lane.b32.xlu1 %v9197_v37, %s7095_s20 }
 0xad6   : > { %2155 = vrot.lane.b32.xlu1 %v9198_v2, %s7095_s20  ;;  %v3365_v2 = vsub.f32 1.0, %v8447_v54 }
 0xada   : > { %2157 = vrot.lane.b32.xlu1 %v9199_v53, %s7095_s20  ;;  %v3841_v53 = vld [vmem:[#allocation3 + $0x80] sm:$0xff] }
 0xade   : > { %1460 = vrot.lane.b32.xlu1 %v9200_v18, %s7095_s20 }
 0xae2   : > { %1462 = vrot.lane.b32.xlu1 %v9201_v14, %s7095_s20 }
 0xae3   : > { %v3402_v30 = vpop.permute.xlu1 %3401 }
 0xae4   : > { %v3441_v28 = vmul.f32 %v3402_v30, %v3361_v40  ;;  %v8741_v40 = vpack.c.bf16 %v5684_v19, %v5683_v27  ;;  %v3368_v19 = vsub.f32 1.0, %v8463_v4 }
 0xae5   : > { %v3404_v24 = vpop.permute.xlu0 %3403 }
 0xae6   : > { %v3473_v55 = vadd.f32 %v3457_v60, %v3441_v28  ;;  %v3442_v43 = vmul.f32 %v3404_v24, %v3362_v9  ;;  %2159 = vrot.lane.b32.xlu1 %v9202_v6, %s7095_s20  ;;  %v3842_v9 = vld [vmem:[#allocation3 + $0x88] sm:$0xff]  ;;  %v9207_v24 = vld [vmem:[#allocation26_spill] sm:$0xff] }
 0xae8   : > { %3513 = vrot.lane.b32.xlu0 %v3473_v55, %s7095_s20  ;;  %v3474_v61 = vadd.f32 %v3458_v46, %v3442_v43  ;;  %v3461_v55 = vmul.f32 %v8447_v54, %v9207_v24  ;;  %v3843_v43 = vld [vmem:[#allocation3 + $0x100] sm:$0xff] }
 0xae9   : > { %v3502_v10 = vpop.permute.xlu0 %3501 }
 0xaea   : > { %3548 = vst.msk [vmem:[#allocation3 + $0x190] sm:$0xff] %vm1480_vm2, %v3502_v10  ;;  %2161 = vrot.lane.b32.xlu1 %v9204_v21, %s7095_s20  ;;  %v3844_v10 = vld [vmem:[#allocation3 + $0x108] sm:$0xff] }
 0xaec   : > { %3515 = vrot.lane.b32.xlu0 %v3474_v61, %s7095_s20  ;;  %v3406_v16 = vpop.permute.xlu1 %3405  ;;  %v9208_v61 = vld [vmem:[#allocation27_spill] sm:$0xff] }
 0xaed   : > { %v3498_v58 = vpop.permute.xlu0 %3497  ;;  %v3443_v29 = vmul.f32 %v3406_v16, %v3363_v11  ;;  %v3462_v21 = vmul.f32 %v8453_v38, %v9208_v61 }
 0xaee   : > { %3546 = vst.msk [vmem:[#allocation3 + $0x180] sm:$0xff] %vm1480_vm2, %v3498_v58 }
 0xaef   : > { %v3475_v22 = vadd.f32 %v3459_v49, %v3443_v29  ;;  %v5685_v29 = vld [vmem:[%s9119_s4 + $0x50] sm:$0xff] }
 0xaf0   : > { %2832 = vrot.lane.b32.xlu0 %v9203_v50, %s7095_s20  ;;  %v2136_v47 = vpop.permute.xlu1 %2135 }
 0xaf1   : > { %v3612_v57 = vld [vmem:[#allocation3 + $0x190] sm:$0xff]  ;;  %2182 = vst.msk [vmem:[#allocation3 + $0x90] sm:$0xff] %vm1480_vm2, %v2136_v47  ;;  %v3504_v52 = vpop.permute.xlu0 %3503 }
 0xaf2   : > { %3629 = vst.msk [vmem:[#allocation3 + $0x10] sm:$0xff] %vm3626_vm7, %v3612_v57  ;;  %3677 = vst.msk [vmem:[#allocation3 + $0x190] sm:$0xff] %vm3626_vm7, %v3564_v20 }
 0xaf3   : > { %3549 = vst.msk [vmem:[#allocation3 + $0x198] sm:$0xff] %vm1480_vm2, %v3504_v52  ;;  %v3367_v52 = vsub.f32 1.0, %v8459_v33 }
 0xaf4   : > { %3517 = vrot.lane.b32.xlu0 %v3475_v22, %s7095_s20  ;;  %v2138_v5 = vpop.permute.xlu1 %2137 }
 0xaf5   : > { %v3610_v36 = vld [vmem:[#allocation3 + $0x180] sm:$0xff]  ;;  %2183 = vst.msk [vmem:[#allocation3 + $0x98] sm:$0xff] %vm1480_vm2, %v2138_v5  ;;  %v3500_v56 = vpop.permute.xlu0 %3499 }
 0xaf6   : > { %3627 = vst.msk [vmem:[#allocation3] sm:$0xff] %vm3626_vm7, %v3610_v36  ;;  %3675 = vst.msk [vmem:[#allocation3 + $0x180] sm:$0xff] %vm3626_vm7, %v3562_v63  ;;  %v5695_v63 = vld [vmem:[%s9119_s4 + $0x60] sm:$0xff]  ;;  %v5696_v36 = vld [vmem:[%s9119_s4 + $0x68] sm:$0xff] }
 0xaf7   : > { %3547 = vst.msk [vmem:[#allocation3 + $0x188] sm:$0xff] %vm1480_vm2, %v3500_v56 }
 0xaf8   : > { %v1441_v42 = vpop.permute.xlu1 %1440  ;;  %v3580_v51 = vld [vmem:[#allocation3 + $0x90] sm:$0xff] }
 0xaf9   : > { %1485 = vst.msk [vmem:[#allocation3 + $0x20] sm:$0xff] %vm1480_vm2, %v1441_v42  ;;  %v3408_v17 = vpop.permute.xlu0 %3407  ;;  %v3988_v57 = vld [vmem:[#allocation3 + $0x10] sm:$0xff] }
 0xafa   : > { %v3613_v25 = vld [vmem:[#allocation3 + $0x198] sm:$0xff]  ;;  %v3444_v26 = vmul.f32 %v3408_v17, %v3364_v1  ;;  %v9209_v1 = vld [vmem:[#allocation28_spill] sm:$0xff] }
 0xafb   : > { %3630 = vst.msk [vmem:[#allocation3 + $0x18] sm:$0xff] %vm3626_vm7, %v3613_v25  ;;  %3678 = vst.msk [vmem:[#allocation3 + $0x198] sm:$0xff] %vm3626_vm7, %v3565_v62  ;;  %v3463_v62 = vmul.f32 %v8459_v33, %v9209_v1 }
 0xafc   : > { %v3476_v41 = vadd.f32 %v3460_v31, %v3444_v26  ;;  %v1443_v35 = vpop.permute.xlu1 %1442  ;;  %v3581_v30 = vld [vmem:[#allocation3 + $0x98] sm:$0xff] }
 0xafd   : > { %1486 = vst.msk [vmem:[#allocation3 + $0x28] sm:$0xff] %vm1480_vm2, %v1443_v35  ;;  %v2819_v12 = vpop.permute.xlu0 %2818  ;;  %v3839_v23 = vld [vmem:[#allocation3] sm:$0xff] }
 0xafe   : > { %v3611_v15 = vld [vmem:[#allocation3 + $0x188] sm:$0xff]  ;;  %2865 = vst.msk [vmem:[#allocation3 + $0x110] sm:$0xff] %vm1480_vm2, %v2819_v12  ;;  %6220 = vmatprep.mubr.msk.f32.mxu1 %vm1480_vm2, %v3839_v23  ;;  %3519 = vrot.lane.b32.xlu0 %v3476_v41, %s7095_s20  ;;  %v3845_v11 = vld [vmem:[#allocation3 + $0x180] sm:$0xff]  ;;  %v6490_v41 = vpack.c.bf16 %v5696_v36, %v5695_v63 }
 0xaff   : > { %3628 = vst.msk [vmem:[#allocation3 + $0x8] sm:$0xff] %vm3626_vm7, %v3611_v15  ;;  %3676 = vst.msk [vmem:[#allocation3 + $0x188] sm:$0xff] %vm3626_vm7, %v3563_v34 }
 0xb00   : > { %v3410_v13 = vpop.permute.xlu1 %3409  ;;  %v3566_v35 = vld [vmem:[#allocation3 + $0x20] sm:$0xff] }
 0xb01   : > { %v2821_v44 = vpop.permute.xlu0 %2820  ;;  %v3445_v18 = vmul.f32 %v3410_v13, %v3365_v2 }
 0xb02   : > { %2866 = vst.msk [vmem:[#allocation3 + $0x118] sm:$0xff] %vm1480_vm2, %v2821_v44  ;;  %2834 = vrot.lane.b32.xlu0 %v9205_v7, %s7095_s20  ;;  %v5686_v7 = vld [vmem:[%s9119_s4 + $0x58] sm:$0xff] }
 0xb03   : > { %v3477_v6 = vadd.f32 %v3461_v55, %v3445_v18  ;;  %v6486_v5 = vpack.c.bf16 %v5686_v7, %v5685_v29  ;;  %v5708_v55 = vld [vmem:[%s9119_s4 + $0x88] sm:$0xff] }
 0xb04   : > { %v2140_v39 = vpop.permute.xlu1 %2139  ;;  %v3567_v44 = vld [vmem:[#allocation3 + $0x28] sm:$0xff] }
 0xb05   : > { %v3596_v32 = vld [vmem:[#allocation3 + $0x110] sm:$0xff]  ;;  %2184 = vst.msk [vmem:[#allocation3 + $0xa0] sm:$0xff] %vm1480_vm2, %v2140_v39  ;;  %v3412_v48 = vpop.permute.xlu0 %3411 }
 0xb06   : > { %v3840_v37 = vld [vmem:[#allocation3 + $0x8] sm:$0xff]  ;;  %3645 = vst.msk [vmem:[#allocation3 + $0x90] sm:$0xff] %vm3626_vm7, %v3596_v32  ;;  %3661 = vst.msk [vmem:[#allocation3 + $0x110] sm:$0xff] %vm3626_vm7, %v3580_v51  ;;  %2836 = vrot.lane.b32.xlu0 %v9206_v59, %s7095_s20  ;;  %v3989_v59 = vld [vmem:[#allocation3 + $0x18] sm:$0xff] }
 0xb07   : > { %6221 = vmatmul.mubr.msk.f32.vlgmr.msra.gmra.mrb[32].mxu1 %vm1480_vm2, %v3840_v37  ;;  %v3846_v20 = vld [vmem:[#allocation3 + $0x188] sm:$0xff]  ;;  %v3995_v51 = vld [vmem:[#allocation3 + $0x198] sm:$0xff]  ;;  %v5697_v32 = vld [vmem:[%s9119_s4 + $0x70] sm:$0xff] }
 0xb08   : > { %6223 = vmatprep.mubr.msk.f32.mxu1 %vm1480_vm2, %v3841_v53  ;;  %6477 = vmatpush3.bf16.msra.mxu1 %v8592_v45  ;;  %v2142_v14 = vpop.permute.xlu1 %2141  ;;  %v3366_v45 = vsub.f32 1.0, %v8453_v38 }
 0xb09   : > { %6479 = vmatprep.subr.bf16.mxu1 %v6478_v8  ;;  %v3597_v60 = vld [vmem:[#allocation3 + $0x118] sm:$0xff]  ;;  %2185 = vst.msk [vmem:[#allocation3 + $0xa8] sm:$0xff] %vm1480_vm2, %v2142_v14  ;;  %v2823_v28 = vpop.permute.xlu0 %2822  ;;  %v9210_v14 = vld [vmem:[#allocation29_spill] sm:$0xff] }
 0xb0a   : > { %3646 = vst.msk [vmem:[#allocation3 + $0x98] sm:$0xff] %vm3626_vm7, %v3597_v60  ;;  %3662 = vst.msk [vmem:[#allocation3 + $0x118] sm:$0xff] %vm3626_vm7, %v3581_v30  ;;  %2838 = vrot.lane.b32.xlu0 %v9207_v24, %s7095_s20  ;;  %v3446_v50 = vmul.f32 %v3412_v48, %v3366_v45  ;;  %v5698_v48 = vld [vmem:[%s9119_s4 + $0x78] sm:$0xff]  ;;  %v5707_v24 = vld [vmem:[%s9119_s4 + $0x80] sm:$0xff] }
 0xb0b   : > { %2867 = vst.msk [vmem:[#allocation3 + $0x120] sm:$0xff] %vm1480_vm2, %v2823_v28  ;;  %6224 = vmatmul.mubr.msk.f32.gmra.mrb[34].mxu1 %vm1480_vm2, %v3842_v9  ;;  %v6494_v9 = vpack.c.bf16 %v5698_v48, %v5697_v32  ;;  %v5073_v32 = vld [vmem:[%s9121_s6 + $0x38] sm:$0xff] }
 0xb0c   : > { %6226 = vmatprep.mubr.msk.f32.mxu1 %vm1480_vm2, %v3843_v43  ;;  %6481 = vmatpush3.bf16.msra.mxu1 %v6478_v8  ;;  %v1445_v54 = vpop.permute.xlu1 %1444  ;;  %v3478_v16 = vadd.f32 %v3462_v21, %v3446_v50  ;;  %v3582_v38 = vld [vmem:[#allocation3 + $0xa0] sm:$0xff]  ;;  %v3994_v8 = vld [vmem:[#allocation3 + $0x190] sm:$0xff] }
 0xb0d   : > { %6483 = vmatprep.subr.bf16.mxu1 %v8741_v40  ;;  %1487 = vst.msk [vmem:[#allocation3 + $0x30] sm:$0xff] %vm1480_vm2, %v1445_v54  ;;  %v2825_v46 = vpop.permute.xlu0 %2824  ;;  %v3990_v31 = vld [vmem:[#allocation3 + $0x90] sm:$0xff] }
 0xb0e   : > { %2868 = vst.msk [vmem:[#allocation3 + $0x128] sm:$0xff] %vm1480_vm2, %v2825_v46  ;;  %3521 = vrot.lane.b32.xlu0 %v3477_v6, %s7095_s20  ;;  %v3992_v23 = vld [vmem:[#allocation3 + $0x110] sm:$0xff]  ;;  %v6498_v46 = vpack.c.bf16 %v5708_v55, %v5707_v24 }
 0xb0f   : > { %6227 = vmatmul.mubr.msk.f32.gmra.mrb[36].mxu1 %vm1480_vm2, %v3844_v10 }
 0xb10   : > { %6229 = vmatprep.mubr.msk.f32.mxu1 %vm1480_vm2, %v3845_v11  ;;  %v1447_v58 = vpop.permute.xlu1 %1446  ;;  %v3583_v56 = vld [vmem:[#allocation3 + $0xa8] sm:$0xff] }
 0xb11   : > { %1488 = vst.msk [vmem:[#allocation3 + $0x38] sm:$0xff] %vm1480_vm2, %v1447_v58  ;;  %v3506_v47 = vpop.permute.xlu0 %3505  ;;  %v3991_v12 = vld [vmem:[#allocation3 + $0x98] sm:$0xff] }
 0xb12   : > { %v3598_v49 = vld [vmem:[#allocation3 + $0x120] sm:$0xff]  ;;  %3550 = vst.msk [vmem:[#allocation3 + $0x1a0] sm:$0xff] %vm1480_vm2, %v3506_v47  ;;  %3523 = vrot.lane.b32.xlu0 %v3478_v16, %s7095_s20  ;;  %v3993_v39 = vld [vmem:[#allocation3 + $0x118] sm:$0xff]  ;;  %v5709_v47 = vld [vmem:[%s9119_s4 + $0x90] sm:$0xff] }
 0xb13   : > { %3647 = vst.msk [vmem:[#allocation3 + $0xa0] sm:$0xff] %vm3626_vm7, %v3598_v49  ;;  %3663 = vst.msk [vmem:[#allocation3 + $0x120] sm:$0xff] %vm3626_vm7, %v3582_v38  ;;  %6230 = vmatmul.mubr.msk.f32.gmra.mrb[38].mxu1 %vm1480_vm2, %v3846_v20  ;;  %v5710_v20 = vld [vmem:[%s9119_s4 + $0x98] sm:$0xff] }
 0xb14   : > { %6240 = vmatprep.mubr.msk.f32.mxu1 %vm1480_vm2, %v3988_v57  ;;  %v3414_v22 = vpop.permute.xlu1 %3413  ;;  %v3568_v37 = vld [vmem:[#allocation3 + $0x30] sm:$0xff] }
 0xb15   : > { %v3599_v42 = vld [vmem:[#allocation3 + $0x128] sm:$0xff]  ;;  %v3447_v25 = vmul.f32 %v3414_v22, %v3367_v52  ;;  %v3508_v17 = vpop.permute.xlu0 %3507 }
 0xb16   : > { %3648 = vst.msk [vmem:[#allocation3 + $0xa8] sm:$0xff] %vm3626_vm7, %v3599_v42  ;;  %3664 = vst.msk [vmem:[#allocation3 + $0x128] sm:$0xff] %vm3626_vm7, %v3583_v56  ;;  %2840 = vrot.lane.b32.xlu0 %v9208_v61, %s7095_s20  ;;  %v6502_v56 = vpack.c.bf16 %v5710_v20, %v5709_v47  ;;  %v5719_v42 = vld [vmem:[%s9119_s4 + $0xa0] sm:$0xff]  ;;  %v5732_v47 = vld [vmem:[%s9119_s4 + $0xc8] sm:$0xff] }
 0xb17   : > { %3551 = vst.msk [vmem:[#allocation3 + $0x1a8] sm:$0xff] %vm1480_vm2, %v3508_v17  ;;  %6241 = vmatmul.mubr.msk.f32.vlgmr.msra.gmra.mrb[32].mxu1 %vm1480_vm2, %v3989_v59  ;;  %v3479_v26 = vadd.f32 %v3463_v62, %v3447_v25 }
 0xb18   : > { %6243 = vmatprep.mubr.msk.f32.mxu1 %vm1480_vm2, %v3990_v31  ;;  %6485 = vmatpush3.bf16.msra.mxu1 %v8741_v40  ;;  %v2144_v33 = vpop.permute.xlu1 %2143  ;;  %v3464_v40 = vmul.f32 %v8463_v4, %v9210_v14  ;;  %v3569_v45 = vld [vmem:[#allocation3 + $0x38] sm:$0xff] }
 0xb19   : > { %6487 = vmatprep.subr.bf16.mxu1 %v6486_v5  ;;  %v3614_v34 = vld [vmem:[#allocation3 + $0x1a0] sm:$0xff]  ;;  %2186 = vst.msk [vmem:[#allocation3 + $0xb0] sm:$0xff] %vm1480_vm2, %v2144_v33  ;;  %v3510_v15 = vpop.permute.xlu0 %3509 }
 0xb1a   : > { %3631 = vst.msk [vmem:[#allocation3 + $0x20] sm:$0xff] %vm3626_vm7, %v3614_v34  ;;  %3679 = vst.msk [vmem:[#allocation3 + $0x1a0] sm:$0xff] %vm3626_vm7, %v3566_v35  ;;  %3525 = vrot.lane.b32.xlu0 %v3479_v26, %s7095_s20  ;;  %v4140_v50 = vld [vmem:[#allocation3 + $0xa0] sm:$0xff]  ;;  %v5067_v34 = vld [vmem:[%s9121_s6 + $0x8] sm:$0xff] }
 0xb1b   : > { %3552 = vst.msk [vmem:[#allocation3 + $0x1b0] sm:$0xff] %vm1480_vm2, %v3510_v15  ;;  %6244 = vmatmul.mubr.msk.f32.gmra.mrb[34].mxu1 %vm1480_vm2, %v3991_v12  ;;  %v4142_v21 = vld [vmem:[#allocation3 + $0x120] sm:$0xff]  ;;  %v5068_v15 = vld [vmem:[%s9121_s6 + $0x10] sm:$0xff] }
 0xb1c   : > { %6246 = vmatprep.mubr.msk.f32.mxu1 %vm1480_vm2, %v3992_v23  ;;  %6489 = vmatpush3.bf16.msra.mxu1 %v6486_v5  ;;  %v2146_v13 = vpop.permute.xlu1 %2145  ;;  %v5066_v35 = vld [vmem:[%s9121_s6] sm:$0xff]  ;;  %v5069_v23 = vld [vmem:[%s9121_s6 + $0x18] sm:$0xff] }
 0xb1d   : > { %6491 = vmatprep.subr.bf16.mxu1 %v6490_v41  ;;  %2187 = vst.msk [vmem:[#allocation3 + $0xb8] sm:$0xff] %vm1480_vm2, %v2146_v13  ;;  %v3512_v0 = vpop.permute.xlu0 %3511  ;;  %v4141_v61 = vld [vmem:[#allocation3 + $0xa8] sm:$0xff]  ;;  %v6530_v12 = vpack.c.bf16 %v5067_v34, %v5066_v35 }
 0xb1e   : > { %v3615_v3 = vld [vmem:[#allocation3 + $0x1a8] sm:$0xff]  ;;  %3553 = vst.msk [vmem:[#allocation3 + $0x1b8] sm:$0xff] %vm1480_vm2, %v3512_v0 }
 0xb1f   : > { %3632 = vst.msk [vmem:[#allocation3 + $0x28] sm:$0xff] %vm3626_vm7, %v3615_v3  ;;  %3680 = vst.msk [vmem:[#allocation3 + $0x1a8] sm:$0xff] %vm3626_vm7, %v3567_v44  ;;  %6247 = vmatmul.mubr.msk.f32.gmra.mrb[36].mxu1 %vm1480_vm2, %v3993_v39  ;;  %v4143_v7 = vld [vmem:[#allocation3 + $0x128] sm:$0xff]  ;;  %v6534_v44 = vpack.c.bf16 %v5069_v23, %v5068_v15  ;;  %v5070_v3 = vld [vmem:[%s9121_s6 + $0x20] sm:$0xff]  ;;  %6531 = vmatprep.subr.bf16.mxu0 %v6530_v12 }
 0xb20   : > { %6249 = vmatprep.mubr.msk.f32.mxu1 %vm1480_vm2, %v3994_v8  ;;  %v1449_v27 = vpop.permute.xlu1 %1448  ;;  %v3584_v16 = vld [vmem:[#allocation3 + $0xb0] sm:$0xff]  ;;  %v5071_v0 = vld [vmem:[%s9121_s6 + $0x28] sm:$0xff]  ;;  %6533 = vmatpush3.bf16.msra.mxu0 %v6530_v12  ;;  %v5734_v15 = vld [vmem:[%s9119_s4 + $0xd8] sm:$0xff] }
 0xb21   : > { %1489 = vst.msk [vmem:[#allocation3 + $0x40] sm:$0xff] %vm1480_vm2, %v1449_v27  ;;  %v3416_v53 = vpop.permute.xlu0 %3415  ;;  %v4138_v18 = vld [vmem:[#allocation3 + $0x20] sm:$0xff]  ;;  %6535 = vmatprep.subr.bf16.mxu0 %v6534_v44  ;;  %v6538_v27 = vpack.c.bf16 %v5071_v0, %v5070_v3 }
 0xb22   : > { %v3616_v2 = vld [vmem:[#allocation3 + $0x1b0] sm:$0xff]  ;;  %v3448_v30 = vmul.f32 %v3416_v53, %v3368_v19  ;;  %v4144_v38 = vld [vmem:[#allocation3 + $0x1a0] sm:$0xff] }
 0xb23   : > { %3633 = vst.msk [vmem:[#allocation3 + $0x30] sm:$0xff] %vm3626_vm7, %v3616_v2  ;;  %3681 = vst.msk [vmem:[#allocation3 + $0x1b0] sm:$0xff] %vm3626_vm7, %v3568_v37  ;;  %6250 = vmatmul.mubr.msk.f32.gmra.mrb[38].mxu1 %vm1480_vm2, %v3995_v51  ;;  %v5072_v51 = vld [vmem:[%s9121_s6 + $0x30] sm:$0xff]  ;;  %v5074_v53 = vld [vmem:[%s9121_s6 + $0x40] sm:$0xff] }
 0xb24   : > { %6260 = vmatprep.mubr.msk.f32.mxu1 %vm1480_vm2, %v4138_v18  ;;  %v3480_v60 = vadd.f32 %v3464_v40, %v3448_v30  ;;  %v1451_v28 = vpop.permute.xlu1 %1450  ;;  %v3585_v57 = vld [vmem:[#allocation3 + $0xb8] sm:$0xff]  ;;  %6537 = vmatpush3.bf16.msra.mxu0 %v6534_v44  ;;  %v6542_v37 = vpack.c.bf16 %v5073_v32, %v5072_v51  ;;  %v5075_v18 = vld [vmem:[%s9121_s6 + $0x48] sm:$0xff]  ;;  %v5076_v30 = vld [vmem:[%s9121_s6 + $0x50] sm:$0xff] }
 0xb25   : > { %v3617_v43 = vld [vmem:[#allocation3 + $0x1b8] sm:$0xff]  ;;  %1490 = vst.msk [vmem:[#allocation3 + $0x48] sm:$0xff] %vm1480_vm2, %v1451_v28  ;;  %v2827_v4 = vpop.permute.xlu0 %2826  ;;  %6539 = vmatprep.subr.bf16.mxu0 %v6538_v27  ;;  %v5743_v23 = vld [vmem:[%s9119_s4 + $0xe0] sm:$0xff] }
 0xb26   : > { %v4139_v6 = vld [vmem:[#allocation3 + $0x28] sm:$0xff]  ;;  %3634 = vst.msk [vmem:[#allocation3 + $0x38] sm:$0xff] %vm3626_vm7, %v3617_v43  ;;  %3682 = vst.msk [vmem:[#allocation3 + $0x1b8] sm:$0xff] %vm3626_vm7, %v3569_v45  ;;  %3527 = vrot.lane.b32.xlu0 %v3480_v60, %s7095_s20  ;;  %v5077_v60 = vld [vmem:[%s9121_s6 + $0x58] sm:$0xff] }
 0xb27   : > { %2869 = vst.msk [vmem:[#allocation3 + $0x130] sm:$0xff] %vm1480_vm2, %v2827_v4  ;;  %6261 = vmatmul.mubr.msk.f32.vlgmr.msra.gmra.mrb[32].mxu1 %vm1480_vm2, %v4139_v6  ;;  %v4145_v22 = vld [vmem:[#allocation3 + $0x1a8] sm:$0xff]  ;;  %v6550_v28 = vpack.c.bf16 %v5077_v60, %v5076_v30 }
 0xb28   : > { %6263 = vmatprep.mubr.msk.f32.mxu1 %vm1480_vm2, %v4140_v50  ;;  %6493 = vmatpush3.bf16.msra.mxu1 %v6490_v41  ;;  %v2148_v54 = vpop.permute.xlu1 %2147  ;;  %v367_v41 = vld [vmem:[%s9123_s8 + $0x5] sm:$0x1] }
 0xb29   : > { %6495 = vmatprep.subr.bf16.mxu1 %v6494_v9  ;;  %2188 = vst.msk [vmem:[#allocation3 + $0xc0] sm:$0xff] %vm1480_vm2, %v2148_v54  ;;  %v2829_v10 = vpop.permute.xlu0 %2828  ;;  %6541 = vmatpush3.bf16.msra.mxu0 %v6538_v27  ;;  %v3570_v50 = vld [vmem:[#allocation3 + $0x40] sm:$0xff] }
 0xb2a   : > { %2870 = vst.msk [vmem:[#allocation3 + $0x138] sm:$0xff] %vm1480_vm2, %v2829_v10  ;;  %2842 = vrot.lane.b32.xlu0 %v9209_v1, %s7095_s20  ;;  %v4288_v5 = vld [vmem:[#allocation3 + $0x30] sm:$0xff]  ;;  %v5720_v1 = vld [vmem:[%s9119_s4 + $0xa8] sm:$0xff]  ;;  %6543 = vmatprep.subr.bf16.mxu0 %v6542_v37 }
 0xb2b   : > { %6264 = vmatmul.mubr.msk.f32.gmra.mrb[34].mxu1 %vm1480_vm2, %v4141_v61  ;;  %v8868_v31 = vpack.c.bf16 %v5720_v1, %v5719_v42  ;;  %6650 = vpush %v367_v41  ;;  %v4294_v8 = vld [vmem:[#allocation3 + $0x1b0] sm:$0xff] }
 0xb2c   : > { %6266 = vmatprep.mubr.msk.f32.mxu1 %vm1480_vm2, %v4142_v21  ;;  %6497 = vmatpush3.bf16.msra.mxu1 %v6494_v9  ;;  %v2150_v11 = vpop.permute.xlu1 %2149  ;;  %v3571_v10 = vld [vmem:[#allocation3 + $0x48] sm:$0xff] }
 0xb2d   : > { %6499 = vmatprep.subr.bf16.mxu1 %v6498_v46  ;;  %2189 = vst.msk [vmem:[#allocation3 + $0xc8] sm:$0xff] %vm1480_vm2, %v2150_v11  ;;  %v2831_v29 = vpop.permute.xlu0 %2830  ;;  %v4289_v36 = vld [vmem:[#allocation3 + $0x38] sm:$0xff]  ;;  %6545 = vmatpush3.bf16.msra.mxu0 %v6542_v37  ;;  %v5721_v11 = vld [vmem:[%s9119_s4 + $0xb0] sm:$0xff] }
 0xb2e   : > { %v3600_v58 = vld [vmem:[#allocation3 + $0x130] sm:$0xff]  ;;  %2871 = vst.msk [vmem:[#allocation3 + $0x140] sm:$0xff] %vm1480_vm2, %v2831_v29  ;;  %2844 = vrot.lane.b32.xlu0 %v9210_v14, %s7095_s20  ;;  %v4295_v48 = vld [vmem:[#allocation3 + $0x1b8] sm:$0xff]  ;;  %v6546_v14 = vpack.c.bf16 %v5075_v18, %v5074_v53 }
 0xb2f   : > { %3649 = vst.msk [vmem:[#allocation3 + $0xb0] sm:$0xff] %vm3626_vm7, %v3600_v58  ;;  %3665 = vst.msk [vmem:[#allocation3 + $0x130] sm:$0xff] %vm3626_vm7, %v3584_v16  ;;  %6267 = vmatmul.mubr.msk.f32.gmra.mrb[36].mxu1 %vm1480_vm2, %v4143_v7  ;;  %v5722_v16 = vld [vmem:[%s9119_s4 + $0xb8] sm:$0xff] }
 0xb30   : > { %6269 = vmatprep.mubr.msk.f32.mxu1 %vm1480_vm2, %v4144_v38  ;;  %v1453_v49 = vpop.permute.xlu1 %1452  ;;  %v3586_v62 = vld [vmem:[#allocation3 + $0xc0] sm:$0xff]  ;;  %6547 = vmatprep.subr.bf16.mxu0 %v6546_v14  ;;  %v6510_v38 = vpack.c.bf16 %v5722_v16, %v5721_v11 }
 0xb31   : > { %v3601_v52 = vld [vmem:[#allocation3 + $0x138] sm:$0xff]  ;;  %1491 = vst.msk [vmem:[#allocation3 + $0x50] sm:$0xff] %vm1480_vm2, %v1453_v49  ;;  %6549 = vmatpush3.bf16.msra.mxu0 %v6546_v14  ;;  %v5731_v49 = vld [vmem:[%s9119_s4 + $0xc0] sm:$0xff] }
 0xb32   : > { %3650 = vst.msk [vmem:[#allocation3 + $0xb8] sm:$0xff] %vm3626_vm7, %v3601_v52  ;;  %3666 = vst.msk [vmem:[#allocation3 + $0x138] sm:$0xff] %vm3626_vm7, %v3585_v57  ;;  %6551 = vmatprep.subr.bf16.mxu0 %v6550_v28 }
 0xb33   : > { %6270 = vmatmul.mubr.msk.f32.gmra.mrb[38].mxu1 %vm1480_vm2, %v4145_v22 }
 0xb34   : > { %6280 = vmatprep.mubr.msk.f32.mxu1 %vm1480_vm2, %v4288_v5  ;;  %v1455_v63 = vpop.permute.xlu1 %1454  ;;  %v3587_v58 = vld [vmem:[#allocation3 + $0xc8] sm:$0xff] }
 0xb35   : > { %v3602_v25 = vld [vmem:[#allocation3 + $0x140] sm:$0xff]  ;;  %1492 = vst.msk [vmem:[#allocation3 + $0x58] sm:$0xff] %vm1480_vm2, %v1455_v63  ;;  %6553 = vmatpush3.bf16.msra.mxu0 %v6550_v28  ;;  %v6514_v63 = vpack.c.bf16 %v5732_v47, %v5731_v49 }
 0xb36   : > { %v4290_v17 = vld [vmem:[#allocation3 + $0xb0] sm:$0xff]  ;;  %3651 = vst.msk [vmem:[#allocation3 + $0xc0] sm:$0xff] %vm3626_vm7, %v3602_v25  ;;  %3667 = vst.msk [vmem:[#allocation3 + $0x140] sm:$0xff] %vm3626_vm7, %v3586_v62 }
 0xb37   : > { %6281 = vmatmul.mubr.msk.f32.vlgmr.msra.gmra.mrb[32].mxu1 %vm1480_vm2, %v4289_v36  ;;  %v4292_v33 = vld [vmem:[#allocation3 + $0x130] sm:$0xff] }
 0xb38   : > { %6283 = vmatprep.mubr.msk.f32.mxu1 %vm1480_vm2, %v4290_v17  ;;  %6501 = vmatpush3.bf16.msra.mxu1 %v6498_v46  ;;  %v2152_v59 = vpop.permute.xlu1 %2151  ;;  %v3572_v20 = vld [vmem:[#allocation3 + $0x50] sm:$0xff] }
 0xb39   : > { %6503 = vmatprep.subr.bf16.mxu1 %v6502_v56  ;;  %2190 = vst.msk [vmem:[#allocation3 + $0xd0] sm:$0xff] %vm1480_vm2, %v2152_v59  ;;  %v4291_v26 = vld [vmem:[#allocation3 + $0xb8] sm:$0xff] }
 0xb3a   : > { %v4293_v39 = vld [vmem:[#allocation3 + $0x138] sm:$0xff] }
 0xb3b   : > { %6284 = vmatmul.mubr.msk.f32.gmra.mrb[34].mxu1 %vm1480_vm2, %v4291_v26 }
 0xb3c   : > { %6286 = vmatprep.mubr.msk.f32.mxu1 %vm1480_vm2, %v4292_v33  ;;  %6505 = vmatpush3.bf16.msra.mxu1 %v6502_v56  ;;  %v2154_v13 = vpop.permute.xlu1 %2153  ;;  %v3573_v25 = vld [vmem:[#allocation3 + $0x58] sm:$0xff]  ;;  %v5733_v33 = vld [vmem:[%s9119_s4 + $0xd0] sm:$0xff] }
 0xb3d   : > { %6507 = vmatprep.subr.bf16.mxu1 %v8868_v31  ;;  %2191 = vst.msk [vmem:[#allocation3 + $0xd8] sm:$0xff] %vm1480_vm2, %v2154_v13  ;;  %v4440_v22 = vld [vmem:[#allocation3 + $0xc0] sm:$0xff]  ;;  %v6518_v12 = vpack.c.bf16 %v5734_v15, %v5733_v33  ;;  %v5744_v13 = vld [vmem:[%s9119_s4 + $0xe8] sm:$0xff]  ;;  %v5081_v33 = vld [vmem:[%s9121_s6 + $0x78] sm:$0xff] }
 0xb3e   : > { %v4442_v56 = vld [vmem:[#allocation3 + $0x140] sm:$0xff]  ;;  %v5220_v15 = vld [vmem:[%s9122_s7 + $0x8] sm:$0xff] }
 0xb3f   : > { %6287 = vmatmul.mubr.msk.f32.gmra.mrb[36].mxu1 %vm1480_vm2, %v4293_v39 }
 0xb40   : > { %6289 = vmatprep.mubr.msk.f32.mxu1 %vm1480_vm2, %v4294_v8  ;;  %v1457_v19 = vpop.permute.xlu1 %1456  ;;  %v3588_v41 = vld [vmem:[#allocation3 + $0xd0] sm:$0xff]  ;;  %v6522_v8 = vpack.c.bf16 %v5744_v13, %v5743_v23  ;;  %v5653_v23 = vld [vmem:[%s9123_s8 + $0x2] ss:$0 sm:$0xff] }
 0xb41   : > { %1493 = vst.msk [vmem:[#allocation3 + $0x60] sm:$0xff] %vm1480_vm2, %v1457_v19 }
 0xb43   : > { %6290 = vmatmul.mubr.msk.f32.gmra.mrb[38].mxu1 %vm1480_vm2, %v4295_v48 }
 0xb44   : > { %v1459_v2 = vpop.permute.xlu1 %1458  ;;  %v3589_v44 = vld [vmem:[#allocation3 + $0xd8] sm:$0xff] }
 0xb45   : > { %1494 = vst.msk [vmem:[#allocation3 + $0x68] sm:$0xff] %vm1480_vm2, %v1459_v2 }
 0xb48   : > { %v2156_v40 = vpop.permute.xlu1 %2155  ;;  %v3574_v48 = vld [vmem:[#allocation3 + $0x60] sm:$0xff] }
 0xb49   : > { %2192 = vst.msk [vmem:[#allocation3 + $0xe0] sm:$0xff] %vm1480_vm2, %v2156_v40 }
 0xb4c   : > { %v2158_v9 = vpop.permute.xlu1 %2157  ;;  %v3575_v14 = vld [vmem:[#allocation3 + $0x68] sm:$0xff] }
 0xb4d   : > { %2193 = vst.msk [vmem:[#allocation3 + $0xe8] sm:$0xff] %vm1480_vm2, %v2158_v9 }
 0xb50   : > { %v1461_v24 = vpop.permute.xlu1 %1460  ;;  %v3590_v27 = vld [vmem:[#allocation3 + $0xe0] sm:$0xff] }
 0xb51   : > { %1495 = vst.msk [vmem:[#allocation3 + $0x70] sm:$0xff] %vm1480_vm2, %v1461_v24  ;;  %v5745_v24 = vld [vmem:[%s9119_s4 + $0xf0] sm:$0xff] }
 0xb54   : > { %v1463_v55 = vpop.permute.xlu1 %1462  ;;  %v3591_v9 = vld [vmem:[#allocation3 + $0xe8] sm:$0xff] }
 0xb55   : > { %1496 = vst.msk [vmem:[#allocation3 + $0x78] sm:$0xff] %vm1480_vm2, %v1463_v55  ;;  %v5746_v55 = vld [vmem:[%s9119_s4 + $0xf8] sm:$0xff] }
 0xb58   : > { %v2160_v45 = vpop.permute.xlu1 %2159 }
 0xb59   : > { %2194 = vst.msk [vmem:[#allocation3 + $0xf0] sm:$0xff] %vm1480_vm2, %v2160_v45 }
 0xb5a   : > { %v3514_v43 = vpop.permute.xlu0 %3513 }
 0xb5b   : > { %3554 = vst.msk [vmem:[#allocation3 + $0x1c0] sm:$0xff] %vm1480_vm2, %v3514_v43 }
 0xb5c   : > { %v2162_v4 = vpop.permute.xlu1 %2161  ;;  %s6651_s16 = spop %6650 }
 0xb5d   : > { %2195 = vst.msk [vmem:[#allocation3 + $0xf8] sm:$0xff] %vm1480_vm2, %v2162_v4 }
 0xb5e   : > { %v3516_v6 = vpop.permute.xlu0 %3515 }
 0xb5f   : > { %3555 = vst.msk [vmem:[#allocation3 + $0x1c8] sm:$0xff] %vm1480_vm2, %v3516_v6  ;;  %v6526_v6 = vpack.c.bf16 %v5746_v55, %v5745_v24 }
 0xb62   : > { %v3618_v54 = vld [vmem:[#allocation3 + $0x1c0] sm:$0xff]  ;;  %v2833_v46 = vpop.permute.xlu0 %2832 }
 0xb63   : > { %3635 = vst.msk [vmem:[#allocation3 + $0x40] sm:$0xff] %vm3626_vm7, %v3618_v54  ;;  %3683 = vst.msk [vmem:[#allocation3 + $0x1c0] sm:$0xff] %vm3626_vm7, %v3570_v50  ;;  %v3576_v50 = vld [vmem:[#allocation3 + $0x70] sm:$0xff] }
 0xb64   : > { %2872 = vst.msk [vmem:[#allocation3 + $0x148] sm:$0xff] %vm1480_vm2, %v2833_v46 }
 0xb66   : > { %v3619_v61 = vld [vmem:[#allocation3 + $0x1c8] sm:$0xff]  ;;  %v3518_v21 = vpop.permute.xlu0 %3517 }
 0xb67   : > { %3636 = vst.msk [vmem:[#allocation3 + $0x48] sm:$0xff] %vm3626_vm7, %v3619_v61  ;;  %3684 = vst.msk [vmem:[#allocation3 + $0x1c8] sm:$0xff] %vm3626_vm7, %v3571_v10 }
 0xb68   : > { %3556 = vst.msk [vmem:[#allocation3 + $0x1d0] sm:$0xff] %vm1480_vm2, %v3518_v21 }
 0xb6a   : > { %v4438_v7 = vld [vmem:[#allocation3 + $0x40] sm:$0xff] }
 0xb6b   : > { %v3603_v29 = vld [vmem:[#allocation3 + $0x148] sm:$0xff]  ;;  %6300 = vmatprep.mubr.msk.f32.mxu1 %vm1480_vm2, %v4438_v7  ;;  %v4444_v62 = vld [vmem:[#allocation3 + $0x1c0] sm:$0xff]  ;;  %v3577_v7 = vld [vmem:[#allocation3 + $0x78] sm:$0xff] }
 0xb6c   : > { %3652 = vst.msk [vmem:[#allocation3 + $0xc8] sm:$0xff] %vm3626_vm7, %v3603_v29  ;;  %3668 = vst.msk [vmem:[#allocation3 + $0x148] sm:$0xff] %vm3626_vm7, %v3587_v58 }
 0xb6e   : > { %v4439_v52 = vld [vmem:[#allocation3 + $0x48] sm:$0xff] }
 0xb6f   : > { %v3620_v57 = vld [vmem:[#allocation3 + $0x1d0] sm:$0xff]  ;;  %6301 = vmatmul.mubr.msk.f32.vlgmr.msra.gmra.mrb[32].mxu1 %vm1480_vm2, %v4439_v52 }
 0xb70   : > { %3637 = vst.msk [vmem:[#allocation3 + $0x50] sm:$0xff] %vm3626_vm7, %v3620_v57  ;;  %3685 = vst.msk [vmem:[#allocation3 + $0x1d0] sm:$0xff] %vm3626_vm7, %v3572_v20  ;;  %v3520_v5 = vpop.permute.xlu0 %3519  ;;  %6303 = vmatprep.mubr.msk.f32.mxu1 %vm1480_vm2, %v4440_v22  ;;  %6509 = vmatpush3.bf16.msra.mxu1 %v8868_v31  ;;  %v4445_v31 = vld [vmem:[#allocation3 + $0x1c8] sm:$0xff]  ;;  %v3592_v57 = vld [vmem:[#allocation3 + $0xf0] sm:$0xff] }
 0xb71   : > { %3557 = vst.msk [vmem:[#allocation3 + $0x1d8] sm:$0xff] %vm1480_vm2, %v3520_v5  ;;  %6511 = vmatprep.subr.bf16.mxu1 %v6510_v38  ;;  %v3593_v22 = vld [vmem:[#allocation3 + $0xf8] sm:$0xff] }
 0xb73   : > { %v4441_v36 = vld [vmem:[#allocation3 + $0xc8] sm:$0xff] }
 0xb74   : > { %6304 = vmatmul.mubr.msk.f32.gmra.mrb[34].mxu1 %vm1480_vm2, %v4441_v36  ;;  %v2835_v42 = vpop.permute.xlu0 %2834  ;;  %v4443_v1 = vld [vmem:[#allocation3 + $0x148] sm:$0xff] }
 0xb75   : > { %6306 = vmatprep.mubr.msk.f32.mxu1 %vm1480_vm2, %v4442_v56  ;;  %6513 = vmatpush3.bf16.msra.mxu1 %v6510_v38  ;;  %2873 = vst.msk [vmem:[#allocation3 + $0x150] sm:$0xff] %vm1480_vm2, %v2835_v42 }
 0xb76   : > { %6515 = vmatprep.subr.bf16.mxu1 %v6514_v63 }
 0xb77   : > { %v4588_v26 = vld [vmem:[#allocation3 + $0x50] sm:$0xff] }
 0xb78   : > { %6307 = vmatmul.mubr.msk.f32.gmra.mrb[36].mxu1 %vm1480_vm2, %v4443_v1  ;;  %v3621_v17 = vld [vmem:[#allocation3 + $0x1d8] sm:$0xff]  ;;  %v2837_v59 = vpop.permute.xlu0 %2836  ;;  %v4594_v28 = vld [vmem:[#allocation3 + $0x1d0] sm:$0xff] }
 0xb79   : > { %6309 = vmatprep.mubr.msk.f32.mxu1 %vm1480_vm2, %v4444_v62  ;;  %3638 = vst.msk [vmem:[#allocation3 + $0x58] sm:$0xff] %vm3626_vm7, %v3621_v17  ;;  %3686 = vst.msk [vmem:[#allocation3 + $0x1d8] sm:$0xff] %vm3626_vm7, %v3573_v25  ;;  %v5078_v17 = vld [vmem:[%s9121_s6 + $0x60] sm:$0xff] }
 0xb7a   : > { %2874 = vst.msk [vmem:[#allocation3 + $0x158] sm:$0xff] %vm1480_vm2, %v2837_v59  ;;  %v5079_v59 = vld [vmem:[%s9121_s6 + $0x68] sm:$0xff] }
 0xb7c   : > { %6310 = vmatmul.mubr.msk.f32.gmra.mrb[38].mxu1 %vm1480_vm2, %v4445_v31  ;;  %v3604_v35 = vld [vmem:[#allocation3 + $0x150] sm:$0xff]  ;;  %v2839_v34 = vpop.permute.xlu0 %2838  ;;  %v6554_v31 = vpack.c.bf16 %v5079_v59, %v5078_v17 }
 0xb7d   : > { %6320 = vmatprep.mubr.msk.f32.mxu1 %vm1480_vm2, %v4588_v26  ;;  %3653 = vst.msk [vmem:[#allocation3 + $0xd0] sm:$0xff] %vm3626_vm7, %v3604_v35  ;;  %3669 = vst.msk [vmem:[#allocation3 + $0x150] sm:$0xff] %vm3626_vm7, %v3588_v41  ;;  %v5080_v26 = vld [vmem:[%s9121_s6 + $0x70] sm:$0xff]  ;;  %v368_v35 = vld [vmem:[%s9123_s8 + $0x6] sm:$0x1] }
 0xb7e   : > { %2875 = vst.msk [vmem:[#allocation3 + $0x160] sm:$0xff] %vm1480_vm2, %v2839_v34  ;;  %6555 = vmatprep.subr.bf16.mxu0 %v6554_v31  ;;  %v6558_v41 = vpack.c.bf16 %v5081_v33, %v5080_v26  ;;  %v5219_v34 = vld [vmem:[%s9122_s7] sm:$0xff] }
 0xb7f   : > { %6557 = vmatpush3.bf16.msra.mxu0 %v6554_v31  ;;  %6652 = vpush %v368_v35 }
 0xb80   : > { %v3522_v0 = vpop.permute.xlu0 %3521  ;;  %v4589_v39 = vld [vmem:[#allocation3 + $0x58] sm:$0xff]  ;;  %6559 = vmatprep.subr.bf16.mxu0 %v6558_v41 }
 0xb81   : > { %v3605_v3 = vld [vmem:[#allocation3 + $0x158] sm:$0xff]  ;;  %3558 = vst.msk [vmem:[#allocation3 + $0x1e0] sm:$0xff] %vm1480_vm2, %v3522_v0  ;;  %6321 = vmatmul.mubr.msk.f32.vlgmr.msra.gmra.mrb[32].mxu1 %vm1480_vm2, %v4589_v39 }
 0xb82   : > { %3654 = vst.msk [vmem:[#allocation3 + $0xd8] sm:$0xff] %vm3626_vm7, %v3605_v3  ;;  %3670 = vst.msk [vmem:[#allocation3 + $0x158] sm:$0xff] %vm3626_vm7, %v3589_v44  ;;  %6517 = vmatpush3.bf16.msra.mxu1 %v6514_v63  ;;  %v4595_v43 = vld [vmem:[#allocation3 + $0x1d8] sm:$0xff]  ;;  %v5048_v44 = vstv %s6651_s16 }
 0xb83   : > { %6519 = vmatprep.subr.bf16.mxu1 %v6518_v12  ;;  %6561 = vmatpush3.bf16.msra.mxu0 %v6558_v41 }
 0xb84   : > { %v3524_v51 = vpop.permute.xlu0 %3523  ;;  %v4590_v32 = vld [vmem:[#allocation3 + $0xd0] sm:$0xff] }
 0xb85   : > { %v3606_v19 = vld [vmem:[#allocation3 + $0x160] sm:$0xff]  ;;  %3559 = vst.msk [vmem:[#allocation3 + $0x1e8] sm:$0xff] %vm1480_vm2, %v3524_v51  ;;  %6323 = vmatprep.mubr.msk.f32.mxu1 %vm1480_vm2, %v4590_v32  ;;  %v4592_v18 = vld [vmem:[#allocation3 + $0x150] sm:$0xff] }
 0xb86   : > { %3655 = vst.msk [vmem:[#allocation3 + $0xe0] sm:$0xff] %vm3626_vm7, %v3606_v19  ;;  %3671 = vst.msk [vmem:[#allocation3 + $0x160] sm:$0xff] %vm3626_vm7, %v3590_v27  ;;  %6521 = vmatpush3.bf16.msra.mxu1 %v6518_v12  ;;  %v6562_v12 = vpack.c.bf16 %v5220_v15, %v5219_v34  ;;  %v5221_v27 = vld [vmem:[%s9122_s7 + $0x10] sm:$0xff]  ;;  %v5222_v19 = vld [vmem:[%s9122_s7 + $0x18] sm:$0xff] }
 0xb87   : > { %6523 = vmatprep.subr.bf16.mxu1 %v6522_v8 }
 0xb88   : > { %v3622_v37 = vld [vmem:[#allocation3 + $0x1e0] sm:$0xff]  ;;  %v2841_v2 = vpop.permute.xlu0 %2840  ;;  %6563 = vmatprep.subr.bf16.mxu0 %v6562_v12 }
 0xb89   : > { %v4591_v53 = vld [vmem:[#allocation3 + $0xd8] sm:$0xff]  ;;  %3639 = vst.msk [vmem:[#allocation3 + $0x60] sm:$0xff] %vm3626_vm7, %v3622_v37  ;;  %3687 = vst.msk [vmem:[#allocation3 + $0x1e0] sm:$0xff] %vm3626_vm7, %v3574_v48  ;;  %v6566_v48 = vpack.c.bf16 %v5222_v19, %v5221_v27 }
 0xb8a   : > { %2876 = vst.msk [vmem:[#allocation3 + $0x168] sm:$0xff] %vm1480_vm2, %v2841_v2  ;;  %6324 = vmatmul.mubr.msk.f32.gmra.mrb[34].mxu1 %vm1480_vm2, %v4591_v53  ;;  %v4593_v60 = vld [vmem:[#allocation3 + $0x158] sm:$0xff] }
 0xb8b   : > { %6326 = vmatprep.mubr.msk.f32.mxu1 %vm1480_vm2, %v4592_v18 }
 0xb8c   : > { %v3623_v40 = vld [vmem:[#allocation3 + $0x1e8] sm:$0xff]  ;;  %v3526_v30 = vpop.permute.xlu0 %3525 }
 0xb8d   : > { %3640 = vst.msk [vmem:[#allocation3 + $0x68] sm:$0xff] %vm3626_vm7, %v3623_v40  ;;  %3688 = vst.msk [vmem:[#allocation3 + $0x1e8] sm:$0xff] %vm3626_vm7, %v3575_v14  ;;  %v4740_v10 = vld [vmem:[#allocation3 + $0xe0] sm:$0xff] }
 0xb8e   : > { %3560 = vst.msk [vmem:[#allocation3 + $0x1f0] sm:$0xff] %vm1480_vm2, %v3526_v30  ;;  %6327 = vmatmul.mubr.msk.f32.gmra.mrb[36].mxu1 %vm1480_vm2, %v4593_v60  ;;  %v4742_v11 = vld [vmem:[#allocation3 + $0x160] sm:$0xff] }
 0xb8f   : > { %6329 = vmatprep.mubr.msk.f32.mxu1 %vm1480_vm2, %v4594_v28 }
 0xb90   : > { %v4738_v4 = vld [vmem:[#allocation3 + $0x60] sm:$0xff] }
 0xb91   : > { %v3607_v45 = vld [vmem:[#allocation3 + $0x168] sm:$0xff]  ;;  %v4744_v29 = vld [vmem:[#allocation3 + $0x1e0] sm:$0xff] }
 0xb92   : > { %3656 = vst.msk [vmem:[#allocation3 + $0xe8] sm:$0xff] %vm3626_vm7, %v3607_v45  ;;  %3672 = vst.msk [vmem:[#allocation3 + $0x168] sm:$0xff] %vm3626_vm7, %v3591_v9  ;;  %6330 = vmatmul.mubr.msk.f32.gmra.mrb[38].mxu1 %vm1480_vm2, %v4595_v43 }
 0xb93   : > { %6340 = vmatprep.mubr.msk.f32.mxu1 %vm1480_vm2, %v4738_v4 }
 0xb94   : > { %v4739_v46 = vld [vmem:[#allocation3 + $0x68] sm:$0xff] }
 0xb95   : > { %v3624_v54 = vld [vmem:[#allocation3 + $0x1f0] sm:$0xff]  ;;  %v4745_v47 = vld [vmem:[#allocation3 + $0x1e8] sm:$0xff] }
 0xb96   : > { %3641 = vst.msk [vmem:[#allocation3 + $0x70] sm:$0xff] %vm3626_vm7, %v3624_v54  ;;  %3689 = vst.msk [vmem:[#allocation3 + $0x1f0] sm:$0xff] %vm3626_vm7, %v3576_v50  ;;  %6341 = vmatmul.mubr.msk.f32.vlgmr.msra.gmra.mrb[32].mxu1 %vm1480_vm2, %v4739_v46 }
 0xb97   : > { %6343 = vmatprep.mubr.msk.f32.mxu1 %vm1480_vm2, %v4740_v10  ;;  %6525 = vmatpush3.bf16.msra.mxu1 %v6522_v8 }
 0xb98   : > { %6527 = vmatprep.subr.bf16.mxu1 %v6526_v6  ;;  %v3528_v61 = vpop.permute.xlu0 %3527 }
 0xb99   : > { %v4741_v21 = vld [vmem:[#allocation3 + $0xe8] sm:$0xff]  ;;  %3561 = vst.msk [vmem:[#allocation3 + $0x1f8] sm:$0xff] %vm1480_vm2, %v3528_v61 }
 0xb9a   : > { %6344 = vmatmul.mubr.msk.f32.gmra.mrb[34].mxu1 %vm1480_vm2, %v4741_v21  ;;  %v4743_v58 = vld [vmem:[#allocation3 + $0x168] sm:$0xff] }
 0xb9b   : > { %6346 = vmatprep.mubr.msk.f32.mxu1 %vm1480_vm2, %v4742_v11  ;;  %6529 = vmatpush3.bf16.msra.mxu1 %v6526_v6 }
 0xb9c   : > { %v2843_v16 = vpop.permute.xlu0 %2842 }
 0xb9d   : > { %2877 = vst.msk [vmem:[#allocation3 + $0x170] sm:$0xff] %vm1480_vm2, %v2843_v16  ;;  %v4888_v20 = vld [vmem:[#allocation3 + $0x70] sm:$0xff] }
 0xb9e   : > { %6347 = vmatmul.mubr.msk.f32.gmra.mrb[36].mxu1 %vm1480_vm2, %v4743_v58  ;;  %v4894_v62 = vld [vmem:[#allocation3 + $0x1f0] sm:$0xff] }
 0xb9f   : > { %6349 = vmatprep.mubr.msk.f32.mxu1 %vm1480_vm2, %v4744_v29  ;;  %v5223_v29 = vld [vmem:[%s9122_s7 + $0x20] sm:$0xff] }
 0xba0   : > { %v3625_v38 = vld [vmem:[#allocation3 + $0x1f8] sm:$0xff]  ;;  %v2845_v49 = vpop.permute.xlu0 %2844 }
 0xba1   : > { %3642 = vst.msk [vmem:[#allocation3 + $0x78] sm:$0xff] %vm3626_vm7, %v3625_v38  ;;  %3690 = vst.msk [vmem:[#allocation3 + $0x1f8] sm:$0xff] %vm3626_vm7, %v3577_v7  ;;  %v5224_v7 = vld [vmem:[%s9122_s7 + $0x28] sm:$0xff] }
 0xba2   : > { %2878 = vst.msk [vmem:[#allocation3 + $0x178] sm:$0xff] %vm1480_vm2, %v2845_v49  ;;  %6350 = vmatmul.mubr.msk.f32.gmra.mrb[38].mxu1 %vm1480_vm2, %v4745_v47  ;;  %v6570_v38 = vpack.c.bf16 %v5224_v7, %v5223_v29  ;;  %v5225_v49 = vld [vmem:[%s9122_s7 + $0x30] sm:$0xff]  ;;  %v5226_v47 = vld [vmem:[%s9122_s7 + $0x38] sm:$0xff] }
 0xba3   : > { %6360 = vmatprep.mubr.msk.f32.mxu1 %vm1480_vm2, %v4888_v20  ;;  %v6574_v20 = vpack.c.bf16 %v5226_v47, %v5225_v49 }
 0xba4   : > { %v3608_v52 = vld [vmem:[#allocation3 + $0x170] sm:$0xff] }
 0xba5   : > { %3657 = vst.msk [vmem:[#allocation3 + $0xf0] sm:$0xff] %vm3626_vm7, %v3608_v52  ;;  %3673 = vst.msk [vmem:[#allocation3 + $0x170] sm:$0xff] %vm3626_vm7, %v3592_v57  ;;  %v5755_v57 = vld [vmem:[%s9123_s8 + $0x3] ss:$0 sm:$0xff] }
 0xba8   : > { %v4889_v63 = vld [vmem:[#allocation3 + $0x78] sm:$0xff] }
 0xba9   : > { %v3609_v5 = vld [vmem:[#allocation3 + $0x178] sm:$0xff]  ;;  %6361 = vmatmul.mubr.msk.f32.vlgmr.msra.gmra.mrb[32].mxu1 %vm1480_vm2, %v4889_v63 }
 0xbaa   : > { %3658 = vst.msk [vmem:[#allocation3 + $0xf8] sm:$0xff] %vm3626_vm7, %v3609_v5  ;;  %3674 = vst.msk [vmem:[#allocation3 + $0x178] sm:$0xff] %vm3626_vm7, %v3593_v22  ;;  %v4895_v25 = vld [vmem:[#allocation3 + $0x1f8] sm:$0xff] }
 0xbac   : > { %v4890_v36 = vld [vmem:[#allocation3 + $0xf0] sm:$0xff] }
 0xbad   : > { %6363 = vmatprep.mubr.msk.f32.mxu1 %vm1480_vm2, %v4890_v36  ;;  %v4892_v42 = vld [vmem:[#allocation3 + $0x170] sm:$0xff] }
 0xbb0   : > { %s6653_s13 = spop %6652 }
 0xbb1   : > { %v4891_v56 = vld [vmem:[#allocation3 + $0xf8] sm:$0xff]  ;;  %v5201_v22 = vstv %s6653_s13 }
 0xbb2   : > { %6364 = vmatmul.mubr.msk.f32.gmra.mrb[34].mxu1 %vm1480_vm2, %v4891_v56  ;;  %v4893_v1 = vld [vmem:[#allocation3 + $0x178] sm:$0xff] }
 0xbb3   : > { %6366 = vmatprep.mubr.msk.f32.mxu1 %vm1480_vm2, %v4892_v42 }
 0xbb6   : > { %6367 = vmatmul.mubr.msk.f32.gmra.mrb[36].mxu1 %vm1480_vm2, %v4893_v1 }
 0xbb7   : > { %6369 = vmatprep.mubr.msk.f32.mxu1 %vm1480_vm2, %v4894_v62 }
 0xbba   : > { %6370 = vmatmul.mubr.msk.f32.gmra.mrb[38].mxu1 %vm1480_vm2, %v4895_v25 }
 0xc7c   : > { %v6362_v13 = vpop.f32.mrb[32].mxu1 }
 0xc7d   : > { %v6578_v3 = vadd.f32 %v6362_v13, %v5653_v23  ;;  %v4991_v0 = vpop.f32.mrb[33].mxu1 }
 0xc7e   : > { %v6579_v39 = vadd.f32 %v5653_v23, %v4991_v0 }
 0xc7f   : > { %v5051_v8 = vmul.f32 %v6578_v3, %v5048_v44  ;;  %vm5039_vm8 = vcmp.ge.f32.partialorder %v6578_v3, 0.0 }
 0xc80   : > { %vm5038_vm9 = vcmp.ge.f32.partialorder %v6579_v39, 0.0  ;;  %v5050_v51 = vmul.f32 %v6579_v39, %v5048_v44 }
 0xc81   : > { %v5059_v37 = vsel %vm5039_vm8, %v6578_v3, %v5051_v8 }
 0xc82   : > { %v5058_v32 = vsel %vm5038_vm9, %v6579_v39, %v5050_v51 }
 0xc83   : > { %6404 = vmatprep.mubr.f32.mxu0 %v5058_v32 }
 0xc84   : > { %6405 = vmatmul.mubr.f32.vlgmr.msra.gmra.mrb[80].mxu0 %v5059_v37 }
 0xc85   : > { %v6365_v2 = vpop.f32.mrb[34].mxu1  ;;  %6565 = vmatpush3.bf16.msra.mxu0 %v6562_v12 }
 0xc86   : > { %v6580_v53 = vadd.f32 %v6365_v2, %v5653_v23  ;;  %v5001_v18 = vpop.f32.mrb[35].mxu1  ;;  %6567 = vmatprep.subr.bf16.mxu0 %v6566_v48  ;;  %v5756_v2 = vld [vmem:[%s9123_s8 + $0x4] ss:$0 sm:$0xff] }
 0xc87   : > { %v6581_v14 = vadd.f32 %v5653_v23, %v5001_v18 }
 0xc88   : > { %v5053_v40 = vmul.f32 %v6580_v53, %v5048_v44  ;;  %vm5041_vm11 = vcmp.ge.f32.partialorder %v6580_v53, 0.0 }
 0xc89   : > { %v5052_v30 = vmul.f32 %v6581_v14, %v5048_v44  ;;  %v6368_v60 = vpop.f32.mrb[36].mxu1  ;;  %vm5040_vm10 = vcmp.ge.f32.partialorder %v6581_v14, 0.0  ;;  %6569 = vmatpush3.bf16.msra.mxu0 %v6566_v48 }
 0xc8a   : > { %v6582_v28 = vadd.f32 %v6368_v60, %v5653_v23  ;;  %v5011_v9 = vpop.f32.mrb[37].mxu1  ;;  %v5061_v43 = vsel %vm5041_vm11, %v6580_v53, %v5053_v40  ;;  %6571 = vmatprep.subr.bf16.mxu0 %v6570_v38 }
 0xc8b   : > { %v6583_v24 = vadd.f32 %v5653_v23, %v5011_v9  ;;  %v5060_v55 = vsel %vm5040_vm10, %v6581_v14, %v5052_v30 }
 0xc8c   : > { %v5055_v45 = vmul.f32 %v6582_v28, %v5048_v44  ;;  %6407 = vmatprep.mubr.f32.mxu0 %v5060_v55  ;;  %vm5043_vm13 = vcmp.ge.f32.partialorder %v6582_v28, 0.0 }
 0xc8d   : > { %v5054_v4 = vmul.f32 %v6583_v24, %v5048_v44  ;;  %v6371_v6 = vpop.f32.mrb[38].mxu1  ;;  %6408 = vmatmul.mubr.f32.gmra.mrb[82].mxu0 %v5061_v43  ;;  %vm5042_vm12 = vcmp.ge.f32.partialorder %v6583_v24, 0.0 }
 0xc8e   : > { %v6584_v50 = vadd.f32 %v6371_v6, %v5653_v23  ;;  %v5021_v54 = vpop.f32.mrb[39].mxu1  ;;  %v5063_v21 = vsel %vm5043_vm13, %v6582_v28, %v5055_v45  ;;  %6573 = vmatpush3.bf16.msra.mxu0 %v6570_v38 }
 0xc8f   : > { %v6585_v46 = vadd.f32 %v5653_v23, %v5021_v54  ;;  %v5062_v10 = vsel %vm5042_vm12, %v6583_v24, %v5054_v4  ;;  %6575 = vmatprep.subr.bf16.mxu0 %v6574_v20 }
 0xc90   : > { %v5057_v61 = vmul.f32 %v6584_v50, %v5048_v44  ;;  %6410 = vmatprep.mubr.f32.mxu0 %v5062_v10  ;;  %vm5045_vm15 = vcmp.ge.f32.partialorder %v6584_v50, 0.0 }
 0xc91   : > { %v5056_v11 = vmul.f32 %v6585_v46, %v5048_v44  ;;  %6411 = vmatmul.mubr.f32.gmra.mrb[84].mxu0 %v5063_v21  ;;  %vm5044_vm14 = vcmp.ge.f32.partialorder %v6585_v46, 0.0 }
 0xc92   : > { %v5065_v58 = vsel %vm5045_vm15, %v6584_v50, %v5057_v61  ;;  %6577 = vmatpush3.bf16.msra.mxu0 %v6574_v20 }
 0xc93   : > { %v5064_v16 = vsel %vm5044_vm14, %v6585_v46, %v5056_v11 }
 0xc94   : > { %6413 = vmatprep.mubr.f32.mxu0 %v5064_v16 }
 0xc95   : > { %6414 = vmatmul.mubr.f32.gmra.mrb[86].mxu0 %v5065_v58 }
 0xd57   : > { %v6406_v52 = vpop.f32.mrb[80].mxu0 }
 0xd58   : > { %v5158_v5 = vadd.f32 %v6406_v52, %v5755_v57  ;;  %v5152_v63 = vpop.f32.mrb[81].mxu0 }
 0xd59   : > { %v5153_v36 = vadd.f32 %v5755_v57, %v5152_v63 }
 0xd5a   : > { %v5204_v56 = vmul.f32 %v5201_v22, %v5158_v5  ;;  %vm5192_vm1 = vcmp.ge.f32.partialorder %v5158_v5, 0.0 }
 0xd5b   : > { %vm5191_vm2 = vcmp.ge.f32.partialorder %v5153_v36, 0.0  ;;  %v5203_v42 = vmul.f32 %v5201_v22, %v5153_v36 }
 0xd5c   : > { %v5212_v62 = vsel %vm5192_vm1, %v5158_v5, %v5204_v56 }
 0xd5d   : > { %v5211_v1 = vsel %vm5191_vm2, %v5153_v36, %v5203_v42 }
 0xd5e   : > { %6432 = vmatprep.mubr.msk.f32.mxu0 %vm445_vm0, %v5211_v1 }
 0xd5f   : > { %6433 = vmatmul.mubr.msk.f32.vlgmr.msra.gmra.mrb[88].mxu0 %vm445_vm0, %v5212_v62 }
 0xd60   : > { %v6409_v25 = vpop.f32.mrb[82].mxu0 }
 0xd61   : > { %v5168_v17 = vadd.f32 %v6409_v25, %v5755_v57  ;;  %v5162_v59 = vpop.f32.mrb[83].mxu0 }
 0xd62   : > { %v5163_v31 = vadd.f32 %v5755_v57, %v5162_v59 }
 0xd63   : > { %v5206_v26 = vmul.f32 %v5201_v22, %v5168_v17  ;;  %vm5194_vm3 = vcmp.ge.f32.partialorder %v5168_v17, 0.0 }
 0xd64   : > { %vm5193_vm4 = vcmp.ge.f32.partialorder %v5163_v31, 0.0  ;;  %v5205_v33 = vmul.f32 %v5201_v22, %v5163_v31  ;;  %v6412_v41 = vpop.f32.mrb[84].mxu0 }
 0xd65   : > { %v5178_v35 = vadd.f32 %v6412_v41, %v5755_v57  ;;  %v5172_v34 = vpop.f32.mrb[85].mxu0  ;;  %v5214_v13 = vsel %vm5194_vm3, %v5168_v17, %v5206_v26 }
 0xd66   : > { %v5173_v15 = vadd.f32 %v5755_v57, %v5172_v34  ;;  %v5213_v12 = vsel %vm5193_vm4, %v5163_v31, %v5205_v33 }
 0xd67   : > { %v5208_v23 = vmul.f32 %v5201_v22, %v5178_v35  ;;  %6435 = vmatprep.mubr.msk.f32.mxu0 %vm445_vm0, %v5213_v12  ;;  %vm5196_vm5 = vcmp.ge.f32.partialorder %v5178_v35, 0.0 }
 0xd68   : > { %vm5195_vm6 = vcmp.ge.f32.partialorder %v5173_v15, 0.0  ;;  %v5207_v44 = vmul.f32 %v5201_v22, %v5173_v15  ;;  %v6415_v3 = vpop.f32.mrb[86].mxu0  ;;  %6436 = vmatmul.mubr.msk.f32.gmra.mrb[90].mxu0 %vm445_vm0, %v5214_v13 }
 0xd69   : > { %v5188_v0 = vadd.f32 %v6415_v3, %v5755_v57  ;;  %v5182_v39 = vpop.f32.mrb[87].mxu0  ;;  %v5216_v51 = vsel %vm5196_vm5, %v5178_v35, %v5208_v23 }
 0xd6a   : > { %v5183_v8 = vadd.f32 %v5755_v57, %v5182_v39  ;;  %v5215_v27 = vsel %vm5195_vm6, %v5173_v15, %v5207_v44 }
 0xd6b   : > { %v5210_v19 = vmul.f32 %v5201_v22, %v5188_v0  ;;  %6438 = vmatprep.mubr.msk.f32.mxu0 %vm445_vm0, %v5215_v27  ;;  %vm5198_vm7 = vcmp.ge.f32.partialorder %v5188_v0, 0.0 }
 0xd6c   : > { %vm5197_vm8 = vcmp.ge.f32.partialorder %v5183_v8, 0.0  ;;  %v5209_v32 = vmul.f32 %v5201_v22, %v5183_v8  ;;  %6439 = vmatmul.mubr.msk.f32.gmra.mrb[92].mxu0 %vm445_vm0, %v5216_v51 }
 0xd6d   : > { %v5218_v37 = vsel %vm5198_vm7, %v5188_v0, %v5210_v19 }
 0xd6e   : > { %v5217_v48 = vsel %vm5197_vm8, %v5183_v8, %v5209_v32 }
 0xd6f   : > { %6441 = vmatprep.mubr.msk.f32.mxu0 %vm445_vm0, %v5217_v48 }
 0xd70   : > { %6442 = vmatmul.mubr.msk.f32.gmra.mrb[94].mxu0 %vm445_vm0, %v5218_v37  ;;  %vm5408_vm0 = vcmask 7168  }
 0xe32   : > { %v6434_v53 = vpop.f32.mrb[88].mxu0 }
 0xe33   : > { %v5327_v18 = vadd.f32 %v6434_v53, %v5756_v2  ;;  %v5321_v14 = vpop.f32.mrb[89].mxu0 }
 0xe34   : > { %v5322_v40 = vadd.f32 %v5756_v2, %v5321_v14 }
 0xe35   : > { %v5766_v30 = vmul.f32 -1.442695, %v5327_v18 }
 0xe36   : > { %v5765_v60 = vmul.f32 -1.442695, %v5322_v40 }
 0xe37   : > { %7051 = vpow2.f32 %v5766_v30 }
 0xe38   : > { %7053 = vpow2.f32 %v5765_v60 }
 0xe3b   : > { %v6437_v28 = vpop.f32.mrb[90].mxu0 }
 0xe3c   : > { %v5337_v9 = vadd.f32 %v6437_v28, %v5756_v2  ;;  %v5331_v24 = vpop.f32.mrb[91].mxu0 }
 0xe3d   : > { %v5332_v55 = vadd.f32 %v5756_v2, %v5331_v24 }
 0xe3e   : > { %v5768_v45 = vmul.f32 -1.442695, %v5337_v9 }
 0xe3f   : > { %v5767_v43 = vmul.f32 -1.442695, %v5332_v55  ;;  %v6440_v4 = vpop.f32.mrb[92].mxu0 }
 0xe40   : > { %7055 = vpow2.f32 %v5768_v45  ;;  %v5347_v6 = vadd.f32 %v6440_v4, %v5756_v2  ;;  %v5341_v50 = vpop.f32.mrb[93].mxu0 }
 0xe41   : > { %7057 = vpow2.f32 %v5767_v43  ;;  %v5342_v54 = vadd.f32 %v5756_v2, %v5341_v50  ;;  %v7052_v46 = vpop.eup %7051 }
 0xe42   : > { %v5770_v10 = vmul.f32 -1.442695, %v5347_v6  ;;  %v7054_v61 = vpop.eup %7053  ;;  %v5385_v21 = vadd.f32 1.0, %v7052_v46 }
 0xe43   : > { %v5769_v11 = vmul.f32 -1.442695, %v5342_v54  ;;  %v6443_v16 = vpop.f32.mrb[94].mxu0  ;;  %v5384_v58 = vadd.f32 1.0, %v7054_v61 }
 0xe44   : > { %7059 = vpow2.f32 %v5770_v10  ;;  %v5357_v29 = vadd.f32 %v6443_v16, %v5756_v2  ;;  %v5351_v7 = vpop.f32.mrb[95].mxu0 }
 0xe45   : > { %7061 = vrcp.f32 %v5385_v21  ;;  %v5352_v38 = vadd.f32 %v5756_v2, %v5351_v7 }
 0xe46   : > { %7063 = vrcp.f32 %v5384_v58  ;;  %v5772_v49 = vmul.f32 -1.442695, %v5357_v29 }
 0xe47   : > { %7065 = vpow2.f32 %v5769_v11  ;;  %v5771_v47 = vmul.f32 -1.442695, %v5352_v38 }
 0xe48   : > { %7067 = vpow2.f32 %v5772_v49 }
 0xe49   : > { %7069 = vpow2.f32 %v5771_v47 }
 0xe4a   : > { %v7056_v20 = vpop.eup %7055 }
 0xe4b   : > { %v7058_v57 = vpop.eup %7057  ;;  %v5387_v52 = vadd.f32 1.0, %v7056_v20 }
 0xe4c   : > { %v5386_v22 = vadd.f32 1.0, %v7058_v57 }
 0xe4d   : > { %7071 = vrcp.f32 %v5387_v52 }
 0xe4e   : > { %v7060_v5 = vpop.eup %7059  ;;  %7073 = vrcp.f32 %v5386_v22 }
 0xe4f   : > { %v7062_v63 = vpop.eup %7061  ;;  %v5389_v36 = vadd.f32 1.0, %v7060_v5 }
 0xe50   : > { %v7064_v56 = vpop.eup %7063  ;;  %5410 = vst.msk [vmem:[%s9094_s21 + $0x8] sm:$0xff] %vm5408_vm0, %v7062_v63 }
 0xe51   : > { %v7066_v42 = vpop.eup %7065  ;;  %5409 = vst.msk [vmem:[%s9094_s21] sm:$0xff] %vm5408_vm0, %v7064_v56  ;;  %7075 = vrcp.f32 %v5389_v36 }
 0xe52   : > { %v7068_v1 = vpop.eup %7067  ;;  %v5388_v62 = vadd.f32 1.0, %v7066_v42 }
 0xe53   : > { %v7070_v25 = vpop.eup %7069  ;;  %v5391_v17 = vadd.f32 1.0, %v7068_v1 }
 0xe54   : > { %7077 = vrcp.f32 %v5388_v62  ;;  %v5390_v59 = vadd.f32 1.0, %v7070_v25 }
 0xe55   : > { %7079 = vrcp.f32 %v5391_v17 }
 0xe56   : > { %7081 = vrcp.f32 %v5390_v59 }
 0xe57   : > { %v7072_v31 = vpop.eup %7071 }
 0xe58   : > { %v7074_v26 = vpop.eup %7073  ;;  %5412 = vst.msk [vmem:[%s9094_s21 + $0x18] sm:$0xff] %vm5408_vm0, %v7072_v31 }
 0xe59   : > { %5411 = vst.msk [vmem:[%s9094_s21 + $0x10] sm:$0xff] %vm5408_vm0, %v7074_v26 }
 0xe5b   : > { %v7076_v33 = vpop.eup %7075 }
 0xe5c   : > { %5414 = vst.msk [vmem:[%s9094_s21 + $0x28] sm:$0xff] %vm5408_vm0, %v7076_v33 }
 0xe5e   : > { %v7078_v41 = vpop.eup %7077 }
 0xe5f   : > { %v7080_v35 = vpop.eup %7079  ;;  %5413 = vst.msk [vmem:[%s9094_s21 + $0x20] sm:$0xff] %vm5408_vm0, %v7078_v41 }
 0xe60   : > { %v7082_v34 = vpop.eup %7081  ;;  %5416 = vst.msk [vmem:[%s9094_s21 + $0x38] sm:$0xff] %vm5408_vm0, %v7080_v35 }
 0xe61   : > { %5415 = vst.msk [vmem:[%s9094_s21 + $0x30] sm:$0xff] %vm5408_vm0, %v7082_v34 }
 0xe62 PF: > { %s19_s30 = sadd.s32 1, %s7092_s30  }
 0xe63   : > { %p16_p5 = scmp.ge.s32.totalorder %s19_s30, 4  }
 0xe65   :  { %18 = sbr.rel (!%p16_p5) target bundleno = 1 (0x1), region = 102 }

</bundles_post_ra>
